<compile_context>
chip_gen: v7x
topology: tpu7x:2x2x1
jax: 0.10.0
libtpu: 0.0.40
codegen_flags: <defaults>
</compile_context>

<pallas_src>
import functools
import math

import jax
import jax.numpy as jnp
from jax import lax
from jax.experimental import pallas as pl
from jax.experimental.pallas import tpu as pltpu

_LN_EPS = 1e-5
_NEG = -1e30  # finite "-inf": avoids exp(-inf - -inf) = NaN on fully-masked rows
_VMEM_LIMIT = 48 * 1024 * 1024  # fits under v7x 64 MiB; below v5e/v6e 128 MiB


def _row_tile(m, cap):
    """Largest tile <= cap that divides m (power-of-two steps), else m."""
    if m <= cap:
        return m
    t = cap
    while t >= 8:
        if m % t == 0:
            return t
        t //= 2
    return m


# ----------------------------------------------------------------------------
# Kernel 1: fused MHA sub-layer  (QKV proj -> batched attention -> O proj ->
#                                 +residual -> LayerNorm)
# ----------------------------------------------------------------------------
def _mha_ln_kernel(*refs, H, eps, has_mask, has_kpad):
    it = iter(refs)
    xq_ref = next(it)                           # (1, tq, E) f32
    xkv_ref = next(it)                          # (1, Lk, E) f32
    mask_ref = next(it) if has_mask else None   # (tq, Lk) f32 additive
    kpad_ref = next(it) if has_kpad else None   # (1, 1, Lk) f32 additive
    (wq_ref, bq_ref, wk_ref, bk_ref, wv_ref, bv_ref,
     wo_ref, bo_ref, g_ref, b_ref, o_ref) = list(it)

    xq = xq_ref[0]                              # (tq, E) f32
    xkv = xkv_ref[0]                            # (Lk, E) f32
    tq, E = xq.shape
    Dh = E // H

    xq16 = xq.astype(jnp.bfloat16)
    xkv16 = xkv.astype(jnp.bfloat16)

    # projections: bf16 operands, f32 accumulation.  1/sqrt(Dh) is already
    # folded into wq/bq at parameter-prep time.
    q = jnp.dot(xq16, wq_ref[...], preferred_element_type=jnp.float32) + bq_ref[...]
    k = jnp.dot(xkv16, wk_ref[...], preferred_element_type=jnp.float32) + bk_ref[...]
    v = jnp.dot(xkv16, wv_ref[...], preferred_element_type=jnp.float32) + bv_ref[...]

    # single bf16 cast of the full tensors, then head-batched (H, L, Dh) layout
    q16 = q.astype(jnp.bfloat16)
    k16 = k.astype(jnp.bfloat16)
    v16 = v.astype(jnp.bfloat16)
    qh = jnp.stack([q16[:, h * Dh:(h + 1) * Dh] for h in range(H)], axis=0)
    kh = jnp.stack([k16[:, h * Dh:(h + 1) * Dh] for h in range(H)], axis=0)
    vh = jnp.stack([v16[:, h * Dh:(h + 1) * Dh] for h in range(H)], axis=0)

    # batched QK^T: (H, tq, Dh) x (H, Lk, Dh) -> (H, tq, Lk), f32 accumulation
    s = jnp.einsum('hqd,hkd->hqk', qh, kh, preferred_element_type=jnp.float32)

    if has_mask and has_kpad:
        s = s + (mask_ref[...] + kpad_ref[0])[None]
    elif has_mask:
        s = s + mask_ref[...][None]
    elif has_kpad:
        s = s + kpad_ref[0][None]

    m = jnp.max(s, axis=-1, keepdims=True)
    p = jnp.exp(s - m)
    denom = jnp.sum(p, axis=-1, keepdims=True)
    p = p * pl.reciprocal(denom, approx=True)

    # batched PV: (H, tq, Lk) x (H, Lk, Dh) -> (H, tq, Dh)
    ctx_h = jnp.einsum('hqk,hkd->hqd', p.astype(jnp.bfloat16), vh,
                       preferred_element_type=jnp.float32)
    # re-assemble (tq, E) context in-register (no scratch round-trip)
    ctx = jnp.concatenate([ctx_h[h] for h in range(H)], axis=-1)

    attn_o = jnp.dot(ctx.astype(jnp.bfloat16), wo_ref[...],
                     preferred_element_type=jnp.float32) + bo_ref[...]

    # fused residual add + LayerNorm (f32 math)
    y = xq + attn_o
    mu = jnp.mean(y, axis=-1, keepdims=True)
    var = jnp.mean((y - mu) ** 2, axis=-1, keepdims=True)
    o_ref[0] = (y - mu) * lax.rsqrt(var + eps) * g_ref[...] + b_ref[...]


def mha_add_ln(xq, xkv, p, H, ln_g, ln_b, attn_mask=None, kpad_bias=None,
               eps=_LN_EPS):
    """xq: (N, Lq, E), xkv: (N, Lk, E) -> LN(xq + MHA(xq, xkv, xkv))."""
    N, Lq, E = xq.shape
    Lk = xkv.shape[1]
    assert E % H == 0
    tq = _row_tile(Lq, 256)               # query-tile grid axis

    args = [xq, xkv]
    specs = [pl.BlockSpec((1, tq, E), lambda b, qi: (b, qi, 0)),
             pl.BlockSpec((1, Lk, E), lambda b, qi: (b, 0, 0))]
    if attn_mask is not None:
        args.append(attn_mask)
        specs.append(pl.BlockSpec((tq, Lk), lambda b, qi: (qi, 0)))
    if kpad_bias is not None:
        args.append(kpad_bias)
        specs.append(pl.BlockSpec((1, 1, Lk), lambda b, qi: (b, 0, 0)))

    args += [p["wq"], p["bq"], p["wk"], p["bk"], p["wv"], p["bv"],
             p["wo"], p["bo"], ln_g, ln_b]
    for _ in range(4):
        specs.append(pl.BlockSpec((E, E), lambda b, qi: (0, 0)))
        specs.append(pl.BlockSpec((1, E), lambda b, qi: (0, 0)))
    specs.append(pl.BlockSpec((1, E), lambda b, qi: (0, 0)))
    specs.append(pl.BlockSpec((1, E), lambda b, qi: (0, 0)))

    # TODO(synk): on v7x, constant-index weight specs could use
    # pipeline_mode=pl.Buffered(1) to halve resident weight VMEM.
    kernel = functools.partial(_mha_ln_kernel, H=H, eps=eps,
                               has_mask=attn_mask is not None,
                               has_kpad=kpad_bias is not None)
    return pl.pallas_call(
        kernel,
        out_shape=jax.ShapeDtypeStruct((N, Lq, E), jnp.float32),
        grid=(N, Lq // tq),
        in_specs=specs,
        out_specs=pl.BlockSpec((1, tq, E), lambda b, qi: (b, qi, 0)),
        compiler_params=pltpu.CompilerParams(
            dimension_semantics=("parallel", "parallel"),
            vmem_limit_bytes=_VMEM_LIMIT),
    )(*args)


# ----------------------------------------------------------------------------
# Kernel 2: fused feed-forward sub-layer  (W1+ReLU -> W2 -> +res -> LN
#                                          [-> final stack LN])
# ----------------------------------------------------------------------------
def _ffn_ln_kernel(*refs, eps, has_final_ln):
    it = iter(refs)
    x_ref, w1_ref, b1_ref, w2_ref, b2_ref, g_ref, b_ref = [next(it) for _ in range(7)]
    if has_final_ln:
        g2_ref = next(it)
        b2f_ref = next(it)
    o_ref = next(it)

    x = x_ref[...]                                     # (tm, E) f32
    h = jnp.dot(x.astype(jnp.bfloat16), w1_ref[...],
                preferred_element_type=jnp.float32) + b1_ref[...]
    h = jnp.maximum(h, 0.0)
    y = jnp.dot(h.astype(jnp.bfloat16), w2_ref[...],
                preferred_element_type=jnp.float32) + b2_ref[...]
    y = x + y
    mu = jnp.mean(y, axis=-1, keepdims=True)
    var = jnp.mean((y - mu) ** 2, axis=-1, keepdims=True)
    y = (y - mu) * lax.rsqrt(var + eps) * g_ref[...] + b_ref[...]
    if has_final_ln:        # fused final encoder/decoder norm (post-norm stack)
        mu = jnp.mean(y, axis=-1, keepdims=True)
        var = jnp.mean((y - mu) ** 2, axis=-1, keepdims=True)
        y = (y - mu) * lax.rsqrt(var + eps) * g2_ref[...] + b2f_ref[...]
    o_ref[...] = y


def ffn_add_ln(x, p, ln_g, ln_b, final_g=None, final_b=None, eps=_LN_EPS):
    N, L, E = x.shape
    F = p["w1"].shape[1]
    M = N * L
    x2 = x.reshape(M, E)
    tm = _row_tile(M, 512)
    has_final = final_g is not None

    # TODO(synk): for v7x at E>=1024,F>=4096, add an F-reduction grid axis so
    # only (E,tf)/(tf,E) weight tiles are VMEM-resident.
    args = [x2, p["w1"], p["b1"], p["w2"], p["b2"], ln_g, ln_b]
    specs = [pl.BlockSpec((tm, E), lambda i: (i, 0)),
             pl.BlockSpec((E, F), lambda i: (0, 0)),
             pl.BlockSpec((1, F), lambda i: (0, 0)),
             pl.BlockSpec((F, E), lambda i: (0, 0)),
             pl.BlockSpec((1, E), lambda i: (0, 0)),
             pl.BlockSpec((1, E), lambda i: (0, 0)),
             pl.BlockSpec((1, E), lambda i: (0, 0))]
    if has_final:
        args += [final_g, final_b]
        specs += [pl.BlockSpec((1, E), lambda i: (0, 0)),
                  pl.BlockSpec((1, E), lambda i: (0, 0))]

    out = pl.pallas_call(
        functools.partial(_ffn_ln_kernel, eps=eps, has_final_ln=has_final),
        out_shape=jax.ShapeDtypeStruct((M, E), jnp.float32),
        grid=(M // tm,),
        in_specs=specs,
        out_specs=pl.BlockSpec((tm, E), lambda i: (i, 0)),
        compiler_params=pltpu.CompilerParams(
            dimension_semantics=("parallel",),
            vmem_limit_bytes=_VMEM_LIMIT),
    )(*args)
    return out.reshape(N, L, E)


# ----------------------------------------------------------------------------
# Kernel 3: tiled matmul + bias (fc_out head; vocab pre-padded to 512 lanes)
# ----------------------------------------------------------------------------
def _matmul_bias_kernel(x_ref, w_ref, b_ref, o_ref, acc_ref):
    @pl.when(pl.program_id(2) == 0)
    def _():
        acc_ref[...] = jnp.zeros_like(acc_ref)

    acc_ref[...] += jnp.dot(x_ref[...].astype(jnp.bfloat16), w_ref[...],
                            preferred_element_type=jnp.float32)

    @pl.when(pl.program_id(2) == pl.num_programs(2) - 1)
    def _():
        o_ref[...] = acc_ref[...] + b_ref[...]


def linear_head(x2, w, b, vocab_out):
    """x2: (M, K) f32, w: (K, Vp) bf16 (pre-padded), b: (1, Vp) f32."""
    M, K = x2.shape
    Vp = w.shape[1]
    tm = _row_tile(M, 256)
    tn = 512 if Vp % 512 == 0 else (256 if Vp % 256 == 0 else 128)
    tn = min(tn, Vp)
    if K <= 512:
        tk = K
    elif K % 512 == 0:
        tk = 512
    elif K % 256 == 0:
        tk = 256
    elif K % 128 == 0:
        tk = 128
    else:
        tk = K

    out = pl.pallas_call(
        _matmul_bias_kernel,
        out_shape=jax.ShapeDtypeStruct((M, Vp), jnp.float32),
        grid=(M // tm, Vp // tn, K // tk),
        in_specs=[
            pl.BlockSpec((tm, tk), lambda i, j, k: (i, k)),
            pl.BlockSpec((tk, tn), lambda i, j, k: (k, j)),
            pl.BlockSpec((1, tn), lambda i, j, k: (0, j)),
        ],
        out_specs=pl.BlockSpec((tm, tn), lambda i, j, k: (i, j)),
        scratch_shapes=[pltpu.VMEM((tm, tn), jnp.float32)],
        compiler_params=pltpu.CompilerParams(
            dimension_semantics=("parallel", "parallel", "arbitrary"),
            vmem_limit_bytes=_VMEM_LIMIT),
    )(x2, w, b)
    return out[:, :vocab_out]


# ----------------------------------------------------------------------------
# Model glue (plain JAX: embedding gather, PE table, mask preparation)
# ----------------------------------------------------------------------------
def positional_encoding(L, E):
    pos = jnp.arange(L, dtype=jnp.float32)[:, None]
    div = jnp.exp(jnp.arange(0, E, 2, dtype=jnp.float32) *
                  (-math.log(10000.0) / E))
    pe = jnp.zeros((L, E), jnp.float32)
    pe = pe.at[:, 0::2].set(jnp.sin(pos * div))
    pe = pe.at[:, 1::2].set(jnp.cos(pos * div))
    return pe


def transformer_forward(params, source, target, source_mask, target_mask,
                        source_padding_mask, target_padding_mask, num_heads,
                        vocab_out):
    """source/target: (N, S)/(N, T) int32 token ids; returns (N, T, vocab_out)."""
    # TODO(synk): dropout (positional encoder + sublayers) is identity (eval mode).
    # TODO(synk): embedding gather + sinusoidal PE stay in plain JAX (tiny int
    # gather has no profitable Pallas equivalent here).
    N, S = source.shape
    T = target.shape[1]
    E = params["embedding"].shape[1]
    H = num_heads

    src = params["embedding"][source] + positional_encoding(S, E)[None]
    tgt = params["embedding"][target] + positional_encoding(T, E)[None]

    src_mask = (None if source_mask is None
                else jnp.maximum(source_mask.astype(jnp.float32), _NEG))
    tgt_mask = (None if target_mask is None
                else jnp.maximum(target_mask.astype(jnp.float32), _NEG))
    src_kpad = (None if source_padding_mask is None else
                jnp.where(source_padding_mask, _NEG, 0.0)
                .astype(jnp.float32).reshape(N, 1, S))
    tgt_kpad = (None if target_padding_mask is None else
                jnp.where(target_padding_mask, _NEG, 0.0)
                .astype(jnp.float32).reshape(N, 1, T))

    # encoder (post-norm, PyTorch norm_first=False); the final encoder
    # LayerNorm is fused into the last layer's FFN kernel.
    x = src
    n_enc = len(params["enc_layers"])
    for i, lp in enumerate(params["enc_layers"]):
        x = mha_add_ln(x, x, lp["self_attn"], H, lp["ln1_g"], lp["ln1_b"],
                       attn_mask=src_mask, kpad_bias=src_kpad)
        last = i == n_enc - 1
        x = ffn_add_ln(x, lp["ffn"], lp["ln2_g"], lp["ln2_b"],
                       final_g=params["enc_norm_g"] if last else None,
                       final_b=params["enc_norm_b"] if last else None)
    memory = x

    # decoder (memory_mask=None, memory_key_padding_mask=None, matching the
    # module's nn.Transformer call which forwards neither).
    y = tgt
    n_dec = len(params["dec_layers"])
    for i, lp in enumerate(params["dec_layers"]):
        y = mha_add_ln(y, y, lp["self_attn"], H, lp["ln1_g"], lp["ln1_b"],
                       attn_mask=tgt_mask, kpad_bias=tgt_kpad)
        y = mha_add_ln(y, memory, lp["cross_attn"], H, lp["ln2_g"], lp["ln2_b"])
        last = i == n_dec - 1
        y = ffn_add_ln(y, lp["ffn"], lp["ln3_g"], lp["ln3_b"],
                       final_g=params["dec_norm_g"] if last else None,
                       final_b=params["dec_norm_b"] if last else None)

    out = linear_head(y.reshape(N * T, E), params["fc_w"], params["fc_b"],
                      vocab_out)
    return out.reshape(N, T, vocab_out)


_forward_jit = jax.jit(transformer_forward,
                       static_argnames=("num_heads", "vocab_out"))


def transformer_apply(params, source, target, source_mask, target_mask,
                      source_padding_mask, target_padding_mask, num_heads):
    """Host-side entry: prunes all-zero attn masks, dispatches jitted forward."""
    if source_mask is not None and not bool(jnp.any(source_mask != 0)):
        source_mask = None
    if target_mask is not None and not bool(jnp.any(target_mask != 0)):
        target_mask = None
    kernel_params = {k: v for k, v in params.items() if k != "vocab_out"}
    return _forward_jit(kernel_params, source, target, source_mask, target_mask,
                        source_padding_mask, target_padding_mask,
                        num_heads=num_heads, vocab_out=params["vocab_out"])


# ----------------------------------------------------------------------------
# One-time host-side parameter prep (bf16 cast, scale folding, fc padding)
# ----------------------------------------------------------------------------
def prepare_params(raw, num_heads):
    E = raw["embedding"].shape[1]
    assert E % num_heads == 0
    scale = 1.0 / math.sqrt(E // num_heads)

    def prep_mha(m):
        return dict(
            wq=(m["wq"] * scale).astype(jnp.bfloat16),
            bq=(m["bq"] * scale).astype(jnp.float32).reshape(1, E),
            wk=m["wk"].astype(jnp.bfloat16),
            bk=m["bk"].astype(jnp.float32).reshape(1, E),
            wv=m["wv"].astype(jnp.bfloat16),
            bv=m["bv"].astype(jnp.float32).reshape(1, E),
            wo=m["wo"].astype(jnp.bfloat16),
            bo=m["bo"].astype(jnp.float32).reshape(1, E),
        )

    def prep_ffn(lp):
        F = lp["w1"].shape[1]
        return dict(w1=lp["w1"].astype(jnp.bfloat16),
                    b1=lp["b1"].astype(jnp.float32).reshape(1, F),
                    w2=lp["w2"].astype(jnp.bfloat16),
                    b2=lp["b2"].astype(jnp.float32).reshape(1, E))

    def ln2d(v):
        return v.astype(jnp.float32).reshape(1, E)

    enc_layers = []
    for lp in raw["enc_layers"]:
        enc_layers.append(dict(
            self_attn=prep_mha(lp["self_attn"]), ffn=prep_ffn(lp),
            ln1_g=ln2d(lp["ln1_g"]), ln1_b=ln2d(lp["ln1_b"]),
            ln2_g=ln2d(lp["ln2_g"]), ln2_b=ln2d(lp["ln2_b"])))
    dec_layers = []
    for lp in raw["dec_layers"]:
        dec_layers.append(dict(
            self_attn=prep_mha(lp["self_attn"]),
            cross_attn=prep_mha(lp["cross_attn"]), ffn=prep_ffn(lp),
            ln1_g=ln2d(lp["ln1_g"]), ln1_b=ln2d(lp["ln1_b"]),
            ln2_g=ln2d(lp["ln2_g"]), ln2_b=ln2d(lp["ln2_b"]),
            ln3_g=ln2d(lp["ln3_g"]), ln3_b=ln2d(lp["ln3_b"])))

    V = raw["fc_w"].shape[1]
    Vp = ((V + 511) // 512) * 512            # lane-dense, tn=512 friendly
    fc_w = jnp.pad(raw["fc_w"], ((0, 0), (0, Vp - V))).astype(jnp.bfloat16)
    fc_b = jnp.pad(raw["fc_b"], (0, Vp - V)).astype(jnp.float32).reshape(1, Vp)

    return dict(embedding=raw["embedding"].astype(jnp.float32),
                enc_layers=enc_layers, dec_layers=dec_layers,
                enc_norm_g=ln2d(raw["enc_norm_g"]),
                enc_norm_b=ln2d(raw["enc_norm_b"]),
                dec_norm_g=ln2d(raw["dec_norm_g"]),
                dec_norm_b=ln2d(raw["dec_norm_b"]),
                fc_w=fc_w, fc_b=fc_b, vocab_out=V)


# ----------------------------------------------------------------------------
# Deterministic parameter init (PyTorch-module-shaped, f32)
# ----------------------------------------------------------------------------
def init_params(key, vocab_in, vocab_out, E, F, n_layers, pad_token):
    keys = iter(jax.random.split(key, 1024))

    def nw(shape):
        return 0.02 * jax.random.normal(next(keys), shape, jnp.float32)

    def init_mha():
        return dict(wq=nw((E, E)), bq=jnp.zeros((E,), jnp.float32),
                    wk=nw((E, E)), bk=jnp.zeros((E,), jnp.float32),
                    wv=nw((E, E)), bv=jnp.zeros((E,), jnp.float32),
                    wo=nw((E, E)), bo=jnp.zeros((E,), jnp.float32))

    def init_ff():
        return dict(w1=nw((E, F)), b1=jnp.zeros((F,), jnp.float32),
                    w2=nw((F, E)), b2=jnp.zeros((E,), jnp.float32))

    def ln():
        return jnp.ones((E,), jnp.float32), jnp.zeros((E,), jnp.float32)

    def init_enc_layer():
        g1, b1 = ln(); g2, b2 = ln()
        return dict(self_attn=init_mha(), **init_ff(),
                    ln1_g=g1, ln1_b=b1, ln2_g=g2, ln2_b=b2)

    def init_dec_layer():
        g1, b1 = ln(); g2, b2 = ln(); g3, b3 = ln()
        return dict(self_attn=init_mha(), cross_attn=init_mha(), **init_ff(),
                    ln1_g=g1, ln1_b=b1, ln2_g=g2, ln2_b=b2, ln3_g=g3, ln3_b=b3)

    emb = nw((vocab_in, E))
    emb = emb.at[pad_token].set(0.0)  # nn.Embedding padding_idx semantics

    eg, eb = ln()
    dg, db = ln()
    return dict(
        embedding=emb,
        enc_layers=[init_enc_layer() for _ in range(n_layers)],
        dec_layers=[init_dec_layer() for _ in range(n_layers)],
        enc_norm_g=eg, enc_norm_b=eb,
        dec_norm_g=dg, dec_norm_b=db,
        fc_w=nw((E, vocab_out)), fc_b=jnp.zeros((vocab_out,), jnp.float32),
    )


# ----------------------------------------------------------------------------
if __name__ == "__main__":
    N, S, T = 2, 8, 8
    E, F, H, LAYERS = 32, 64, 4, 2
    VOCAB = 40
    PAD = 0  # MIDI_PAD_TOKEN stand-in

    root = jax.random.PRNGKey(0)
    k_param, k_src, k_tgt = jax.random.split(root, 3)

    raw_params = init_params(k_param, VOCAB, VOCAB, E, F, LAYERS, PAD)
    params = prepare_params(raw_params, num_heads=H)

    source = jax.random.randint(k_src, (N, S), 1, VOCAB, dtype=jnp.int32)
    target = jax.random.randint(k_tgt, (N, T), 1, VOCAB, dtype=jnp.int32)
    source = source.at[:, -1].set(PAD)
    target = target.at[:, -1].set(PAD)

    source_mask = jnp.zeros((S, S), jnp.float32)
    causal = jnp.triu(jnp.ones((T, T), jnp.bool_), k=1)
    target_mask = jnp.where(causal, -jnp.inf, 0.0).astype(jnp.float32)
    source_padding_mask = source == PAD
    target_padding_mask = target == PAD

    out = transformer_apply(params, source, target, source_mask, target_mask,
                            source_padding_mask, target_padding_mask,
                            num_heads=H)
    out = jax.block_until_ready(out)
    assert out.shape == (N, T, VOCAB)
    assert bool(jnp.all(jnp.isfinite(out)))
    print("KERNEL_OK")
</pallas_src>

<mosaic_0001>
module attributes {stable_mosaic.version = 11 : i64} {
  func.func @_ffn_ln_kernel(%arg0: i32, %arg1: memref<16x32xf32, #tpu.memory_space<vmem>>, %arg2: memref<32x64xbf16, #tpu.memory_space<vmem>>, %arg3: memref<1x64xf32, #tpu.memory_space<vmem>>, %arg4: memref<64x32xbf16, #tpu.memory_space<vmem>>, %arg5: memref<1x32xf32, #tpu.memory_space<vmem>>, %arg6: memref<1x32xf32, #tpu.memory_space<vmem>>, %arg7: memref<1x32xf32, #tpu.memory_space<vmem>>, %arg8: memref<16x32xf32, #tpu.memory_space<vmem>>) attributes {dimension_semantics = [#tpu.dimension_semantics<parallel>], iteration_bounds = array<i64: 1>, scalar_prefetch = 0 : i64, scratch_operands = 0 : i64, tpu.core_type = #tpu.core_type<tc>, window_params = [{transform_indices = @transform_0, window_bounds = array<i64: 16, 32>}, {pipeline_mode = #tpu.pipeline_mode<synchronous>, transform_indices = @transform_1, window_bounds = array<i64: 32, 64>}, {pipeline_mode = #tpu.pipeline_mode<synchronous>, transform_indices = @transform_2, window_bounds = array<i64: 1, 64>}, {pipeline_mode = #tpu.pipeline_mode<synchronous>, transform_indices = @transform_3, window_bounds = array<i64: 64, 32>}, {pipeline_mode = #tpu.pipeline_mode<synchronous>, transform_indices = @transform_4, window_bounds = array<i64: 1, 32>}, {pipeline_mode = #tpu.pipeline_mode<synchronous>, transform_indices = @transform_5, window_bounds = array<i64: 1, 32>}, {pipeline_mode = #tpu.pipeline_mode<synchronous>, transform_indices = @transform_6, window_bounds = array<i64: 1, 32>}, {transform_indices = @transform_7, window_bounds = array<i64: 16, 32>}]} {
    %c0 = arith.constant 0 : index
    %c0_0 = arith.constant 0 : index
    %0 = vector.load %arg1[%c0, %c0_0] : memref<16x32xf32, #tpu.memory_space<vmem>>, vector<16x32xf32>
    %1 = arith.truncf %0 : vector<16x32xf32> to vector<16x32xbf16>
    %c0_1 = arith.constant 0 : index
    %c0_2 = arith.constant 0 : index
    %2 = vector.load %arg2[%c0_1, %c0_2] : memref<32x64xbf16, #tpu.memory_space<vmem>>, vector<32x64xbf16>
    %cst = arith.constant dense<0.000000e+00> : vector<16x64xf32>
    %3 = tpu.matmul %1, %2, %cst {dimension_numbers = #tpu.dot_dimension_numbers<[1], [0], [0], [1], [0, 0, 1, 1], [], []>} : vector<16x32xbf16>, vector<32x64xbf16>, vector<16x64xf32> -> vector<16x64xf32>
    %c0_3 = arith.constant 0 : index
    %c0_4 = arith.constant 0 : index
    %4 = vector.load %arg3[%c0_3, %c0_4] : memref<1x64xf32, #tpu.memory_space<vmem>>, vector<1x64xf32>
    %5 = vector.broadcast %4 : vector<1x64xf32> to vector<16x64xf32>
    %6 = arith.addf %3, %5 : vector<16x64xf32>
    %cst_5 = arith.constant 0.000000e+00 : f32
    %7 = vector.broadcast %cst_5 : f32 to vector<16x64xf32>
    %8 = arith.maximumf %6, %7 : vector<16x64xf32>
    %9 = arith.truncf %8 : vector<16x64xf32> to vector<16x64xbf16>
    %c0_6 = arith.constant 0 : index
    %c0_7 = arith.constant 0 : index
    %10 = vector.load %arg4[%c0_6, %c0_7] : memref<64x32xbf16, #tpu.memory_space<vmem>>, vector<64x32xbf16>
    %cst_8 = arith.constant dense<0.000000e+00> : vector<16x32xf32>
    %11 = tpu.matmul %9, %10, %cst_8 {dimension_numbers = #tpu.dot_dimension_numbers<[1], [0], [0], [1], [0, 0, 1, 1], [], []>} : vector<16x64xbf16>, vector<64x32xbf16>, vector<16x32xf32> -> vector<16x32xf32>
    %c0_9 = arith.constant 0 : index
    %c0_10 = arith.constant 0 : index
    %12 = vector.load %arg5[%c0_9, %c0_10] : memref<1x32xf32, #tpu.memory_space<vmem>>, vector<1x32xf32>
    %13 = vector.broadcast %12 : vector<1x32xf32> to vector<16x32xf32>
    %14 = arith.addf %11, %13 : vector<16x32xf32>
    %15 = arith.addf %0, %14 : vector<16x32xf32>
    %cst_11 = arith.constant dense<0.000000e+00> : vector<16xf32>
    %16 = vector.multi_reduction <add>, %15, %cst_11 [1] : vector<16x32xf32> to vector<16xf32>
    %17 = vector.shape_cast %16 : vector<16xf32> to vector<16x1xf32>
    %cst_12 = arith.constant 3.200000e+01 : f32
    %18 = vector.broadcast %cst_12 : f32 to vector<16x1xf32>
    %19 = arith.divf %17, %18 : vector<16x1xf32>
    %20 = vector.broadcast %19 : vector<16x1xf32> to vector<16x32xf32>
    %21 = arith.subf %15, %20 : vector<16x32xf32>
    %22 = arith.mulf %21, %21 : vector<16x32xf32>
    %cst_13 = arith.constant dense<0.000000e+00> : vector<16xf32>
    %23 = vector.multi_reduction <add>, %22, %cst_13 [1] : vector<16x32xf32> to vector<16xf32>
    %24 = vector.shape_cast %23 : vector<16xf32> to vector<16x1xf32>
    %cst_14 = arith.constant 3.200000e+01 : f32
    %25 = vector.broadcast %cst_14 : f32 to vector<16x1xf32>
    %26 = arith.divf %24, %25 : vector<16x1xf32>
    %27 = vector.broadcast %19 : vector<16x1xf32> to vector<16x32xf32>
    %28 = arith.subf %15, %27 : vector<16x32xf32>
    %cst_15 = arith.constant 9.99999974E-6 : f32
    %29 = vector.broadcast %cst_15 : f32 to vector<16x1xf32>
    %30 = arith.addf %26, %29 : vector<16x1xf32>
    %31 = math.rsqrt %30 : vector<16x1xf32>
    %32 = vector.broadcast %31 : vector<16x1xf32> to vector<16x32xf32>
    %33 = arith.mulf %28, %32 : vector<16x32xf32>
    %c0_16 = arith.constant 0 : index
    %c0_17 = arith.constant 0 : index
    %34 = vector.load %arg6[%c0_16, %c0_17] : memref<1x32xf32, #tpu.memory_space<vmem>>, vector<1x32xf32>
    %35 = vector.broadcast %34 : vector<1x32xf32> to vector<16x32xf32>
    %36 = arith.mulf %33, %35 : vector<16x32xf32>
    %c0_18 = arith.constant 0 : index
    %c0_19 = arith.constant 0 : index
    %37 = vector.load %arg7[%c0_18, %c0_19] : memref<1x32xf32, #tpu.memory_space<vmem>>, vector<1x32xf32>
    %38 = vector.broadcast %37 : vector<1x32xf32> to vector<16x32xf32>
    %39 = arith.addf %36, %38 : vector<16x32xf32>
    %c0_20 = arith.constant 0 : index
    %c0_21 = arith.constant 0 : index
    %40 = vector.load %arg8[%c0_20, %c0_21] : memref<16x32xf32, #tpu.memory_space<vmem>>, vector<16x32xf32>
    tpu.vector_store %arg8[%c0_20, %c0_21], %39 {strides = array<i32>} : memref<16x32xf32, #tpu.memory_space<vmem>>, vector<16x32xf32>,
    return
  }
  func.func @transform_0(%arg0: i32) -> (i32, i32) {
    %c0_i32 = arith.constant 0 : i32
    %c0_i32_0 = arith.constant 0 : i32
    return %arg0, %c0_i32 : i32, i32
  }
  func.func @transform_1(%arg0: i32) -> (i32, i32) {
    %c0_i32 = arith.constant 0 : i32
    %c0_i32_0 = arith.constant 0 : i32
    %c0_i32_1 = arith.constant 0 : i32
    return %c0_i32, %c0_i32_0 : i32, i32
  }
  func.func @transform_2(%arg0: i32) -> (i32, i32) {
    %c0_i32 = arith.constant 0 : i32
    %c0_i32_0 = arith.constant 0 : i32
    %c0_i32_1 = arith.constant 0 : i32
    return %c0_i32, %c0_i32_0 : i32, i32
  }
  func.func @transform_3(%arg0: i32) -> (i32, i32) {
    %c0_i32 = arith.constant 0 : i32
    %c0_i32_0 = arith.constant 0 : i32
    %c0_i32_1 = arith.constant 0 : i32
    return %c0_i32, %c0_i32_0 : i32, i32
  }
  func.func @transform_4(%arg0: i32) -> (i32, i32) {
    %c0_i32 = arith.constant 0 : i32
    %c0_i32_0 = arith.constant 0 : i32
    %c0_i32_1 = arith.constant 0 : i32
    return %c0_i32, %c0_i32_0 : i32, i32
  }
  func.func @transform_5(%arg0: i32) -> (i32, i32) {
    %c0_i32 = arith.constant 0 : i32
    %c0_i32_0 = arith.constant 0 : i32
    %c0_i32_1 = arith.constant 0 : i32
    return %c0_i32, %c0_i32_0 : i32, i32
  }
  func.func @transform_6(%arg0: i32) -> (i32, i32) {
    %c0_i32 = arith.constant 0 : i32
    %c0_i32_0 = arith.constant 0 : i32
    %c0_i32_1 = arith.constant 0 : i32
    return %c0_i32, %c0_i32_0 : i32, i32
  }
  func.func @transform_7(%arg0: i32) -> (i32, i32) {
    %c0_i32 = arith.constant 0 : i32
    %c0_i32_0 = arith.constant 0 : i32
    return %arg0, %c0_i32 : i32, i32
  }
}

module attributes {stable_mosaic.version = 11 : i64} {
  func.func @_mha_ln_kernel(%arg0: i32, %arg1: i32, %arg2: memref<1x8x32xf32, #tpu.memory_space<vmem>>, %arg3: memref<1x8x32xf32, #tpu.memory_space<vmem>>, %arg4: memref<1x1x8xf32, #tpu.memory_space<vmem>>, %arg5: memref<32x32xbf16, #tpu.memory_space<vmem>>, %arg6: memref<1x32xf32, #tpu.memory_space<vmem>>, %arg7: memref<32x32xbf16, #tpu.memory_space<vmem>>, %arg8: memref<1x32xf32, #tpu.memory_space<vmem>>, %arg9: memref<32x32xbf16, #tpu.memory_space<vmem>>, %arg10: memref<1x32xf32, #tpu.memory_space<vmem>>, %arg11: memref<32x32xbf16, #tpu.memory_space<vmem>>, %arg12: memref<1x32xf32, #tpu.memory_space<vmem>>, %arg13: memref<1x32xf32, #tpu.memory_space<vmem>>, %arg14: memref<1x32xf32, #tpu.memory_space<vmem>>, %arg15: memref<1x8x32xf32, #tpu.memory_space<vmem>>) attributes {dimension_semantics = [#tpu.dimension_semantics<parallel>, #tpu.dimension_semantics<parallel>], iteration_bounds = array<i64: 2, 1>, scalar_prefetch = 0 : i64, scratch_operands = 0 : i64, tpu.core_type = #tpu.core_type<tc>, window_params = [{transform_indices = @transform_0, window_bounds = array<i64: 1, 8, 32>}, {transform_indices = @transform_1, window_bounds = array<i64: 1, 8, 32>}, {transform_indices = @transform_2, window_bounds = array<i64: 1, 1, 8>}, {pipeline_mode = #tpu.pipeline_mode<synchronous>, transform_indices = @transform_3, window_bounds = array<i64: 32, 32>}, {pipeline_mode = #tpu.pipeline_mode<synchronous>, transform_indices = @transform_4, window_bounds = array<i64: 1, 32>}, {pipeline_mode = #tpu.pipeline_mode<synchronous>, transform_indices = @transform_5, window_bounds = array<i64: 32, 32>}, {pipeline_mode = #tpu.pipeline_mode<synchronous>, transform_indices = @transform_6, window_bounds = array<i64: 1, 32>}, {pipeline_mode = #tpu.pipeline_mode<synchronous>, transform_indices = @transform_7, window_bounds = array<i64: 32, 32>}, {pipeline_mode = #tpu.pipeline_mode<synchronous>, transform_indices = @transform_8, window_bounds = array<i64: 1, 32>}, {pipeline_mode = #tpu.pipeline_mode<synchronous>, transform_indices = @transform_9, window_bounds = array<i64: 32, 32>}, {pipeline_mode = #tpu.pipeline_mode<synchronous>, transform_indices = @transform_10, window_bounds = array<i64: 1, 32>}, {pipeline_mode = #tpu.pipeline_mode<synchronous>, transform_indices = @transform_11, window_bounds = array<i64: 1, 32>}, {pipeline_mode = #tpu.pipeline_mode<synchronous>, transform_indices = @transform_12, window_bounds = array<i64: 1, 32>}, {transform_indices = @transform_13, window_bounds = array<i64: 1, 8, 32>}]} {
    %c0 = arith.constant 0 : index
    %c0_0 = arith.constant 0 : index
    %c0_1 = arith.constant 0 : index
    %0 = vector.load %arg2[%c0, %c0_0, %c0_1] : memref<1x8x32xf32, #tpu.memory_space<vmem>>, vector<1x8x32xf32>
    %1 = vector.shape_cast %0 : vector<1x8x32xf32> to vector<8x32xf32>
    %c0_2 = arith.constant 0 : index
    %c0_3 = arith.constant 0 : index
    %c0_4 = arith.constant 0 : index
    %2 = vector.load %arg3[%c0_2, %c0_3, %c0_4] : memref<1x8x32xf32, #tpu.memory_space<vmem>>, vector<1x8x32xf32>
    %3 = vector.shape_cast %2 : vector<1x8x32xf32> to vector<8x32xf32>
    %4 = arith.truncf %1 : vector<8x32xf32> to vector<8x32xbf16>
    %5 = arith.truncf %3 : vector<8x32xf32> to vector<8x32xbf16>
    %c0_5 = arith.constant 0 : index
    %c0_6 = arith.constant 0 : index
    %6 = vector.load %arg5[%c0_5, %c0_6] : memref<32x32xbf16, #tpu.memory_space<vmem>>, vector<32x32xbf16>
    %cst = arith.constant dense<0.000000e+00> : vector<8x32xf32>
    %7 = tpu.matmul %4, %6, %cst {dimension_numbers = #tpu.dot_dimension_numbers<[1], [0], [0], [1], [0, 0, 1, 1], [], []>} : vector<8x32xbf16>, vector<32x32xbf16>, vector<8x32xf32> -> vector<8x32xf32>
    %c0_7 = arith.constant 0 : index
    %c0_8 = arith.constant 0 : index
    %8 = vector.load %arg6[%c0_7, %c0_8] : memref<1x32xf32, #tpu.memory_space<vmem>>, vector<1x32xf32>
    %9 = vector.broadcast %8 : vector<1x32xf32> to vector<8x32xf32>
    %10 = arith.addf %7, %9 : vector<8x32xf32>
    %c0_9 = arith.constant 0 : index
    %c0_10 = arith.constant 0 : index
    %11 = vector.load %arg7[%c0_9, %c0_10] : memref<32x32xbf16, #tpu.memory_space<vmem>>, vector<32x32xbf16>
    %cst_11 = arith.constant dense<0.000000e+00> : vector<8x32xf32>
    %12 = tpu.matmul %5, %11, %cst_11 {dimension_numbers = #tpu.dot_dimension_numbers<[1], [0], [0], [1], [0, 0, 1, 1], [], []>} : vector<8x32xbf16>, vector<32x32xbf16>, vector<8x32xf32> -> vector<8x32xf32>
    %c0_12 = arith.constant 0 : index
    %c0_13 = arith.constant 0 : index
    %13 = vector.load %arg8[%c0_12, %c0_13] : memref<1x32xf32, #tpu.memory_space<vmem>>, vector<1x32xf32>
    %14 = vector.broadcast %13 : vector<1x32xf32> to vector<8x32xf32>
    %15 = arith.addf %12, %14 : vector<8x32xf32>
    %c0_14 = arith.constant 0 : index
    %c0_15 = arith.constant 0 : index
    %16 = vector.load %arg9[%c0_14, %c0_15] : memref<32x32xbf16, #tpu.memory_space<vmem>>, vector<32x32xbf16>
    %cst_16 = arith.constant dense<0.000000e+00> : vector<8x32xf32>
    %17 = tpu.matmul %5, %16, %cst_16 {dimension_numbers = #tpu.dot_dimension_numbers<[1], [0], [0], [1], [0, 0, 1, 1], [], []>} : vector<8x32xbf16>, vector<32x32xbf16>, vector<8x32xf32> -> vector<8x32xf32>
    %c0_17 = arith.constant 0 : index
    %c0_18 = arith.constant 0 : index
    %18 = vector.load %arg10[%c0_17, %c0_18] : memref<1x32xf32, #tpu.memory_space<vmem>>, vector<1x32xf32>
    %19 = vector.broadcast %18 : vector<1x32xf32> to vector<8x32xf32>
    %20 = arith.addf %17, %19 : vector<8x32xf32>
    %21 = arith.truncf %10 : vector<8x32xf32> to vector<8x32xbf16>
    %22 = arith.truncf %15 : vector<8x32xf32> to vector<8x32xbf16>
    %23 = arith.truncf %20 : vector<8x32xf32> to vector<8x32xbf16>
    %24 = vector.extract_strided_slice %21 {offsets = [0, 0], sizes = [8, 8], strides = [1, 1]} : vector<8x32xbf16> to vector<8x8xbf16>
    %25 = vector.extract_strided_slice %21 {offsets = [0, 8], sizes = [8, 8], strides = [1, 1]} : vector<8x32xbf16> to vector<8x8xbf16>
    %26 = vector.extract_strided_slice %21 {offsets = [0, 16], sizes = [8, 8], strides = [1, 1]} : vector<8x32xbf16> to vector<8x8xbf16>
    %27 = vector.extract_strided_slice %21 {offsets = [0, 24], sizes = [8, 8], strides = [1, 1]} : vector<8x32xbf16> to vector<8x8xbf16>
    %28 = vector.shape_cast %24 : vector<8x8xbf16> to vector<1x8x8xbf16>
    %29 = vector.shape_cast %25 : vector<8x8xbf16> to vector<1x8x8xbf16>
    %30 = vector.shape_cast %26 : vector<8x8xbf16> to vector<1x8x8xbf16>
    %31 = vector.shape_cast %27 : vector<8x8xbf16> to vector<1x8x8xbf16>
    %32 = tpu.concatenate %28, %29, %30, %31 in 0 : vector<1x8x8xbf16>, vector<1x8x8xbf16>, vector<1x8x8xbf16>, vector<1x8x8xbf16> -> vector<4x8x8xbf16>
    %33 = vector.extract_strided_slice %22 {offsets = [0, 0], sizes = [8, 8], strides = [1, 1]} : vector<8x32xbf16> to vector<8x8xbf16>
    %34 = vector.extract_strided_slice %22 {offsets = [0, 8], sizes = [8, 8], strides = [1, 1]} : vector<8x32xbf16> to vector<8x8xbf16>
    %35 = vector.extract_strided_slice %22 {offsets = [0, 16], sizes = [8, 8], strides = [1, 1]} : vector<8x32xbf16> to vector<8x8xbf16>
    %36 = vector.extract_strided_slice %22 {offsets = [0, 24], sizes = [8, 8], strides = [1, 1]} : vector<8x32xbf16> to vector<8x8xbf16>
    %37 = vector.shape_cast %33 : vector<8x8xbf16> to vector<1x8x8xbf16>
    %38 = vector.shape_cast %34 : vector<8x8xbf16> to vector<1x8x8xbf16>
    %39 = vector.shape_cast %35 : vector<8x8xbf16> to vector<1x8x8xbf16>
    %40 = vector.shape_cast %36 : vector<8x8xbf16> to vector<1x8x8xbf16>
    %41 = tpu.concatenate %37, %38, %39, %40 in 0 : vector<1x8x8xbf16>, vector<1x8x8xbf16>, vector<1x8x8xbf16>, vector<1x8x8xbf16> -> vector<4x8x8xbf16>
    %42 = vector.extract_strided_slice %23 {offsets = [0, 0], sizes = [8, 8], strides = [1, 1]} : vector<8x32xbf16> to vector<8x8xbf16>
    %43 = vector.extract_strided_slice %23 {offsets = [0, 8], sizes = [8, 8], strides = [1, 1]} : vector<8x32xbf16> to vector<8x8xbf16>
    %44 = vector.extract_strided_slice %23 {offsets = [0, 16], sizes = [8, 8], strides = [1, 1]} : vector<8x32xbf16> to vector<8x8xbf16>
    %45 = vector.extract_strided_slice %23 {offsets = [0, 24], sizes = [8, 8], strides = [1, 1]} : vector<8x32xbf16> to vector<8x8xbf16>
    %46 = vector.shape_cast %42 : vector<8x8xbf16> to vector<1x8x8xbf16>
    %47 = vector.shape_cast %43 : vector<8x8xbf16> to vector<1x8x8xbf16>
    %48 = vector.shape_cast %44 : vector<8x8xbf16> to vector<1x8x8xbf16>
    %49 = vector.shape_cast %45 : vector<8x8xbf16> to vector<1x8x8xbf16>
    %50 = tpu.concatenate %46, %47, %48, %49 in 0 : vector<1x8x8xbf16>, vector<1x8x8xbf16>, vector<1x8x8xbf16>, vector<1x8x8xbf16> -> vector<4x8x8xbf16>
    "tpu.trace_start"() <{level = 10 : i32, message = "hqd,hkd->hqk"}> : () -> ()
    %cst_19 = arith.constant dense<0.000000e+00> : vector<4x8x8xf32>
    %51 = tpu.matmul %32, %41, %cst_19 {dimension_numbers = #tpu.dot_dimension_numbers<[2], [2], [1], [1], [0, 0, 0, 1, 1, 1], [0], [0]>} : vector<4x8x8xbf16>, vector<4x8x8xbf16>, vector<4x8x8xf32> -> vector<4x8x8xf32>
    "tpu.trace_stop"() : () -> ()
    %c0_20 = arith.constant 0 : index
    %c0_21 = arith.constant 0 : index
    %c0_22 = arith.constant 0 : index
    %52 = vector.load %arg4[%c0_20, %c0_21, %c0_22] : memref<1x1x8xf32, #tpu.memory_space<vmem>>, vector<1x1x8xf32>
    %53 = vector.shape_cast %52 : vector<1x1x8xf32> to vector<1x8xf32>
    %54 = vector.shape_cast %53 : vector<1x8xf32> to vector<1x1x8xf32>
    %55 = vector.broadcast %54 : vector<1x1x8xf32> to vector<4x8x8xf32>
    %56 = arith.addf %51, %55 : vector<4x8x8xf32>
    %cst_23 = arith.constant dense<0xFF800000> : vector<4x8xf32>
    %57 = vector.multi_reduction <maximumf>, %56, %cst_23 [2] : vector<4x8x8xf32> to vector<4x8xf32>
    %58 = vector.shape_cast %57 : vector<4x8xf32> to vector<4x8x1xf32>
    %59 = vector.broadcast %58 : vector<4x8x1xf32> to vector<4x8x8xf32>
    %60 = arith.subf %56, %59 : vector<4x8x8xf32>
    %61 = math.exp %60 : vector<4x8x8xf32>
    %cst_24 = arith.constant dense<0.000000e+00> : vector<4x8xf32>
    %62 = vector.multi_reduction <add>, %61, %cst_24 [2] : vector<4x8x8xf32> to vector<4x8xf32>
    %63 = vector.shape_cast %62 : vector<4x8xf32> to vector<4x8x1xf32>
    %64 = tpu.reciprocal %63 {approx = true} : vector<4x8x1xf32> -> vector<4x8x1xf32>
    %65 = vector.broadcast %64 : vector<4x8x1xf32> to vector<4x8x8xf32>
    %66 = arith.mulf %61, %65 : vector<4x8x8xf32>
    %67 = arith.truncf %66 : vector<4x8x8xf32> to vector<4x8x8xbf16>
    "tpu.trace_start"() <{level = 10 : i32, message = "hqk,hkd->hqd"}> : () -> ()
    %cst_25 = arith.constant dense<0.000000e+00> : vector<4x8x8xf32>
    %68 = tpu.matmul %67, %50, %cst_25 {dimension_numbers = #tpu.dot_dimension_numbers<[2], [1], [1], [2], [0, 0, 0, 1, 1, 2], [0], [0]>} : vector<4x8x8xbf16>, vector<4x8x8xbf16>, vector<4x8x8xf32> -> vector<4x8x8xf32>
    "tpu.trace_stop"() : () -> ()
    %69 = vector.extract_strided_slice %68 {offsets = [0, 0, 0], sizes = [1, 8, 8], strides = [1, 1, 1]} : vector<4x8x8xf32> to vector<1x8x8xf32>
    %70 = vector.shape_cast %69 : vector<1x8x8xf32> to vector<8x8xf32>
    %71 = vector.extract_strided_slice %68 {offsets = [1, 0, 0], sizes = [1, 8, 8], strides = [1, 1, 1]} : vector<4x8x8xf32> to vector<1x8x8xf32>
    %72 = vector.shape_cast %71 : vector<1x8x8xf32> to vector<8x8xf32>
    %73 = vector.extract_strided_slice %68 {offsets = [2, 0, 0], sizes = [1, 8, 8], strides = [1, 1, 1]} : vector<4x8x8xf32> to vector<1x8x8xf32>
    %74 = vector.shape_cast %73 : vector<1x8x8xf32> to vector<8x8xf32>
    %75 = vector.extract_strided_slice %68 {offsets = [3, 0, 0], sizes = [1, 8, 8], strides = [1, 1, 1]} : vector<4x8x8xf32> to vector<1x8x8xf32>
    %76 = vector.shape_cast %75 : vector<1x8x8xf32> to vector<8x8xf32>
    %77 = tpu.concatenate %70, %72, %74, %76 in 1 : vector<8x8xf32>, vector<8x8xf32>, vector<8x8xf32>, vector<8x8xf32> -> vector<8x32xf32>
    %78 = arith.truncf %77 : vector<8x32xf32> to vector<8x32xbf16>
    %c0_26 = arith.constant 0 : index
    %c0_27 = arith.constant 0 : index
    %79 = vector.load %arg11[%c0_26, %c0_27] : memref<32x32xbf16, #tpu.memory_space<vmem>>, vector<32x32xbf16>
    %cst_28 = arith.constant dense<0.000000e+00> : vector<8x32xf32>
    %80 = tpu.matmul %78, %79, %cst_28 {dimension_numbers = #tpu.dot_dimension_numbers<[1], [0], [0], [1], [0, 0, 1, 1], [], []>} : vector<8x32xbf16>, vector<32x32xbf16>, vector<8x32xf32> -> vector<8x32xf32>
    %c0_29 = arith.constant 0 : index
    %c0_30 = arith.constant 0 : index
    %81 = vector.load %arg12[%c0_29, %c0_30] : memref<1x32xf32, #tpu.memory_space<vmem>>, vector<1x32xf32>
    %82 = vector.broadcast %81 : vector<1x32xf32> to vector<8x32xf32>
    %83 = arith.addf %80, %82 : vector<8x32xf32>
    %84 = arith.addf %1, %83 : vector<8x32xf32>
    %cst_31 = arith.constant dense<0.000000e+00> : vector<8xf32>
    %85 = vector.multi_reduction <add>, %84, %cst_31 [1] : vector<8x32xf32> to vector<8xf32>
    %86 = vector.shape_cast %85 : vector<8xf32> to vector<8x1xf32>
    %cst_32 = arith.constant 3.200000e+01 : f32
    %87 = vector.broadcast %cst_32 : f32 to vector<8x1xf32>
    %88 = arith.divf %86, %87 : vector<8x1xf32>
    %89 = vector.broadcast %88 : vector<8x1xf32> to vector<8x32xf32>
    %90 = arith.subf %84, %89 : vector<8x32xf32>
    %91 = arith.mulf %90, %90 : vector<8x32xf32>
    %cst_33 = arith.constant dense<0.000000e+00> : vector<8xf32>
    %92 = vector.multi_reduction <add>, %91, %cst_33 [1] : vector<8x32xf32> to vector<8xf32>
    %93 = vector.shape_cast %92 : vector<8xf32> to vector<8x1xf32>
    %cst_34 = arith.constant 3.200000e+01 : f32
    %94 = vector.broadcast %cst_34 : f32 to vector<8x1xf32>
    %95 = arith.divf %93, %94 : vector<8x1xf32>
    %96 = vector.broadcast %88 : vector<8x1xf32> to vector<8x32xf32>
    %97 = arith.subf %84, %96 : vector<8x32xf32>
    %cst_35 = arith.constant 9.99999974E-6 : f32
    %98 = vector.broadcast %cst_35 : f32 to vector<8x1xf32>
    %99 = arith.addf %95, %98 : vector<8x1xf32>
    %100 = math.rsqrt %99 : vector<8x1xf32>
    %101 = vector.broadcast %100 : vector<8x1xf32> to vector<8x32xf32>
    %102 = arith.mulf %97, %101 : vector<8x32xf32>
    %c0_36 = arith.constant 0 : index
    %c0_37 = arith.constant 0 : index
    %103 = vector.load %arg13[%c0_36, %c0_37] : memref<1x32xf32, #tpu.memory_space<vmem>>, vector<1x32xf32>
    %104 = vector.broadcast %103 : vector<1x32xf32> to vector<8x32xf32>
    %105 = arith.mulf %102, %104 : vector<8x32xf32>
    %c0_38 = arith.constant 0 : index
    %c0_39 = arith.constant 0 : index
    %106 = vector.load %arg14[%c0_38, %c0_39] : memref<1x32xf32, #tpu.memory_space<vmem>>, vector<1x32xf32>
    %107 = vector.broadcast %106 : vector<1x32xf32> to vector<8x32xf32>
    %108 = arith.addf %105, %107 : vector<8x32xf32>
    %c0_40 = arith.constant 0 : index
    %c0_41 = arith.constant 0 : index
    %c0_42 = arith.constant 0 : index
    %109 = vector.load %arg15[%c0_40, %c0_41, %c0_42] : memref<1x8x32xf32, #tpu.memory_space<vmem>>, vector<1x8x32xf32>
    %110 = vector.shape_cast %109 : vector<1x8x32xf32> to vector<8x32xf32>
    %111 = vector.shape_cast %108 : vector<8x32xf32> to vector<1x8x32xf32>
    tpu.vector_store %arg15[%c0_40, %c0_41, %c0_42], %111 {strides = array<i32>} : memref<1x8x32xf32, #tpu.memory_space<vmem>>, vector<1x8x32xf32>,
    return
  }
  func.func @transform_0(%arg0: i32, %arg1: i32) -> (i32, i32, i32) {
    %c0_i32 = arith.constant 0 : i32
    %c0_i32_0 = arith.constant 0 : i32
    return %arg0, %arg1, %c0_i32 : i32, i32, i32
  }
  func.func @transform_1(%arg0: i32, %arg1: i32) -> (i32, i32, i32) {
    %c0_i32 = arith.constant 0 : i32
    %c0_i32_0 = arith.constant 0 : i32
    %c0_i32_1 = arith.constant 0 : i32
    return %arg0, %c0_i32, %c0_i32_0 : i32, i32, i32
  }
  func.func @transform_2(%arg0: i32, %arg1: i32) -> (i32, i32, i32) {
    %c0_i32 = arith.constant 0 : i32
    %c0_i32_0 = arith.constant 0 : i32
    %c0_i32_1 = arith.constant 0 : i32
    return %arg0, %c0_i32, %c0_i32_0 : i32, i32, i32
  }
  func.func @transform_3(%arg0: i32, %arg1: i32) -> (i32, i32) {
    %c0_i32 = arith.constant 0 : i32
    %c0_i32_0 = arith.constant 0 : i32
    %c0_i32_1 = arith.constant 0 : i32
    return %c0_i32, %c0_i32_0 : i32, i32
  }
  func.func @transform_4(%arg0: i32, %arg1: i32) -> (i32, i32) {
    %c0_i32 = arith.constant 0 : i32
    %c0_i32_0 = arith.constant 0 : i32
    %c0_i32_1 = arith.constant 0 : i32
    return %c0_i32, %c0_i32_0 : i32, i32
  }
  func.func @transform_5(%arg0: i32, %arg1: i32) -> (i32, i32) {
    %c0_i32 = arith.constant 0 : i32
    %c0_i32_0 = arith.constant 0 : i32
    %c0_i32_1 = arith.constant 0 : i32
    return %c0_i32, %c0_i32_0 : i32, i32
  }
  func.func @transform_6(%arg0: i32, %arg1: i32) -> (i32, i32) {
    %c0_i32 = arith.constant 0 : i32
    %c0_i32_0 = arith.constant 0 : i32
    %c0_i32_1 = arith.constant 0 : i32
    return %c0_i32, %c0_i32_0 : i32, i32
  }
  func.func @transform_7(%arg0: i32, %arg1: i32) -> (i32, i32) {
    %c0_i32 = arith.constant 0 : i32
    %c0_i32_0 = arith.constant 0 : i32
    %c0_i32_1 = arith.constant 0 : i32
    return %c0_i32, %c0_i32_0 : i32, i32
  }
  func.func @transform_8(%arg0: i32, %arg1: i32) -> (i32, i32) {
    %c0_i32 = arith.constant 0 : i32
    %c0_i32_0 = arith.constant 0 : i32
    %c0_i32_1 = arith.constant 0 : i32
    return %c0_i32, %c0_i32_0 : i32, i32
  }
  func.func @transform_9(%arg0: i32, %arg1: i32) -> (i32, i32) {
    %c0_i32 = arith.constant 0 : i32
    %c0_i32_0 = arith.constant 0 : i32
    %c0_i32_1 = arith.constant 0 : i32
    return %c0_i32, %c0_i32_0 : i32, i32
  }
  func.func @transform_10(%arg0: i32, %arg1: i32) -> (i32, i32) {
    %c0_i32 = arith.constant 0 : i32
    %c0_i32_0 = arith.constant 0 : i32
    %c0_i32_1 = arith.constant 0 : i32
    return %c0_i32, %c0_i32_0 : i32, i32
  }
  func.func @transform_11(%arg0: i32, %arg1: i32) -> (i32, i32) {
    %c0_i32 = arith.constant 0 : i32
    %c0_i32_0 = arith.constant 0 : i32
    %c0_i32_1 = arith.constant 0 : i32
    return %c0_i32, %c0_i32_0 : i32, i32
  }
  func.func @transform_12(%arg0: i32, %arg1: i32) -> (i32, i32) {
    %c0_i32 = arith.constant 0 : i32
    %c0_i32_0 = arith.constant 0 : i32
    %c0_i32_1 = arith.constant 0 : i32
    return %c0_i32, %c0_i32_0 : i32, i32
  }
  func.func @transform_13(%arg0: i32, %arg1: i32) -> (i32, i32, i32) {
    %c0_i32 = arith.constant 0 : i32
    %c0_i32_0 = arith.constant 0 : i32
    return %arg0, %arg1, %c0_i32 : i32, i32, i32
  }
}

module attributes {stable_mosaic.version = 11 : i64} {
  func.func @_ffn_ln_kernel(%arg0: i32, %arg1: memref<16x32xf32, #tpu.memory_space<vmem>>, %arg2: memref<32x64xbf16, #tpu.memory_space<vmem>>, %arg3: memref<1x64xf32, #tpu.memory_space<vmem>>, %arg4: memref<64x32xbf16, #tpu.memory_space<vmem>>, %arg5: memref<1x32xf32, #tpu.memory_space<vmem>>, %arg6: memref<1x32xf32, #tpu.memory_space<vmem>>, %arg7: memref<1x32xf32, #tpu.memory_space<vmem>>, %arg8: memref<1x32xf32, #tpu.memory_space<vmem>>, %arg9: memref<1x32xf32, #tpu.memory_space<vmem>>, %arg10: memref<16x32xf32, #tpu.memory_space<vmem>>) attributes {dimension_semantics = [#tpu.dimension_semantics<parallel>], iteration_bounds = array<i64: 1>, scalar_prefetch = 0 : i64, scratch_operands = 0 : i64, tpu.core_type = #tpu.core_type<tc>, window_params = [{transform_indices = @transform_0, window_bounds = array<i64: 16, 32>}, {pipeline_mode = #tpu.pipeline_mode<synchronous>, transform_indices = @transform_1, window_bounds = array<i64: 32, 64>}, {pipeline_mode = #tpu.pipeline_mode<synchronous>, transform_indices = @transform_2, window_bounds = array<i64: 1, 64>}, {pipeline_mode = #tpu.pipeline_mode<synchronous>, transform_indices = @transform_3, window_bounds = array<i64: 64, 32>}, {pipeline_mode = #tpu.pipeline_mode<synchronous>, transform_indices = @transform_4, window_bounds = array<i64: 1, 32>}, {pipeline_mode = #tpu.pipeline_mode<synchronous>, transform_indices = @transform_5, window_bounds = array<i64: 1, 32>}, {pipeline_mode = #tpu.pipeline_mode<synchronous>, transform_indices = @transform_6, window_bounds = array<i64: 1, 32>}, {pipeline_mode = #tpu.pipeline_mode<synchronous>, transform_indices = @transform_7, window_bounds = array<i64: 1, 32>}, {pipeline_mode = #tpu.pipeline_mode<synchronous>, transform_indices = @transform_8, window_bounds = array<i64: 1, 32>}, {transform_indices = @transform_9, window_bounds = array<i64: 16, 32>}]} {
    %c0 = arith.constant 0 : index
    %c0_0 = arith.constant 0 : index
    %0 = vector.load %arg1[%c0, %c0_0] : memref<16x32xf32, #tpu.memory_space<vmem>>, vector<16x32xf32>
    %1 = arith.truncf %0 : vector<16x32xf32> to vector<16x32xbf16>
    %c0_1 = arith.constant 0 : index
    %c0_2 = arith.constant 0 : index
    %2 = vector.load %arg2[%c0_1, %c0_2] : memref<32x64xbf16, #tpu.memory_space<vmem>>, vector<32x64xbf16>
    %cst = arith.constant dense<0.000000e+00> : vector<16x64xf32>
    %3 = tpu.matmul %1, %2, %cst {dimension_numbers = #tpu.dot_dimension_numbers<[1], [0], [0], [1], [0, 0, 1, 1], [], []>} : vector<16x32xbf16>, vector<32x64xbf16>, vector<16x64xf32> -> vector<16x64xf32>
    %c0_3 = arith.constant 0 : index
    %c0_4 = arith.constant 0 : index
    %4 = vector.load %arg3[%c0_3, %c0_4] : memref<1x64xf32, #tpu.memory_space<vmem>>, vector<1x64xf32>
    %5 = vector.broadcast %4 : vector<1x64xf32> to vector<16x64xf32>
    %6 = arith.addf %3, %5 : vector<16x64xf32>
    %cst_5 = arith.constant 0.000000e+00 : f32
    %7 = vector.broadcast %cst_5 : f32 to vector<16x64xf32>
    %8 = arith.maximumf %6, %7 : vector<16x64xf32>
    %9 = arith.truncf %8 : vector<16x64xf32> to vector<16x64xbf16>
    %c0_6 = arith.constant 0 : index
    %c0_7 = arith.constant 0 : index
    %10 = vector.load %arg4[%c0_6, %c0_7] : memref<64x32xbf16, #tpu.memory_space<vmem>>, vector<64x32xbf16>
    %cst_8 = arith.constant dense<0.000000e+00> : vector<16x32xf32>
    %11 = tpu.matmul %9, %10, %cst_8 {dimension_numbers = #tpu.dot_dimension_numbers<[1], [0], [0], [1], [0, 0, 1, 1], [], []>} : vector<16x64xbf16>, vector<64x32xbf16>, vector<16x32xf32> -> vector<16x32xf32>
    %c0_9 = arith.constant 0 : index
    %c0_10 = arith.constant 0 : index
    %12 = vector.load %arg5[%c0_9, %c0_10] : memref<1x32xf32, #tpu.memory_space<vmem>>, vector<1x32xf32>
    %13 = vector.broadcast %12 : vector<1x32xf32> to vector<16x32xf32>
    %14 = arith.addf %11, %13 : vector<16x32xf32>
    %15 = arith.addf %0, %14 : vector<16x32xf32>
    %cst_11 = arith.constant dense<0.000000e+00> : vector<16xf32>
    %16 = vector.multi_reduction <add>, %15, %cst_11 [1] : vector<16x32xf32> to vector<16xf32>
    %17 = vector.shape_cast %16 : vector<16xf32> to vector<16x1xf32>
    %cst_12 = arith.constant 3.200000e+01 : f32
    %18 = vector.broadcast %cst_12 : f32 to vector<16x1xf32>
    %19 = arith.divf %17, %18 : vector<16x1xf32>
    %20 = vector.broadcast %19 : vector<16x1xf32> to vector<16x32xf32>
    %21 = arith.subf %15, %20 : vector<16x32xf32>
    %22 = arith.mulf %21, %21 : vector<16x32xf32>
    %cst_13 = arith.constant dense<0.000000e+00> : vector<16xf32>
    %23 = vector.multi_reduction <add>, %22, %cst_13 [1] : vector<16x32xf32> to vector<16xf32>
    %24 = vector.shape_cast %23 : vector<16xf32> to vector<16x1xf32>
    %cst_14 = arith.constant 3.200000e+01 : f32
    %25 = vector.broadcast %cst_14 : f32 to vector<16x1xf32>
    %26 = arith.divf %24, %25 : vector<16x1xf32>
    %27 = vector.broadcast %19 : vector<16x1xf32> to vector<16x32xf32>
    %28 = arith.subf %15, %27 : vector<16x32xf32>
    %cst_15 = arith.constant 9.99999974E-6 : f32
    %29 = vector.broadcast %cst_15 : f32 to vector<16x1xf32>
    %30 = arith.addf %26, %29 : vector<16x1xf32>
    %31 = math.rsqrt %30 : vector<16x1xf32>
    %32 = vector.broadcast %31 : vector<16x1xf32> to vector<16x32xf32>
    %33 = arith.mulf %28, %32 : vector<16x32xf32>
    %c0_16 = arith.constant 0 : index
    %c0_17 = arith.constant 0 : index
    %34 = vector.load %arg6[%c0_16, %c0_17] : memref<1x32xf32, #tpu.memory_space<vmem>>, vector<1x32xf32>
    %35 = vector.broadcast %34 : vector<1x32xf32> to vector<16x32xf32>
    %36 = arith.mulf %33, %35 : vector<16x32xf32>
    %c0_18 = arith.constant 0 : index
    %c0_19 = arith.constant 0 : index
    %37 = vector.load %arg7[%c0_18, %c0_19] : memref<1x32xf32, #tpu.memory_space<vmem>>, vector<1x32xf32>
    %38 = vector.broadcast %37 : vector<1x32xf32> to vector<16x32xf32>
    %39 = arith.addf %36, %38 : vector<16x32xf32>
    %cst_20 = arith.constant dense<0.000000e+00> : vector<16xf32>
    %40 = vector.multi_reduction <add>, %39, %cst_20 [1] : vector<16x32xf32> to vector<16xf32>
    %41 = vector.shape_cast %40 : vector<16xf32> to vector<16x1xf32>
    %cst_21 = arith.constant 3.200000e+01 : f32
    %42 = vector.broadcast %cst_21 : f32 to vector<16x1xf32>
    %43 = arith.divf %41, %42 : vector<16x1xf32>
    %44 = vector.broadcast %43 : vector<16x1xf32> to vector<16x32xf32>
    %45 = arith.subf %39, %44 : vector<16x32xf32>
    %46 = arith.mulf %45, %45 : vector<16x32xf32>
    %cst_22 = arith.constant dense<0.000000e+00> : vector<16xf32>
    %47 = vector.multi_reduction <add>, %46, %cst_22 [1] : vector<16x32xf32> to vector<16xf32>
    %48 = vector.shape_cast %47 : vector<16xf32> to vector<16x1xf32>
    %cst_23 = arith.constant 3.200000e+01 : f32
    %49 = vector.broadcast %cst_23 : f32 to vector<16x1xf32>
    %50 = arith.divf %48, %49 : vector<16x1xf32>
    %51 = vector.broadcast %43 : vector<16x1xf32> to vector<16x32xf32>
    %52 = arith.subf %39, %51 : vector<16x32xf32>
    %cst_24 = arith.constant 9.99999974E-6 : f32
    %53 = vector.broadcast %cst_24 : f32 to vector<16x1xf32>
    %54 = arith.addf %50, %53 : vector<16x1xf32>
    %55 = math.rsqrt %54 : vector<16x1xf32>
    %56 = vector.broadcast %55 : vector<16x1xf32> to vector<16x32xf32>
    %57 = arith.mulf %52, %56 : vector<16x32xf32>
    %c0_25 = arith.constant 0 : index
    %c0_26 = arith.constant 0 : index
    %58 = vector.load %arg8[%c0_25, %c0_26] : memref<1x32xf32, #tpu.memory_space<vmem>>, vector<1x32xf32>
    %59 = vector.broadcast %58 : vector<1x32xf32> to vector<16x32xf32>
    %60 = arith.mulf %57, %59 : vector<16x32xf32>
    %c0_27 = arith.constant 0 : index
    %c0_28 = arith.constant 0 : index
    %61 = vector.load %arg9[%c0_27, %c0_28] : memref<1x32xf32, #tpu.memory_space<vmem>>, vector<1x32xf32>
    %62 = vector.broadcast %61 : vector<1x32xf32> to vector<16x32xf32>
    %63 = arith.addf %60, %62 : vector<16x32xf32>
    %c0_29 = arith.constant 0 : index
    %c0_30 = arith.constant 0 : index
    %64 = vector.load %arg10[%c0_29, %c0_30] : memref<16x32xf32, #tpu.memory_space<vmem>>, vector<16x32xf32>
    tpu.vector_store %arg10[%c0_29, %c0_30], %63 {strides = array<i32>} : memref<16x32xf32, #tpu.memory_space<vmem>>, vector<16x32xf32>,
    return
  }
  func.func @transform_0(%arg0: i32) -> (i32, i32) {
    %c0_i32 = arith.constant 0 : i32
    %c0_i32_0 = arith.constant 0 : i32
    return %arg0, %c0_i32 : i32, i32
  }
  func.func @transform_1(%arg0: i32) -> (i32, i32) {
    %c0_i32 = arith.constant 0 : i32
    %c0_i32_0 = arith.constant 0 : i32
    %c0_i32_1 = arith.constant 0 : i32
    return %c0_i32, %c0_i32_0 : i32, i32
  }
  func.func @transform_2(%arg0: i32) -> (i32, i32) {
    %c0_i32 = arith.constant 0 : i32
    %c0_i32_0 = arith.constant 0 : i32
    %c0_i32_1 = arith.constant 0 : i32
    return %c0_i32, %c0_i32_0 : i32, i32
  }
  func.func @transform_3(%arg0: i32) -> (i32, i32) {
    %c0_i32 = arith.constant 0 : i32
    %c0_i32_0 = arith.constant 0 : i32
    %c0_i32_1 = arith.constant 0 : i32
    return %c0_i32, %c0_i32_0 : i32, i32
  }
  func.func @transform_4(%arg0: i32) -> (i32, i32) {
    %c0_i32 = arith.constant 0 : i32
    %c0_i32_0 = arith.constant 0 : i32
    %c0_i32_1 = arith.constant 0 : i32
    return %c0_i32, %c0_i32_0 : i32, i32
  }
  func.func @transform_5(%arg0: i32) -> (i32, i32) {
    %c0_i32 = arith.constant 0 : i32
    %c0_i32_0 = arith.constant 0 : i32
    %c0_i32_1 = arith.constant 0 : i32
    return %c0_i32, %c0_i32_0 : i32, i32
  }
  func.func @transform_6(%arg0: i32) -> (i32, i32) {
    %c0_i32 = arith.constant 0 : i32
    %c0_i32_0 = arith.constant 0 : i32
    %c0_i32_1 = arith.constant 0 : i32
    return %c0_i32, %c0_i32_0 : i32, i32
  }
  func.func @transform_7(%arg0: i32) -> (i32, i32) {
    %c0_i32 = arith.constant 0 : i32
    %c0_i32_0 = arith.constant 0 : i32
    %c0_i32_1 = arith.constant 0 : i32
    return %c0_i32, %c0_i32_0 : i32, i32
  }
  func.func @transform_8(%arg0: i32) -> (i32, i32) {
    %c0_i32 = arith.constant 0 : i32
    %c0_i32_0 = arith.constant 0 : i32
    %c0_i32_1 = arith.constant 0 : i32
    return %c0_i32, %c0_i32_0 : i32, i32
  }
  func.func @transform_9(%arg0: i32) -> (i32, i32) {
    %c0_i32 = arith.constant 0 : i32
    %c0_i32_0 = arith.constant 0 : i32
    return %arg0, %c0_i32 : i32, i32
  }
}

module attributes {stable_mosaic.version = 11 : i64} {
  func.func @_mha_ln_kernel(%arg0: i32, %arg1: i32, %arg2: memref<1x8x32xf32, #tpu.memory_space<vmem>>, %arg3: memref<1x8x32xf32, #tpu.memory_space<vmem>>, %arg4: memref<8x8xf32, #tpu.memory_space<vmem>>, %arg5: memref<1x1x8xf32, #tpu.memory_space<vmem>>, %arg6: memref<32x32xbf16, #tpu.memory_space<vmem>>, %arg7: memref<1x32xf32, #tpu.memory_space<vmem>>, %arg8: memref<32x32xbf16, #tpu.memory_space<vmem>>, %arg9: memref<1x32xf32, #tpu.memory_space<vmem>>, %arg10: memref<32x32xbf16, #tpu.memory_space<vmem>>, %arg11: memref<1x32xf32, #tpu.memory_space<vmem>>, %arg12: memref<32x32xbf16, #tpu.memory_space<vmem>>, %arg13: memref<1x32xf32, #tpu.memory_space<vmem>>, %arg14: memref<1x32xf32, #tpu.memory_space<vmem>>, %arg15: memref<1x32xf32, #tpu.memory_space<vmem>>, %arg16: memref<1x8x32xf32, #tpu.memory_space<vmem>>) attributes {dimension_semantics = [#tpu.dimension_semantics<parallel>, #tpu.dimension_semantics<parallel>], iteration_bounds = array<i64: 2, 1>, scalar_prefetch = 0 : i64, scratch_operands = 0 : i64, tpu.core_type = #tpu.core_type<tc>, window_params = [{transform_indices = @transform_0, window_bounds = array<i64: 1, 8, 32>}, {transform_indices = @transform_1, window_bounds = array<i64: 1, 8, 32>}, {transform_indices = @transform_2, window_bounds = array<i64: 8, 8>}, {transform_indices = @transform_3, window_bounds = array<i64: 1, 1, 8>}, {pipeline_mode = #tpu.pipeline_mode<synchronous>, transform_indices = @transform_4, window_bounds = array<i64: 32, 32>}, {pipeline_mode = #tpu.pipeline_mode<synchronous>, transform_indices = @transform_5, window_bounds = array<i64: 1, 32>}, {pipeline_mode = #tpu.pipeline_mode<synchronous>, transform_indices = @transform_6, window_bounds = array<i64: 32, 32>}, {pipeline_mode = #tpu.pipeline_mode<synchronous>, transform_indices = @transform_7, window_bounds = array<i64: 1, 32>}, {pipeline_mode = #tpu.pipeline_mode<synchronous>, transform_indices = @transform_8, window_bounds = array<i64: 32, 32>}, {pipeline_mode = #tpu.pipeline_mode<synchronous>, transform_indices = @transform_9, window_bounds = array<i64: 1, 32>}, {pipeline_mode = #tpu.pipeline_mode<synchronous>, transform_indices = @transform_10, window_bounds = array<i64: 32, 32>}, {pipeline_mode = #tpu.pipeline_mode<synchronous>, transform_indices = @transform_11, window_bounds = array<i64: 1, 32>}, {pipeline_mode = #tpu.pipeline_mode<synchronous>, transform_indices = @transform_12, window_bounds = array<i64: 1, 32>}, {pipeline_mode = #tpu.pipeline_mode<synchronous>, transform_indices = @transform_13, window_bounds = array<i64: 1, 32>}, {transform_indices = @transform_14, window_bounds = array<i64: 1, 8, 32>}]} {
    %c0 = arith.constant 0 : index
    %c0_0 = arith.constant 0 : index
    %c0_1 = arith.constant 0 : index
    %0 = vector.load %arg2[%c0, %c0_0, %c0_1] : memref<1x8x32xf32, #tpu.memory_space<vmem>>, vector<1x8x32xf32>
    %1 = vector.shape_cast %0 : vector<1x8x32xf32> to vector<8x32xf32>
    %c0_2 = arith.constant 0 : index
    %c0_3 = arith.constant 0 : index
    %c0_4 = arith.constant 0 : index
    %2 = vector.load %arg3[%c0_2, %c0_3, %c0_4] : memref<1x8x32xf32, #tpu.memory_space<vmem>>, vector<1x8x32xf32>
    %3 = vector.shape_cast %2 : vector<1x8x32xf32> to vector<8x32xf32>
    %4 = arith.truncf %1 : vector<8x32xf32> to vector<8x32xbf16>
    %5 = arith.truncf %3 : vector<8x32xf32> to vector<8x32xbf16>
    %c0_5 = arith.constant 0 : index
    %c0_6 = arith.constant 0 : index
    %6 = vector.load %arg6[%c0_5, %c0_6] : memref<32x32xbf16, #tpu.memory_space<vmem>>, vector<32x32xbf16>
    %cst = arith.constant dense<0.000000e+00> : vector<8x32xf32>
    %7 = tpu.matmul %4, %6, %cst {dimension_numbers = #tpu.dot_dimension_numbers<[1], [0], [0], [1], [0, 0, 1, 1], [], []>} : vector<8x32xbf16>, vector<32x32xbf16>, vector<8x32xf32> -> vector<8x32xf32>
    %c0_7 = arith.constant 0 : index
    %c0_8 = arith.constant 0 : index
    %8 = vector.load %arg7[%c0_7, %c0_8] : memref<1x32xf32, #tpu.memory_space<vmem>>, vector<1x32xf32>
    %9 = vector.broadcast %8 : vector<1x32xf32> to vector<8x32xf32>
    %10 = arith.addf %7, %9 : vector<8x32xf32>
    %c0_9 = arith.constant 0 : index
    %c0_10 = arith.constant 0 : index
    %11 = vector.load %arg8[%c0_9, %c0_10] : memref<32x32xbf16, #tpu.memory_space<vmem>>, vector<32x32xbf16>
    %cst_11 = arith.constant dense<0.000000e+00> : vector<8x32xf32>
    %12 = tpu.matmul %5, %11, %cst_11 {dimension_numbers = #tpu.dot_dimension_numbers<[1], [0], [0], [1], [0, 0, 1, 1], [], []>} : vector<8x32xbf16>, vector<32x32xbf16>, vector<8x32xf32> -> vector<8x32xf32>
    %c0_12 = arith.constant 0 : index
    %c0_13 = arith.constant 0 : index
    %13 = vector.load %arg9[%c0_12, %c0_13] : memref<1x32xf32, #tpu.memory_space<vmem>>, vector<1x32xf32>
    %14 = vector.broadcast %13 : vector<1x32xf32> to vector<8x32xf32>
    %15 = arith.addf %12, %14 : vector<8x32xf32>
    %c0_14 = arith.constant 0 : index
    %c0_15 = arith.constant 0 : index
    %16 = vector.load %arg10[%c0_14, %c0_15] : memref<32x32xbf16, #tpu.memory_space<vmem>>, vector<32x32xbf16>
    %cst_16 = arith.constant dense<0.000000e+00> : vector<8x32xf32>
    %17 = tpu.matmul %5, %16, %cst_16 {dimension_numbers = #tpu.dot_dimension_numbers<[1], [0], [0], [1], [0, 0, 1, 1], [], []>} : vector<8x32xbf16>, vector<32x32xbf16>, vector<8x32xf32> -> vector<8x32xf32>
    %c0_17 = arith.constant 0 : index
    %c0_18 = arith.constant 0 : index
    %18 = vector.load %arg11[%c0_17, %c0_18] : memref<1x32xf32, #tpu.memory_space<vmem>>, vector<1x32xf32>
    %19 = vector.broadcast %18 : vector<1x32xf32> to vector<8x32xf32>
    %20 = arith.addf %17, %19 : vector<8x32xf32>
    %21 = arith.truncf %10 : vector<8x32xf32> to vector<8x32xbf16>
    %22 = arith.truncf %15 : vector<8x32xf32> to vector<8x32xbf16>
    %23 = arith.truncf %20 : vector<8x32xf32> to vector<8x32xbf16>
    %24 = vector.extract_strided_slice %21 {offsets = [0, 0], sizes = [8, 8], strides = [1, 1]} : vector<8x32xbf16> to vector<8x8xbf16>
    %25 = vector.extract_strided_slice %21 {offsets = [0, 8], sizes = [8, 8], strides = [1, 1]} : vector<8x32xbf16> to vector<8x8xbf16>
    %26 = vector.extract_strided_slice %21 {offsets = [0, 16], sizes = [8, 8], strides = [1, 1]} : vector<8x32xbf16> to vector<8x8xbf16>
    %27 = vector.extract_strided_slice %21 {offsets = [0, 24], sizes = [8, 8], strides = [1, 1]} : vector<8x32xbf16> to vector<8x8xbf16>
    %28 = vector.shape_cast %24 : vector<8x8xbf16> to vector<1x8x8xbf16>
    %29 = vector.shape_cast %25 : vector<8x8xbf16> to vector<1x8x8xbf16>
    %30 = vector.shape_cast %26 : vector<8x8xbf16> to vector<1x8x8xbf16>
    %31 = vector.shape_cast %27 : vector<8x8xbf16> to vector<1x8x8xbf16>
    %32 = tpu.concatenate %28, %29, %30, %31 in 0 : vector<1x8x8xbf16>, vector<1x8x8xbf16>, vector<1x8x8xbf16>, vector<1x8x8xbf16> -> vector<4x8x8xbf16>
    %33 = vector.extract_strided_slice %22 {offsets = [0, 0], sizes = [8, 8], strides = [1, 1]} : vector<8x32xbf16> to vector<8x8xbf16>
    %34 = vector.extract_strided_slice %22 {offsets = [0, 8], sizes = [8, 8], strides = [1, 1]} : vector<8x32xbf16> to vector<8x8xbf16>
    %35 = vector.extract_strided_slice %22 {offsets = [0, 16], sizes = [8, 8], strides = [1, 1]} : vector<8x32xbf16> to vector<8x8xbf16>
    %36 = vector.extract_strided_slice %22 {offsets = [0, 24], sizes = [8, 8], strides = [1, 1]} : vector<8x32xbf16> to vector<8x8xbf16>
    %37 = vector.shape_cast %33 : vector<8x8xbf16> to vector<1x8x8xbf16>
    %38 = vector.shape_cast %34 : vector<8x8xbf16> to vector<1x8x8xbf16>
    %39 = vector.shape_cast %35 : vector<8x8xbf16> to vector<1x8x8xbf16>
    %40 = vector.shape_cast %36 : vector<8x8xbf16> to vector<1x8x8xbf16>
    %41 = tpu.concatenate %37, %38, %39, %40 in 0 : vector<1x8x8xbf16>, vector<1x8x8xbf16>, vector<1x8x8xbf16>, vector<1x8x8xbf16> -> vector<4x8x8xbf16>
    %42 = vector.extract_strided_slice %23 {offsets = [0, 0], sizes = [8, 8], strides = [1, 1]} : vector<8x32xbf16> to vector<8x8xbf16>
    %43 = vector.extract_strided_slice %23 {offsets = [0, 8], sizes = [8, 8], strides = [1, 1]} : vector<8x32xbf16> to vector<8x8xbf16>
    %44 = vector.extract_strided_slice %23 {offsets = [0, 16], sizes = [8, 8], strides = [1, 1]} : vector<8x32xbf16> to vector<8x8xbf16>
    %45 = vector.extract_strided_slice %23 {offsets = [0, 24], sizes = [8, 8], strides = [1, 1]} : vector<8x32xbf16> to vector<8x8xbf16>
    %46 = vector.shape_cast %42 : vector<8x8xbf16> to vector<1x8x8xbf16>
    %47 = vector.shape_cast %43 : vector<8x8xbf16> to vector<1x8x8xbf16>
    %48 = vector.shape_cast %44 : vector<8x8xbf16> to vector<1x8x8xbf16>
    %49 = vector.shape_cast %45 : vector<8x8xbf16> to vector<1x8x8xbf16>
    %50 = tpu.concatenate %46, %47, %48, %49 in 0 : vector<1x8x8xbf16>, vector<1x8x8xbf16>, vector<1x8x8xbf16>, vector<1x8x8xbf16> -> vector<4x8x8xbf16>
    "tpu.trace_start"() <{level = 10 : i32, message = "hqd,hkd->hqk"}> : () -> ()
    %cst_19 = arith.constant dense<0.000000e+00> : vector<4x8x8xf32>
    %51 = tpu.matmul %32, %41, %cst_19 {dimension_numbers = #tpu.dot_dimension_numbers<[2], [2], [1], [1], [0, 0, 0, 1, 1, 1], [0], [0]>} : vector<4x8x8xbf16>, vector<4x8x8xbf16>, vector<4x8x8xf32> -> vector<4x8x8xf32>
    "tpu.trace_stop"() : () -> ()
    %c0_20 = arith.constant 0 : index
    %c0_21 = arith.constant 0 : index
    %52 = vector.load %arg4[%c0_20, %c0_21] : memref<8x8xf32, #tpu.memory_space<vmem>>, vector<8x8xf32>
    %c0_22 = arith.constant 0 : index
    %c0_23 = arith.constant 0 : index
    %c0_24 = arith.constant 0 : index
    %53 = vector.load %arg5[%c0_22, %c0_23, %c0_24] : memref<1x1x8xf32, #tpu.memory_space<vmem>>, vector<1x1x8xf32>
    %54 = vector.shape_cast %53 : vector<1x1x8xf32> to vector<1x8xf32>
    %55 = vector.broadcast %54 : vector<1x8xf32> to vector<8x8xf32>
    %56 = arith.addf %52, %55 : vector<8x8xf32>
    %57 = vector.shape_cast %56 : vector<8x8xf32> to vector<1x8x8xf32>
    %58 = vector.broadcast %57 : vector<1x8x8xf32> to vector<4x8x8xf32>
    %59 = arith.addf %51, %58 : vector<4x8x8xf32>
    %cst_25 = arith.constant dense<0xFF800000> : vector<4x8xf32>
    %60 = vector.multi_reduction <maximumf>, %59, %cst_25 [2] : vector<4x8x8xf32> to vector<4x8xf32>
    %61 = vector.shape_cast %60 : vector<4x8xf32> to vector<4x8x1xf32>
    %62 = vector.broadcast %61 : vector<4x8x1xf32> to vector<4x8x8xf32>
    %63 = arith.subf %59, %62 : vector<4x8x8xf32>
    %64 = math.exp %63 : vector<4x8x8xf32>
    %cst_26 = arith.constant dense<0.000000e+00> : vector<4x8xf32>
    %65 = vector.multi_reduction <add>, %64, %cst_26 [2] : vector<4x8x8xf32> to vector<4x8xf32>
    %66 = vector.shape_cast %65 : vector<4x8xf32> to vector<4x8x1xf32>
    %67 = tpu.reciprocal %66 {approx = true} : vector<4x8x1xf32> -> vector<4x8x1xf32>
    %68 = vector.broadcast %67 : vector<4x8x1xf32> to vector<4x8x8xf32>
    %69 = arith.mulf %64, %68 : vector<4x8x8xf32>
    %70 = arith.truncf %69 : vector<4x8x8xf32> to vector<4x8x8xbf16>
    "tpu.trace_start"() <{level = 10 : i32, message = "hqk,hkd->hqd"}> : () -> ()
    %cst_27 = arith.constant dense<0.000000e+00> : vector<4x8x8xf32>
    %71 = tpu.matmul %70, %50, %cst_27 {dimension_numbers = #tpu.dot_dimension_numbers<[2], [1], [1], [2], [0, 0, 0, 1, 1, 2], [0], [0]>} : vector<4x8x8xbf16>, vector<4x8x8xbf16>, vector<4x8x8xf32> -> vector<4x8x8xf32>
    "tpu.trace_stop"() : () -> ()
    %72 = vector.extract_strided_slice %71 {offsets = [0, 0, 0], sizes = [1, 8, 8], strides = [1, 1, 1]} : vector<4x8x8xf32> to vector<1x8x8xf32>
    %73 = vector.shape_cast %72 : vector<1x8x8xf32> to vector<8x8xf32>
    %74 = vector.extract_strided_slice %71 {offsets = [1, 0, 0], sizes = [1, 8, 8], strides = [1, 1, 1]} : vector<4x8x8xf32> to vector<1x8x8xf32>
    %75 = vector.shape_cast %74 : vector<1x8x8xf32> to vector<8x8xf32>
    %76 = vector.extract_strided_slice %71 {offsets = [2, 0, 0], sizes = [1, 8, 8], strides = [1, 1, 1]} : vector<4x8x8xf32> to vector<1x8x8xf32>
    %77 = vector.shape_cast %76 : vector<1x8x8xf32> to vector<8x8xf32>
    %78 = vector.extract_strided_slice %71 {offsets = [3, 0, 0], sizes = [1, 8, 8], strides = [1, 1, 1]} : vector<4x8x8xf32> to vector<1x8x8xf32>
    %79 = vector.shape_cast %78 : vector<1x8x8xf32> to vector<8x8xf32>
    %80 = tpu.concatenate %73, %75, %77, %79 in 1 : vector<8x8xf32>, vector<8x8xf32>, vector<8x8xf32>, vector<8x8xf32> -> vector<8x32xf32>
    %81 = arith.truncf %80 : vector<8x32xf32> to vector<8x32xbf16>
    %c0_28 = arith.constant 0 : index
    %c0_29 = arith.constant 0 : index
    %82 = vector.load %arg12[%c0_28, %c0_29] : memref<32x32xbf16, #tpu.memory_space<vmem>>, vector<32x32xbf16>
    %cst_30 = arith.constant dense<0.000000e+00> : vector<8x32xf32>
    %83 = tpu.matmul %81, %82, %cst_30 {dimension_numbers = #tpu.dot_dimension_numbers<[1], [0], [0], [1], [0, 0, 1, 1], [], []>} : vector<8x32xbf16>, vector<32x32xbf16>, vector<8x32xf32> -> vector<8x32xf32>
    %c0_31 = arith.constant 0 : index
    %c0_32 = arith.constant 0 : index
    %84 = vector.load %arg13[%c0_31, %c0_32] : memref<1x32xf32, #tpu.memory_space<vmem>>, vector<1x32xf32>
    %85 = vector.broadcast %84 : vector<1x32xf32> to vector<8x32xf32>
    %86 = arith.addf %83, %85 : vector<8x32xf32>
    %87 = arith.addf %1, %86 : vector<8x32xf32>
    %cst_33 = arith.constant dense<0.000000e+00> : vector<8xf32>
    %88 = vector.multi_reduction <add>, %87, %cst_33 [1] : vector<8x32xf32> to vector<8xf32>
    %89 = vector.shape_cast %88 : vector<8xf32> to vector<8x1xf32>
    %cst_34 = arith.constant 3.200000e+01 : f32
    %90 = vector.broadcast %cst_34 : f32 to vector<8x1xf32>
    %91 = arith.divf %89, %90 : vector<8x1xf32>
    %92 = vector.broadcast %91 : vector<8x1xf32> to vector<8x32xf32>
    %93 = arith.subf %87, %92 : vector<8x32xf32>
    %94 = arith.mulf %93, %93 : vector<8x32xf32>
    %cst_35 = arith.constant dense<0.000000e+00> : vector<8xf32>
    %95 = vector.multi_reduction <add>, %94, %cst_35 [1] : vector<8x32xf32> to vector<8xf32>
    %96 = vector.shape_cast %95 : vector<8xf32> to vector<8x1xf32>
    %cst_36 = arith.constant 3.200000e+01 : f32
    %97 = vector.broadcast %cst_36 : f32 to vector<8x1xf32>
    %98 = arith.divf %96, %97 : vector<8x1xf32>
    %99 = vector.broadcast %91 : vector<8x1xf32> to vector<8x32xf32>
    %100 = arith.subf %87, %99 : vector<8x32xf32>
    %cst_37 = arith.constant 9.99999974E-6 : f32
    %101 = vector.broadcast %cst_37 : f32 to vector<8x1xf32>
    %102 = arith.addf %98, %101 : vector<8x1xf32>
    %103 = math.rsqrt %102 : vector<8x1xf32>
    %104 = vector.broadcast %103 : vector<8x1xf32> to vector<8x32xf32>
    %105 = arith.mulf %100, %104 : vector<8x32xf32>
    %c0_38 = arith.constant 0 : index
    %c0_39 = arith.constant 0 : index
    %106 = vector.load %arg14[%c0_38, %c0_39] : memref<1x32xf32, #tpu.memory_space<vmem>>, vector<1x32xf32>
    %107 = vector.broadcast %106 : vector<1x32xf32> to vector<8x32xf32>
    %108 = arith.mulf %105, %107 : vector<8x32xf32>
    %c0_40 = arith.constant 0 : index
    %c0_41 = arith.constant 0 : index
    %109 = vector.load %arg15[%c0_40, %c0_41] : memref<1x32xf32, #tpu.memory_space<vmem>>, vector<1x32xf32>
    %110 = vector.broadcast %109 : vector<1x32xf32> to vector<8x32xf32>
    %111 = arith.addf %108, %110 : vector<8x32xf32>
    %c0_42 = arith.constant 0 : index
    %c0_43 = arith.constant 0 : index
    %c0_44 = arith.constant 0 : index
    %112 = vector.load %arg16[%c0_42, %c0_43, %c0_44] : memref<1x8x32xf32, #tpu.memory_space<vmem>>, vector<1x8x32xf32>
    %113 = vector.shape_cast %112 : vector<1x8x32xf32> to vector<8x32xf32>
    %114 = vector.shape_cast %111 : vector<8x32xf32> to vector<1x8x32xf32>
    tpu.vector_store %arg16[%c0_42, %c0_43, %c0_44], %114 {strides = array<i32>} : memref<1x8x32xf32, #tpu.memory_space<vmem>>, vector<1x8x32xf32>,
    return
  }
  func.func @transform_0(%arg0: i32, %arg1: i32) -> (i32, i32, i32) {
    %c0_i32 = arith.constant 0 : i32
    %c0_i32_0 = arith.constant 0 : i32
    return %arg0, %arg1, %c0_i32 : i32, i32, i32
  }
  func.func @transform_1(%arg0: i32, %arg1: i32) -> (i32, i32, i32) {
    %c0_i32 = arith.constant 0 : i32
    %c0_i32_0 = arith.constant 0 : i32
    %c0_i32_1 = arith.constant 0 : i32
    return %arg0, %c0_i32, %c0_i32_0 : i32, i32, i32
  }
  func.func @transform_2(%arg0: i32, %arg1: i32) -> (i32, i32) {
    %c0_i32 = arith.constant 0 : i32
    %c0_i32_0 = arith.constant 0 : i32
    return %arg1, %c0_i32 : i32, i32
  }
  func.func @transform_3(%arg0: i32, %arg1: i32) -> (i32, i32, i32) {
    %c0_i32 = arith.constant 0 : i32
    %c0_i32_0 = arith.constant 0 : i32
    %c0_i32_1 = arith.constant 0 : i32
    return %arg0, %c0_i32, %c0_i32_0 : i32, i32, i32
  }
  func.func @transform_4(%arg0: i32, %arg1: i32) -> (i32, i32) {
    %c0_i32 = arith.constant 0 : i32
    %c0_i32_0 = arith.constant 0 : i32
    %c0_i32_1 = arith.constant 0 : i32
    return %c0_i32, %c0_i32_0 : i32, i32
  }
  func.func @transform_5(%arg0: i32, %arg1: i32) -> (i32, i32) {
    %c0_i32 = arith.constant 0 : i32
    %c0_i32_0 = arith.constant 0 : i32
    %c0_i32_1 = arith.constant 0 : i32
    return %c0_i32, %c0_i32_0 : i32, i32
  }
  func.func @transform_6(%arg0: i32, %arg1: i32) -> (i32, i32) {
    %c0_i32 = arith.constant 0 : i32
    %c0_i32_0 = arith.constant 0 : i32
    %c0_i32_1 = arith.constant 0 : i32
    return %c0_i32, %c0_i32_0 : i32, i32
  }
  func.func @transform_7(%arg0: i32, %arg1: i32) -> (i32, i32) {
    %c0_i32 = arith.constant 0 : i32
    %c0_i32_0 = arith.constant 0 : i32
    %c0_i32_1 = arith.constant 0 : i32
    return %c0_i32, %c0_i32_0 : i32, i32
  }
  func.func @transform_8(%arg0: i32, %arg1: i32) -> (i32, i32) {
    %c0_i32 = arith.constant 0 : i32
    %c0_i32_0 = arith.constant 0 : i32
    %c0_i32_1 = arith.constant 0 : i32
    return %c0_i32, %c0_i32_0 : i32, i32
  }
  func.func @transform_9(%arg0: i32, %arg1: i32) -> (i32, i32) {
    %c0_i32 = arith.constant 0 : i32
    %c0_i32_0 = arith.constant 0 : i32
    %c0_i32_1 = arith.constant 0 : i32
    return %c0_i32, %c0_i32_0 : i32, i32
  }
  func.func @transform_10(%arg0: i32, %arg1: i32) -> (i32, i32) {
    %c0_i32 = arith.constant 0 : i32
    %c0_i32_0 = arith.constant 0 : i32
    %c0_i32_1 = arith.constant 0 : i32
    return %c0_i32, %c0_i32_0 : i32, i32
  }
  func.func @transform_11(%arg0: i32, %arg1: i32) -> (i32, i32) {
    %c0_i32 = arith.constant 0 : i32
    %c0_i32_0 = arith.constant 0 : i32
    %c0_i32_1 = arith.constant 0 : i32
    return %c0_i32, %c0_i32_0 : i32, i32
  }
  func.func @transform_12(%arg0: i32, %arg1: i32) -> (i32, i32) {
    %c0_i32 = arith.constant 0 : i32
    %c0_i32_0 = arith.constant 0 : i32
    %c0_i32_1 = arith.constant 0 : i32
    return %c0_i32, %c0_i32_0 : i32, i32
  }
  func.func @transform_13(%arg0: i32, %arg1: i32) -> (i32, i32) {
    %c0_i32 = arith.constant 0 : i32
    %c0_i32_0 = arith.constant 0 : i32
    %c0_i32_1 = arith.constant 0 : i32
    return %c0_i32, %c0_i32_0 : i32, i32
  }
  func.func @transform_14(%arg0: i32, %arg1: i32) -> (i32, i32, i32) {
    %c0_i32 = arith.constant 0 : i32
    %c0_i32_0 = arith.constant 0 : i32
    return %arg0, %arg1, %c0_i32 : i32, i32, i32
  }
}

module attributes {stable_mosaic.version = 11 : i64} {
  func.func @_mha_ln_kernel(%arg0: i32, %arg1: i32, %arg2: memref<1x8x32xf32, #tpu.memory_space<vmem>>, %arg3: memref<1x8x32xf32, #tpu.memory_space<vmem>>, %arg4: memref<32x32xbf16, #tpu.memory_space<vmem>>, %arg5: memref<1x32xf32, #tpu.memory_space<vmem>>, %arg6: memref<32x32xbf16, #tpu.memory_space<vmem>>, %arg7: memref<1x32xf32, #tpu.memory_space<vmem>>, %arg8: memref<32x32xbf16, #tpu.memory_space<vmem>>, %arg9: memref<1x32xf32, #tpu.memory_space<vmem>>, %arg10: memref<32x32xbf16, #tpu.memory_space<vmem>>, %arg11: memref<1x32xf32, #tpu.memory_space<vmem>>, %arg12: memref<1x32xf32, #tpu.memory_space<vmem>>, %arg13: memref<1x32xf32, #tpu.memory_space<vmem>>, %arg14: memref<1x8x32xf32, #tpu.memory_space<vmem>>) attributes {dimension_semantics = [#tpu.dimension_semantics<parallel>, #tpu.dimension_semantics<parallel>], iteration_bounds = array<i64: 2, 1>, scalar_prefetch = 0 : i64, scratch_operands = 0 : i64, tpu.core_type = #tpu.core_type<tc>, window_params = [{transform_indices = @transform_0, window_bounds = array<i64: 1, 8, 32>}, {transform_indices = @transform_1, window_bounds = array<i64: 1, 8, 32>}, {pipeline_mode = #tpu.pipeline_mode<synchronous>, transform_indices = @transform_2, window_bounds = array<i64: 32, 32>}, {pipeline_mode = #tpu.pipeline_mode<synchronous>, transform_indices = @transform_3, window_bounds = array<i64: 1, 32>}, {pipeline_mode = #tpu.pipeline_mode<synchronous>, transform_indices = @transform_4, window_bounds = array<i64: 32, 32>}, {pipeline_mode = #tpu.pipeline_mode<synchronous>, transform_indices = @transform_5, window_bounds = array<i64: 1, 32>}, {pipeline_mode = #tpu.pipeline_mode<synchronous>, transform_indices = @transform_6, window_bounds = array<i64: 32, 32>}, {pipeline_mode = #tpu.pipeline_mode<synchronous>, transform_indices = @transform_7, window_bounds = array<i64: 1, 32>}, {pipeline_mode = #tpu.pipeline_mode<synchronous>, transform_indices = @transform_8, window_bounds = array<i64: 32, 32>}, {pipeline_mode = #tpu.pipeline_mode<synchronous>, transform_indices = @transform_9, window_bounds = array<i64: 1, 32>}, {pipeline_mode = #tpu.pipeline_mode<synchronous>, transform_indices = @transform_10, window_bounds = array<i64: 1, 32>}, {pipeline_mode = #tpu.pipeline_mode<synchronous>, transform_indices = @transform_11, window_bounds = array<i64: 1, 32>}, {transform_indices = @transform_12, window_bounds = array<i64: 1, 8, 32>}]} {
    %c0 = arith.constant 0 : index
    %c0_0 = arith.constant 0 : index
    %c0_1 = arith.constant 0 : index
    %0 = vector.load %arg2[%c0, %c0_0, %c0_1] : memref<1x8x32xf32, #tpu.memory_space<vmem>>, vector<1x8x32xf32>
    %1 = vector.shape_cast %0 : vector<1x8x32xf32> to vector<8x32xf32>
    %c0_2 = arith.constant 0 : index
    %c0_3 = arith.constant 0 : index
    %c0_4 = arith.constant 0 : index
    %2 = vector.load %arg3[%c0_2, %c0_3, %c0_4] : memref<1x8x32xf32, #tpu.memory_space<vmem>>, vector<1x8x32xf32>
    %3 = vector.shape_cast %2 : vector<1x8x32xf32> to vector<8x32xf32>
    %4 = arith.truncf %1 : vector<8x32xf32> to vector<8x32xbf16>
    %5 = arith.truncf %3 : vector<8x32xf32> to vector<8x32xbf16>
    %c0_5 = arith.constant 0 : index
    %c0_6 = arith.constant 0 : index
    %6 = vector.load %arg4[%c0_5, %c0_6] : memref<32x32xbf16, #tpu.memory_space<vmem>>, vector<32x32xbf16>
    %cst = arith.constant dense<0.000000e+00> : vector<8x32xf32>
    %7 = tpu.matmul %4, %6, %cst {dimension_numbers = #tpu.dot_dimension_numbers<[1], [0], [0], [1], [0, 0, 1, 1], [], []>} : vector<8x32xbf16>, vector<32x32xbf16>, vector<8x32xf32> -> vector<8x32xf32>
    %c0_7 = arith.constant 0 : index
    %c0_8 = arith.constant 0 : index
    %8 = vector.load %arg5[%c0_7, %c0_8] : memref<1x32xf32, #tpu.memory_space<vmem>>, vector<1x32xf32>
    %9 = vector.broadcast %8 : vector<1x32xf32> to vector<8x32xf32>
    %10 = arith.addf %7, %9 : vector<8x32xf32>
    %c0_9 = arith.constant 0 : index
    %c0_10 = arith.constant 0 : index
    %11 = vector.load %arg6[%c0_9, %c0_10] : memref<32x32xbf16, #tpu.memory_space<vmem>>, vector<32x32xbf16>
    %cst_11 = arith.constant dense<0.000000e+00> : vector<8x32xf32>
    %12 = tpu.matmul %5, %11, %cst_11 {dimension_numbers = #tpu.dot_dimension_numbers<[1], [0], [0], [1], [0, 0, 1, 1], [], []>} : vector<8x32xbf16>, vector<32x32xbf16>, vector<8x32xf32> -> vector<8x32xf32>
    %c0_12 = arith.constant 0 : index
    %c0_13 = arith.constant 0 : index
    %13 = vector.load %arg7[%c0_12, %c0_13] : memref<1x32xf32, #tpu.memory_space<vmem>>, vector<1x32xf32>
    %14 = vector.broadcast %13 : vector<1x32xf32> to vector<8x32xf32>
    %15 = arith.addf %12, %14 : vector<8x32xf32>
    %c0_14 = arith.constant 0 : index
    %c0_15 = arith.constant 0 : index
    %16 = vector.load %arg8[%c0_14, %c0_15] : memref<32x32xbf16, #tpu.memory_space<vmem>>, vector<32x32xbf16>
    %cst_16 = arith.constant dense<0.000000e+00> : vector<8x32xf32>
    %17 = tpu.matmul %5, %16, %cst_16 {dimension_numbers = #tpu.dot_dimension_numbers<[1], [0], [0], [1], [0, 0, 1, 1], [], []>} : vector<8x32xbf16>, vector<32x32xbf16>, vector<8x32xf32> -> vector<8x32xf32>
    %c0_17 = arith.constant 0 : index
    %c0_18 = arith.constant 0 : index
    %18 = vector.load %arg9[%c0_17, %c0_18] : memref<1x32xf32, #tpu.memory_space<vmem>>, vector<1x32xf32>
    %19 = vector.broadcast %18 : vector<1x32xf32> to vector<8x32xf32>
    %20 = arith.addf %17, %19 : vector<8x32xf32>
    %21 = arith.truncf %10 : vector<8x32xf32> to vector<8x32xbf16>
    %22 = arith.truncf %15 : vector<8x32xf32> to vector<8x32xbf16>
    %23 = arith.truncf %20 : vector<8x32xf32> to vector<8x32xbf16>
    %24 = vector.extract_strided_slice %21 {offsets = [0, 0], sizes = [8, 8], strides = [1, 1]} : vector<8x32xbf16> to vector<8x8xbf16>
    %25 = vector.extract_strided_slice %21 {offsets = [0, 8], sizes = [8, 8], strides = [1, 1]} : vector<8x32xbf16> to vector<8x8xbf16>
    %26 = vector.extract_strided_slice %21 {offsets = [0, 16], sizes = [8, 8], strides = [1, 1]} : vector<8x32xbf16> to vector<8x8xbf16>
    %27 = vector.extract_strided_slice %21 {offsets = [0, 24], sizes = [8, 8], strides = [1, 1]} : vector<8x32xbf16> to vector<8x8xbf16>
    %28 = vector.shape_cast %24 : vector<8x8xbf16> to vector<1x8x8xbf16>
    %29 = vector.shape_cast %25 : vector<8x8xbf16> to vector<1x8x8xbf16>
    %30 = vector.shape_cast %26 : vector<8x8xbf16> to vector<1x8x8xbf16>
    %31 = vector.shape_cast %27 : vector<8x8xbf16> to vector<1x8x8xbf16>
    %32 = tpu.concatenate %28, %29, %30, %31 in 0 : vector<1x8x8xbf16>, vector<1x8x8xbf16>, vector<1x8x8xbf16>, vector<1x8x8xbf16> -> vector<4x8x8xbf16>
    %33 = vector.extract_strided_slice %22 {offsets = [0, 0], sizes = [8, 8], strides = [1, 1]} : vector<8x32xbf16> to vector<8x8xbf16>
    %34 = vector.extract_strided_slice %22 {offsets = [0, 8], sizes = [8, 8], strides = [1, 1]} : vector<8x32xbf16> to vector<8x8xbf16>
    %35 = vector.extract_strided_slice %22 {offsets = [0, 16], sizes = [8, 8], strides = [1, 1]} : vector<8x32xbf16> to vector<8x8xbf16>
    %36 = vector.extract_strided_slice %22 {offsets = [0, 24], sizes = [8, 8], strides = [1, 1]} : vector<8x32xbf16> to vector<8x8xbf16>
    %37 = vector.shape_cast %33 : vector<8x8xbf16> to vector<1x8x8xbf16>
    %38 = vector.shape_cast %34 : vector<8x8xbf16> to vector<1x8x8xbf16>
    %39 = vector.shape_cast %35 : vector<8x8xbf16> to vector<1x8x8xbf16>
    %40 = vector.shape_cast %36 : vector<8x8xbf16> to vector<1x8x8xbf16>
    %41 = tpu.concatenate %37, %38, %39, %40 in 0 : vector<1x8x8xbf16>, vector<1x8x8xbf16>, vector<1x8x8xbf16>, vector<1x8x8xbf16> -> vector<4x8x8xbf16>
    %42 = vector.extract_strided_slice %23 {offsets = [0, 0], sizes = [8, 8], strides = [1, 1]} : vector<8x32xbf16> to vector<8x8xbf16>
    %43 = vector.extract_strided_slice %23 {offsets = [0, 8], sizes = [8, 8], strides = [1, 1]} : vector<8x32xbf16> to vector<8x8xbf16>
    %44 = vector.extract_strided_slice %23 {offsets = [0, 16], sizes = [8, 8], strides = [1, 1]} : vector<8x32xbf16> to vector<8x8xbf16>
    %45 = vector.extract_strided_slice %23 {offsets = [0, 24], sizes = [8, 8], strides = [1, 1]} : vector<8x32xbf16> to vector<8x8xbf16>
    %46 = vector.shape_cast %42 : vector<8x8xbf16> to vector<1x8x8xbf16>
    %47 = vector.shape_cast %43 : vector<8x8xbf16> to vector<1x8x8xbf16>
    %48 = vector.shape_cast %44 : vector<8x8xbf16> to vector<1x8x8xbf16>
    %49 = vector.shape_cast %45 : vector<8x8xbf16> to vector<1x8x8xbf16>
    %50 = tpu.concatenate %46, %47, %48, %49 in 0 : vector<1x8x8xbf16>, vector<1x8x8xbf16>, vector<1x8x8xbf16>, vector<1x8x8xbf16> -> vector<4x8x8xbf16>
    "tpu.trace_start"() <{level = 10 : i32, message = "hqd,hkd->hqk"}> : () -> ()
    %cst_19 = arith.constant dense<0.000000e+00> : vector<4x8x8xf32>
    %51 = tpu.matmul %32, %41, %cst_19 {dimension_numbers = #tpu.dot_dimension_numbers<[2], [2], [1], [1], [0, 0, 0, 1, 1, 1], [0], [0]>} : vector<4x8x8xbf16>, vector<4x8x8xbf16>, vector<4x8x8xf32> -> vector<4x8x8xf32>
    "tpu.trace_stop"() : () -> ()
    %cst_20 = arith.constant dense<0xFF800000> : vector<4x8xf32>
    %52 = vector.multi_reduction <maximumf>, %51, %cst_20 [2] : vector<4x8x8xf32> to vector<4x8xf32>
    %53 = vector.shape_cast %52 : vector<4x8xf32> to vector<4x8x1xf32>
    %54 = vector.broadcast %53 : vector<4x8x1xf32> to vector<4x8x8xf32>
    %55 = arith.subf %51, %54 : vector<4x8x8xf32>
    %56 = math.exp %55 : vector<4x8x8xf32>
    %cst_21 = arith.constant dense<0.000000e+00> : vector<4x8xf32>
    %57 = vector.multi_reduction <add>, %56, %cst_21 [2] : vector<4x8x8xf32> to vector<4x8xf32>
    %58 = vector.shape_cast %57 : vector<4x8xf32> to vector<4x8x1xf32>
    %59 = tpu.reciprocal %58 {approx = true} : vector<4x8x1xf32> -> vector<4x8x1xf32>
    %60 = vector.broadcast %59 : vector<4x8x1xf32> to vector<4x8x8xf32>
    %61 = arith.mulf %56, %60 : vector<4x8x8xf32>
    %62 = arith.truncf %61 : vector<4x8x8xf32> to vector<4x8x8xbf16>
    "tpu.trace_start"() <{level = 10 : i32, message = "hqk,hkd->hqd"}> : () -> ()
    %cst_22 = arith.constant dense<0.000000e+00> : vector<4x8x8xf32>
    %63 = tpu.matmul %62, %50, %cst_22 {dimension_numbers = #tpu.dot_dimension_numbers<[2], [1], [1], [2], [0, 0, 0, 1, 1, 2], [0], [0]>} : vector<4x8x8xbf16>, vector<4x8x8xbf16>, vector<4x8x8xf32> -> vector<4x8x8xf32>
    "tpu.trace_stop"() : () -> ()
    %64 = vector.extract_strided_slice %63 {offsets = [0, 0, 0], sizes = [1, 8, 8], strides = [1, 1, 1]} : vector<4x8x8xf32> to vector<1x8x8xf32>
    %65 = vector.shape_cast %64 : vector<1x8x8xf32> to vector<8x8xf32>
    %66 = vector.extract_strided_slice %63 {offsets = [1, 0, 0], sizes = [1, 8, 8], strides = [1, 1, 1]} : vector<4x8x8xf32> to vector<1x8x8xf32>
    %67 = vector.shape_cast %66 : vector<1x8x8xf32> to vector<8x8xf32>
    %68 = vector.extract_strided_slice %63 {offsets = [2, 0, 0], sizes = [1, 8, 8], strides = [1, 1, 1]} : vector<4x8x8xf32> to vector<1x8x8xf32>
    %69 = vector.shape_cast %68 : vector<1x8x8xf32> to vector<8x8xf32>
    %70 = vector.extract_strided_slice %63 {offsets = [3, 0, 0], sizes = [1, 8, 8], strides = [1, 1, 1]} : vector<4x8x8xf32> to vector<1x8x8xf32>
    %71 = vector.shape_cast %70 : vector<1x8x8xf32> to vector<8x8xf32>
    %72 = tpu.concatenate %65, %67, %69, %71 in 1 : vector<8x8xf32>, vector<8x8xf32>, vector<8x8xf32>, vector<8x8xf32> -> vector<8x32xf32>
    %73 = arith.truncf %72 : vector<8x32xf32> to vector<8x32xbf16>
    %c0_23 = arith.constant 0 : index
    %c0_24 = arith.constant 0 : index
    %74 = vector.load %arg10[%c0_23, %c0_24] : memref<32x32xbf16, #tpu.memory_space<vmem>>, vector<32x32xbf16>
    %cst_25 = arith.constant dense<0.000000e+00> : vector<8x32xf32>
    %75 = tpu.matmul %73, %74, %cst_25 {dimension_numbers = #tpu.dot_dimension_numbers<[1], [0], [0], [1], [0, 0, 1, 1], [], []>} : vector<8x32xbf16>, vector<32x32xbf16>, vector<8x32xf32> -> vector<8x32xf32>
    %c0_26 = arith.constant 0 : index
    %c0_27 = arith.constant 0 : index
    %76 = vector.load %arg11[%c0_26, %c0_27] : memref<1x32xf32, #tpu.memory_space<vmem>>, vector<1x32xf32>
    %77 = vector.broadcast %76 : vector<1x32xf32> to vector<8x32xf32>
    %78 = arith.addf %75, %77 : vector<8x32xf32>
    %79 = arith.addf %1, %78 : vector<8x32xf32>
    %cst_28 = arith.constant dense<0.000000e+00> : vector<8xf32>
    %80 = vector.multi_reduction <add>, %79, %cst_28 [1] : vector<8x32xf32> to vector<8xf32>
    %81 = vector.shape_cast %80 : vector<8xf32> to vector<8x1xf32>
    %cst_29 = arith.constant 3.200000e+01 : f32
    %82 = vector.broadcast %cst_29 : f32 to vector<8x1xf32>
    %83 = arith.divf %81, %82 : vector<8x1xf32>
    %84 = vector.broadcast %83 : vector<8x1xf32> to vector<8x32xf32>
    %85 = arith.subf %79, %84 : vector<8x32xf32>
    %86 = arith.mulf %85, %85 : vector<8x32xf32>
    %cst_30 = arith.constant dense<0.000000e+00> : vector<8xf32>
    %87 = vector.multi_reduction <add>, %86, %cst_30 [1] : vector<8x32xf32> to vector<8xf32>
    %88 = vector.shape_cast %87 : vector<8xf32> to vector<8x1xf32>
    %cst_31 = arith.constant 3.200000e+01 : f32
    %89 = vector.broadcast %cst_31 : f32 to vector<8x1xf32>
    %90 = arith.divf %88, %89 : vector<8x1xf32>
    %91 = vector.broadcast %83 : vector<8x1xf32> to vector<8x32xf32>
    %92 = arith.subf %79, %91 : vector<8x32xf32>
    %cst_32 = arith.constant 9.99999974E-6 : f32
    %93 = vector.broadcast %cst_32 : f32 to vector<8x1xf32>
    %94 = arith.addf %90, %93 : vector<8x1xf32>
    %95 = math.rsqrt %94 : vector<8x1xf32>
    %96 = vector.broadcast %95 : vector<8x1xf32> to vector<8x32xf32>
    %97 = arith.mulf %92, %96 : vector<8x32xf32>
    %c0_33 = arith.constant 0 : index
    %c0_34 = arith.constant 0 : index
    %98 = vector.load %arg12[%c0_33, %c0_34] : memref<1x32xf32, #tpu.memory_space<vmem>>, vector<1x32xf32>
    %99 = vector.broadcast %98 : vector<1x32xf32> to vector<8x32xf32>
    %100 = arith.mulf %97, %99 : vector<8x32xf32>
    %c0_35 = arith.constant 0 : index
    %c0_36 = arith.constant 0 : index
    %101 = vector.load %arg13[%c0_35, %c0_36] : memref<1x32xf32, #tpu.memory_space<vmem>>, vector<1x32xf32>
    %102 = vector.broadcast %101 : vector<1x32xf32> to vector<8x32xf32>
    %103 = arith.addf %100, %102 : vector<8x32xf32>
    %c0_37 = arith.constant 0 : index
    %c0_38 = arith.constant 0 : index
    %c0_39 = arith.constant 0 : index
    %104 = vector.load %arg14[%c0_37, %c0_38, %c0_39] : memref<1x8x32xf32, #tpu.memory_space<vmem>>, vector<1x8x32xf32>
    %105 = vector.shape_cast %104 : vector<1x8x32xf32> to vector<8x32xf32>
    %106 = vector.shape_cast %103 : vector<8x32xf32> to vector<1x8x32xf32>
    tpu.vector_store %arg14[%c0_37, %c0_38, %c0_39], %106 {strides = array<i32>} : memref<1x8x32xf32, #tpu.memory_space<vmem>>, vector<1x8x32xf32>,
    return
  }
  func.func @transform_0(%arg0: i32, %arg1: i32) -> (i32, i32, i32) {
    %c0_i32 = arith.constant 0 : i32
    %c0_i32_0 = arith.constant 0 : i32
    return %arg0, %arg1, %c0_i32 : i32, i32, i32
  }
  func.func @transform_1(%arg0: i32, %arg1: i32) -> (i32, i32, i32) {
    %c0_i32 = arith.constant 0 : i32
    %c0_i32_0 = arith.constant 0 : i32
    %c0_i32_1 = arith.constant 0 : i32
    return %arg0, %c0_i32, %c0_i32_0 : i32, i32, i32
  }
  func.func @transform_2(%arg0: i32, %arg1: i32) -> (i32, i32) {
    %c0_i32 = arith.constant 0 : i32
    %c0_i32_0 = arith.constant 0 : i32
    %c0_i32_1 = arith.constant 0 : i32
    return %c0_i32, %c0_i32_0 : i32, i32
  }
  func.func @transform_3(%arg0: i32, %arg1: i32) -> (i32, i32) {
    %c0_i32 = arith.constant 0 : i32
    %c0_i32_0 = arith.constant 0 : i32
    %c0_i32_1 = arith.constant 0 : i32
    return %c0_i32, %c0_i32_0 : i32, i32
  }
  func.func @transform_4(%arg0: i32, %arg1: i32) -> (i32, i32) {
    %c0_i32 = arith.constant 0 : i32
    %c0_i32_0 = arith.constant 0 : i32
    %c0_i32_1 = arith.constant 0 : i32
    return %c0_i32, %c0_i32_0 : i32, i32
  }
  func.func @transform_5(%arg0: i32, %arg1: i32) -> (i32, i32) {
    %c0_i32 = arith.constant 0 : i32
    %c0_i32_0 = arith.constant 0 : i32
    %c0_i32_1 = arith.constant 0 : i32
    return %c0_i32, %c0_i32_0 : i32, i32
  }
  func.func @transform_6(%arg0: i32, %arg1: i32) -> (i32, i32) {
    %c0_i32 = arith.constant 0 : i32
    %c0_i32_0 = arith.constant 0 : i32
    %c0_i32_1 = arith.constant 0 : i32
    return %c0_i32, %c0_i32_0 : i32, i32
  }
  func.func @transform_7(%arg0: i32, %arg1: i32) -> (i32, i32) {
    %c0_i32 = arith.constant 0 : i32
    %c0_i32_0 = arith.constant 0 : i32
    %c0_i32_1 = arith.constant 0 : i32
    return %c0_i32, %c0_i32_0 : i32, i32
  }
  func.func @transform_8(%arg0: i32, %arg1: i32) -> (i32, i32) {
    %c0_i32 = arith.constant 0 : i32
    %c0_i32_0 = arith.constant 0 : i32
    %c0_i32_1 = arith.constant 0 : i32
    return %c0_i32, %c0_i32_0 : i32, i32
  }
  func.func @transform_9(%arg0: i32, %arg1: i32) -> (i32, i32) {
    %c0_i32 = arith.constant 0 : i32
    %c0_i32_0 = arith.constant 0 : i32
    %c0_i32_1 = arith.constant 0 : i32
    return %c0_i32, %c0_i32_0 : i32, i32
  }
  func.func @transform_10(%arg0: i32, %arg1: i32) -> (i32, i32) {
    %c0_i32 = arith.constant 0 : i32
    %c0_i32_0 = arith.constant 0 : i32
    %c0_i32_1 = arith.constant 0 : i32
    return %c0_i32, %c0_i32_0 : i32, i32
  }
  func.func @transform_11(%arg0: i32, %arg1: i32) -> (i32, i32) {
    %c0_i32 = arith.constant 0 : i32
    %c0_i32_0 = arith.constant 0 : i32
    %c0_i32_1 = arith.constant 0 : i32
    return %c0_i32, %c0_i32_0 : i32, i32
  }
  func.func @transform_12(%arg0: i32, %arg1: i32) -> (i32, i32, i32) {
    %c0_i32 = arith.constant 0 : i32
    %c0_i32_0 = arith.constant 0 : i32
    return %arg0, %arg1, %c0_i32 : i32, i32, i32
  }
}

module attributes {stable_mosaic.version = 11 : i64} {
  func.func @_matmul_bias_kernel(%arg0: i32, %arg1: i32, %arg2: i32, %arg3: memref<16x32xf32, #tpu.memory_space<vmem>>, %arg4: memref<32x512xbf16, #tpu.memory_space<vmem>>, %arg5: memref<1x512xf32, #tpu.memory_space<vmem>>, %arg6: memref<16x512xf32, #tpu.memory_space<vmem>>, %arg7: memref<16x512xf32, #tpu.memory_space<vmem>>) attributes {dimension_semantics = [#tpu.dimension_semantics<parallel>, #tpu.dimension_semantics<parallel>, #tpu.dimension_semantics<arbitrary>], iteration_bounds = array<i64: 1, 1, 1>, scalar_prefetch = 0 : i64, scratch_operands = 1 : i64, tpu.core_type = #tpu.core_type<tc>, window_params = [{transform_indices = @transform_0, window_bounds = array<i64: 16, 32>}, {transform_indices = @transform_1, window_bounds = array<i64: 32, 512>}, {transform_indices = @transform_2, window_bounds = array<i64: 1, 512>}, {transform_indices = @transform_3, window_bounds = array<i64: 16, 512>}]} {
    %c0_i32 = arith.constant 0 : i32
    %0 = arith.cmpi eq, %arg2, %c0_i32 : i32
    %1 = arith.extui %0 : i1 to i32
    %c0_i32_0 = arith.constant 0 : i32
    %2 = arith.cmpi ne, %1, %c0_i32_0 : i32
    scf.if %2 {
      %cst_10 = arith.constant 0.000000e+00 : f32
      %13 = vector.broadcast %cst_10 : f32 to vector<16x512xf32>
      %c0_11 = arith.constant 0 : index
      %c0_12 = arith.constant 0 : index
      %14 = vector.load %arg7[%c0_11, %c0_12] : memref<16x512xf32, #tpu.memory_space<vmem>>, vector<16x512xf32>
      tpu.vector_store %arg7[%c0_11, %c0_12], %13 {strides = array<i32>} : memref<16x512xf32, #tpu.memory_space<vmem>>, vector<16x512xf32>,
    } else {
    }
    %c0 = arith.constant 0 : index
    %c0_1 = arith.constant 0 : index
    %3 = vector.load %arg7[%c0, %c0_1] : memref<16x512xf32, #tpu.memory_space<vmem>>, vector<16x512xf32>
    %c0_2 = arith.constant 0 : index
    %c0_3 = arith.constant 0 : index
    %4 = vector.load %arg3[%c0_2, %c0_3] : memref<16x32xf32, #tpu.memory_space<vmem>>, vector<16x32xf32>
    %5 = arith.truncf %4 : vector<16x32xf32> to vector<16x32xbf16>
    %c0_4 = arith.constant 0 : index
    %c0_5 = arith.constant 0 : index
    %6 = vector.load %arg4[%c0_4, %c0_5] : memref<32x512xbf16, #tpu.memory_space<vmem>>, vector<32x512xbf16>
    %cst = arith.constant dense<0.000000e+00> : vector<16x512xf32>
    %7 = tpu.matmul %5, %6, %cst {dimension_numbers = #tpu.dot_dimension_numbers<[1], [0], [0], [1], [0, 0, 1, 1], [], []>} : vector<16x32xbf16>, vector<32x512xbf16>, vector<16x512xf32> -> vector<16x512xf32>
    %8 = arith.addf %3, %7 : vector<16x512xf32>
    %c0_6 = arith.constant 0 : index
    %c0_7 = arith.constant 0 : index
    %9 = vector.load %arg7[%c0_6, %c0_7] : memref<16x512xf32, #tpu.memory_space<vmem>>, vector<16x512xf32>
    tpu.vector_store %arg7[%c0_6, %c0_7], %8 {strides = array<i32>} : memref<16x512xf32, #tpu.memory_space<vmem>>, vector<16x512xf32>,
    %c0_i32_8 = arith.constant 0 : i32
    %10 = arith.cmpi eq, %arg2, %c0_i32_8 : i32
    %11 = arith.extui %10 : i1 to i32
    %c0_i32_9 = arith.constant 0 : i32
    %12 = arith.cmpi ne, %11, %c0_i32_9 : i32
    scf.if %12 {
      %c0_10 = arith.constant 0 : index
      %c0_11 = arith.constant 0 : index
      %13 = vector.load %arg7[%c0_10, %c0_11] : memref<16x512xf32, #tpu.memory_space<vmem>>, vector<16x512xf32>
      %c0_12 = arith.constant 0 : index
      %c0_13 = arith.constant 0 : index
      %14 = vector.load %arg5[%c0_12, %c0_13] : memref<1x512xf32, #tpu.memory_space<vmem>>, vector<1x512xf32>
      %15 = vector.broadcast %14 : vector<1x512xf32> to vector<16x512xf32>
      %16 = arith.addf %13, %15 : vector<16x512xf32>
      %c0_14 = arith.constant 0 : index
      %c0_15 = arith.constant 0 : index
      %17 = vector.load %arg6[%c0_14, %c0_15] : memref<16x512xf32, #tpu.memory_space<vmem>>, vector<16x512xf32>
      tpu.vector_store %arg6[%c0_14, %c0_15], %16 {strides = array<i32>} : memref<16x512xf32, #tpu.memory_space<vmem>>, vector<16x512xf32>,
    } else {
    }
    return
  }
  func.func @transform_0(%arg0: i32, %arg1: i32, %arg2: i32) -> (i32, i32) {
    %c0_i32 = arith.constant 0 : i32
    return %arg0, %arg2 : i32, i32
  }
  func.func @transform_1(%arg0: i32, %arg1: i32, %arg2: i32) -> (i32, i32) {
    %c0_i32 = arith.constant 0 : i32
    return %arg2, %arg1 : i32, i32
  }
  func.func @transform_2(%arg0: i32, %arg1: i32, %arg2: i32) -> (i32, i32) {
    %c0_i32 = arith.constant 0 : i32
    %c0_i32_0 = arith.constant 0 : i32
    return %c0_i32, %arg1 : i32, i32
  }
  func.func @transform_3(%arg0: i32, %arg1: i32, %arg2: i32) -> (i32, i32) {
    %c0_i32 = arith.constant 0 : i32
    return %arg0, %arg1 : i32, i32
  }
}

</mosaic_0001>

<bundles_post_ra>
// kernel: transformer_forward.12
= control target key start
LH: loop header
LB: loop body
LE: loop exit
PB: predicated region body
PF: predicated region fallthrough
CT: control target
= control target key end

     0   :  { %v290_v0 = vmov 0.0   ;;  %vm291_vm0 = vmmov 0   ;;  %vm53_vm1 = vcmask 261120   ;;  %vm140_vm2 = vcmask 523264   ;;  %s381_s1 = inlined_call_operand.vmem [shape: bf16[32,64], index: 1, kind: input, shape index: {}]   ;;  %s382_s0 = inlined_call_operand.vmem [shape: f32[16,32], index: 0, kind: input, shape index: {}]   ;;  %s383_s3 = inlined_call_operand.vmem [shape: bf16[64,32], index: 3, kind: input, shape index: {}]   ;;  %s384_s2 = inlined_call_operand.vmem [shape: f32[1,64], index: 2, kind: input, shape index: {}]   ;;  %s385_s4 = inlined_call_operand.vmem [shape: f32[1,32], index: 4, kind: input, shape index: {}]   ;;  %s386_s5 = inlined_call_operand.vmem [shape: f32[1,32], index: 5, kind: input, shape index: {}]   ;;  %s387_s6 = inlined_call_operand.vmem [shape: f32[1,32], index: 6, kind: input, shape index: {}]   ;;  %s388_s7 = inlined_call_operand.vmem [shape: f32[16,32], index: 7, kind: output, shape index: {}]  }
   0x1   :  { %258 = vmatprep.subr.bf16.mxu0 %v290_v0  ;;  %v280_v1 = vld [vmem:[%s381_s1] sm:$0xff]   ;;  %262 = vmatprep.mubr.msk.bf16.mxu0 %vm291_vm0, %v290_v0  ;;  %v281_v2 = vld [vmem:[%s381_s1 + $0x8] sm:$0xff]   ;;  %v284_v8 = vld [vmem:[%s383_s3 + $0x10] sm:$0xff]  }
   0x2   :  { %266 = vmatprep.subr.bf16.mxu1 %v290_v0  ;;  %274 = vmatprep.mubr.msk.bf16.mxu1 %vm291_vm0, %v290_v0  ;;  %v27_v3 = vld [vmem:[%s382_s0] sm:$0xff]  ;;  %v28_v4 = vld [vmem:[%s382_s0 + $0x8] sm:$0xff]  ;;  %v285_v9 = vld [vmem:[%s383_s3 + $0x18] sm:$0xff]  }
   0x3   :  { %259 = vmatpush3.bf16.msra.mxu0 %v280_v1  ;;  %v282_v5 = vld [vmem:[%s383_s3] sm:$0xff]   ;;  %v283_v6 = vld [vmem:[%s383_s3 + $0x8] sm:$0xff]   ;;  %v29_v7 = vpack.c.bf16 %v28_v4, %v27_v3 }
   0x4   :  { %260 = vmatprep.subr.bf16.mxu0 %v290_v0  ;;  %267 = vmatpush3.bf16.msra.mxu1 %v282_v5  ;;  %v238_v10 = vld [vmem:[%s384_s2] ss:$0 sm:$0xff] }
   0x5   :  { %268 = vmatprep.subr.bf16.mxu1 %v290_v0  ;;  %v242_v20 = vld [vmem:[%s385_s4] ss:$0 sm:$0xff] }
   0x6   :  { %v248_v48 = vld [vmem:[%s386_s5] ss:$0 sm:$0xff] }
   0x7   :  { %261 = vmatpush3.bf16.msra.mxu0 %v281_v2  ;;  %v249_v50 = vld [vmem:[%s387_s6] ss:$0 sm:$0xff] }
   0x8   :  { %269 = vmatpush3.bf16.msra.mxu1 %v283_v6 }
   0x9   :  { %270 = vmatprep.subr.bf16.mxu1 %v290_v0 }
   0xa   :  { %263 = vmatmul.mubr.msk.bf16.vlgmr.msra.gmra.mrb[0].mxu0 %vm53_vm1, %v29_v7 }
   0xc   :  { %271 = vmatpush3.bf16.msra.mxu1 %v284_v8 }
   0xd   :  { %272 = vmatprep.subr.bf16.mxu1 %v290_v0 }
  0x10   :  { %273 = vmatpush3.bf16.msra.mxu1 %v285_v9 }
  0xdd   :  { %v91_v11 = vpop.f32.mrb[0].mxu0 }
  0xde   :  { %v92_v12 = vadd.f32 %v238_v10, %v91_v11  ;;  %v264_v13 = vpop.f32.mrb[1].mxu0 }
  0xdf   :  { %v94_v14 = vpop.f32.mrb[2].mxu0 }
  0xe0   :  { %v95_v15 = vadd.f32 %v238_v10, %v94_v14  ;;  %v265_v16 = vpop.f32.mrb[3].mxu0  ;;  %v98_v17 = vmax.f32 %v92_v12, 0.0 }
  0xe2   :  { %v99_v18 = vmax.f32 %v95_v15, 0.0 }
  0xe4   :  { %v100_v19 = vpack.c.bf16 %v99_v18, %v98_v17 }
  0xe6   :  { %275 = vmatmul.mubr.msk.bf16.vlgmr.msra.gmra.mrb[0].mxu1 %vm140_vm2, %v100_v19 }
 0x1b9   :  { %v178_v21 = vpop.f32.mrb[0].mxu1 }
 0x1ba   :  { %v179_v22 = vadd.f32 %v242_v20, %v178_v21  ;;  %v276_v23 = vpop.f32.mrb[1].mxu1 }
 0x1bb   :  { %v181_v24 = vpop.f32.mrb[2].mxu1 }
 0x1bc   :  { %v182_v25 = vadd.f32 %v242_v20, %v181_v24  ;;  %v277_v26 = vpop.f32.mrb[3].mxu1  ;;  %v185_v27 = vadd.f32 %v179_v22, %v27_v3 }
 0x1be   :  { %v187_v28 = vsel %vm53_vm1, %v185_v27, 0.0  ;;  %v186_v29 = vadd.f32 %v182_v25, %v28_v4 }
 0x1bf   :  { %188 = vadd.xlane.f32.xlu0 %v187_v28 }
 0x1c0   :  { %v190_v30 = vsel %vm53_vm1, %v186_v29, 0.0 }
 0x1c3   :  { %191 = vadd.xlane.f32.xlu0 %v190_v30 }
 0x24c   :  { %v189_v31 = vpop.xlane.xlu0 %188 }
 0x24d   :  { %v194_v32 = vmul.f32 0.03125, %v189_v31 }
 0x24f   :  { %v196_v33 = vsub.f32 %v185_v27, %v194_v32 }
 0x250   :  { %v192_v34 = vpop.xlane.xlu0 %191 }
 0x251   :  { %v195_v35 = vmul.f32 0.03125, %v192_v34  ;;  %v198_v36 = vmul.f32 %v196_v33, %v196_v33 }
 0x253   :  { %v197_v37 = vsub.f32 %v186_v29, %v195_v35  ;;  %v200_v38 = vsel %vm53_vm1, %v198_v36, 0.0 }
 0x254   :  { %201 = vadd.xlane.f32.xlu1 %v200_v38 }
 0x255   :  { %v199_v39 = vmul.f32 %v197_v37, %v197_v37 }
 0x257   :  { %v203_v40 = vsel %vm53_vm1, %v199_v39, 0.0 }
 0x258   :  { %204 = vadd.xlane.f32.xlu1 %v203_v40 }
 0x2e1   :  { %v202_v41 = vpop.xlane.xlu1 %201 }
 0x2e2   :  { %v206_v42 = vmul.f32 0.03125, %v202_v41 }
 0x2e4   :  { %v208_v43 = vadd.f32 1e-05, %v206_v42 }
 0x2e5   :  { %v205_v44 = vpop.xlane.xlu1 %204 }
 0x2e6   :  { %286 = vrsqrt.f32 %v208_v43  ;;  %v207_v45 = vmul.f32 0.03125, %v205_v44 }
 0x2e8   :  { %v209_v46 = vadd.f32 1e-05, %v207_v45 }
 0x2ea   :  { %288 = vrsqrt.f32 %v209_v46 }
 0x2f0   :  { %v287_v47 = vpop.eup %286 }
 0x2f1   :  { %v212_v49 = vmul.f32 %v287_v47, %v196_v33 }
 0x2f3   :  { %v221_v51 = vmul.f32 %v248_v48, %v212_v49 }
 0x2f4   :  { %v289_v52 = vpop.eup %288 }
 0x2f5   :  { %v230_v53 = vadd.f32 %v249_v50, %v221_v51  ;;  %v213_v54 = vmul.f32 %v289_v52, %v197_v37 }
 0x2f7   :  { %232 = vst.msk [vmem:[%s388_s7] sm:$0xff] %vm53_vm1, %v230_v53  ;;  %v222_v55 = vmul.f32 %v248_v48, %v213_v54 }
 0x2f9   :  { %v231_v56 = vadd.f32 %v249_v50, %v222_v55 }
 0x2fb   :  { %233 = vst.msk [vmem:[%s388_s7 + $0x8] sm:$0xff] %vm53_vm1, %v231_v56 }

// kernel: transformer_forward.14
= control target key start
LH: loop header
LB: loop body
LE: loop exit
PB: predicated region body
PF: predicated region fallthrough
CT: control target
= control target key end

     0   :  { %v346_v0 = vmov 0.0   ;;  %vm347_vm0 = vmmov 0   ;;  %vm59_vm1 = vcmask 261120   ;;  %vm146_vm2 = vcmask 523264   ;;  %s457_s1 = inlined_call_operand.vmem [shape: bf16[32,64], index: 1, kind: input, shape index: {}]   ;;  %s458_s0 = inlined_call_operand.vmem [shape: f32[16,32], index: 0, kind: input, shape index: {}]   ;;  %s459_s3 = inlined_call_operand.vmem [shape: bf16[64,32], index: 3, kind: input, shape index: {}]   ;;  %s460_s2 = inlined_call_operand.vmem [shape: f32[1,64], index: 2, kind: input, shape index: {}]   ;;  %s461_s4 = inlined_call_operand.vmem [shape: f32[1,32], index: 4, kind: input, shape index: {}]   ;;  %s462_s5 = inlined_call_operand.vmem [shape: f32[1,32], index: 5, kind: input, shape index: {}]   ;;  %s463_s6 = inlined_call_operand.vmem [shape: f32[1,32], index: 6, kind: input, shape index: {}]   ;;  %s464_s7 = inlined_call_operand.vmem [shape: f32[1,32], index: 7, kind: input, shape index: {}]   ;;  %s465_s8 = inlined_call_operand.vmem [shape: f32[1,32], index: 8, kind: input, shape index: {}]   ;;  %s466_s9 = inlined_call_operand.vmem [shape: f32[16,32], index: 9, kind: output, shape index: {}]  }
   0x1   :  { %310 = vmatprep.subr.bf16.mxu0 %v346_v0  ;;  %v332_v1 = vld [vmem:[%s457_s1] sm:$0xff]   ;;  %314 = vmatprep.mubr.msk.bf16.mxu0 %vm347_vm0, %v346_v0  ;;  %v333_v2 = vld [vmem:[%s457_s1 + $0x8] sm:$0xff]   ;;  %v336_v8 = vld [vmem:[%s459_s3 + $0x10] sm:$0xff]  }
   0x2   :  { %318 = vmatprep.subr.bf16.mxu1 %v346_v0  ;;  %326 = vmatprep.mubr.msk.bf16.mxu1 %vm347_vm0, %v346_v0  ;;  %v33_v3 = vld [vmem:[%s458_s0] sm:$0xff]  ;;  %v34_v4 = vld [vmem:[%s458_s0 + $0x8] sm:$0xff]  ;;  %v337_v9 = vld [vmem:[%s459_s3 + $0x18] sm:$0xff]  }
   0x3   :  { %311 = vmatpush3.bf16.msra.mxu0 %v332_v1  ;;  %v334_v5 = vld [vmem:[%s459_s3] sm:$0xff]   ;;  %v335_v6 = vld [vmem:[%s459_s3 + $0x8] sm:$0xff]   ;;  %v35_v7 = vpack.c.bf16 %v34_v4, %v33_v3 }
   0x4   :  { %312 = vmatprep.subr.bf16.mxu0 %v346_v0  ;;  %319 = vmatpush3.bf16.msra.mxu1 %v334_v5  ;;  %v288_v10 = vld [vmem:[%s460_s2] ss:$0 sm:$0xff] }
   0x5   :  { %320 = vmatprep.subr.bf16.mxu1 %v346_v0  ;;  %v292_v20 = vld [vmem:[%s461_s4] ss:$0 sm:$0xff] }
   0x6   :  { %v298_v48 = vld [vmem:[%s462_s5] ss:$0 sm:$0xff] }
   0x7   :  { %313 = vmatpush3.bf16.msra.mxu0 %v333_v2  ;;  %v299_v50 = vld [vmem:[%s463_s6] ss:$0 sm:$0xff] }
   0x8   :  { %321 = vmatpush3.bf16.msra.mxu1 %v335_v6 }
   0x9   :  { %322 = vmatprep.subr.bf16.mxu1 %v346_v0 }
   0xa   :  { %315 = vmatmul.mubr.msk.bf16.vlgmr.msra.gmra.mrb[0].mxu0 %vm59_vm1, %v35_v7 }
   0xc   :  { %323 = vmatpush3.bf16.msra.mxu1 %v336_v8 }
   0xd   :  { %324 = vmatprep.subr.bf16.mxu1 %v346_v0 }
  0x10   :  { %325 = vmatpush3.bf16.msra.mxu1 %v337_v9 }
  0xdd   :  { %v97_v11 = vpop.f32.mrb[0].mxu0 }
  0xde   :  { %v98_v12 = vadd.f32 %v288_v10, %v97_v11  ;;  %v316_v13 = vpop.f32.mrb[1].mxu0 }
  0xdf   :  { %v100_v14 = vpop.f32.mrb[2].mxu0 }
  0xe0   :  { %v101_v15 = vadd.f32 %v288_v10, %v100_v14  ;;  %v317_v16 = vpop.f32.mrb[3].mxu0  ;;  %v104_v17 = vmax.f32 %v98_v12, 0.0  ;;  %v300_v12 = vld [vmem:[%s464_s7] ss:$0 sm:$0xff] }
  0xe1   :  { %v301_v14 = vld [vmem:[%s465_s8] ss:$0 sm:$0xff] }
  0xe2   :  { %v105_v18 = vmax.f32 %v101_v15, 0.0 }
  0xe4   :  { %v106_v19 = vpack.c.bf16 %v105_v18, %v104_v17 }
  0xe6   :  { %327 = vmatmul.mubr.msk.bf16.vlgmr.msra.gmra.mrb[0].mxu1 %vm146_vm2, %v106_v19 }
 0x1b9   :  { %v184_v21 = vpop.f32.mrb[0].mxu1 }
 0x1ba   :  { %v185_v22 = vadd.f32 %v292_v20, %v184_v21  ;;  %v328_v23 = vpop.f32.mrb[1].mxu1 }
 0x1bb   :  { %v187_v24 = vpop.f32.mrb[2].mxu1 }
 0x1bc   :  { %v188_v25 = vadd.f32 %v292_v20, %v187_v24  ;;  %v329_v26 = vpop.f32.mrb[3].mxu1  ;;  %v191_v27 = vadd.f32 %v185_v22, %v33_v3 }
 0x1be   :  { %v193_v28 = vsel %vm59_vm1, %v191_v27, 0.0  ;;  %v192_v29 = vadd.f32 %v188_v25, %v34_v4 }
 0x1bf   :  { %194 = vadd.xlane.f32.xlu0 %v193_v28 }
 0x1c0   :  { %v196_v30 = vsel %vm59_vm1, %v192_v29, 0.0 }
 0x1c3   :  { %197 = vadd.xlane.f32.xlu0 %v196_v30 }
 0x24c   :  { %v195_v31 = vpop.xlane.xlu0 %194 }
 0x24d   :  { %v200_v32 = vmul.f32 0.03125, %v195_v31 }
 0x24f   :  { %v202_v33 = vsub.f32 %v191_v27, %v200_v32 }
 0x250   :  { %v198_v34 = vpop.xlane.xlu0 %197 }
 0x251   :  { %v201_v35 = vmul.f32 0.03125, %v198_v34  ;;  %v204_v36 = vmul.f32 %v202_v33, %v202_v33 }
 0x253   :  { %v203_v37 = vsub.f32 %v192_v29, %v201_v35  ;;  %v206_v38 = vsel %vm59_vm1, %v204_v36, 0.0 }
 0x254   :  { %207 = vadd.xlane.f32.xlu1 %v206_v38 }
 0x255   :  { %v205_v39 = vmul.f32 %v203_v37, %v203_v37 }
 0x257   :  { %v209_v40 = vsel %vm59_vm1, %v205_v39, 0.0 }
 0x258   :  { %210 = vadd.xlane.f32.xlu1 %v209_v40 }
 0x2e1   :  { %v208_v41 = vpop.xlane.xlu1 %207 }
 0x2e2   :  { %v212_v42 = vmul.f32 0.03125, %v208_v41 }
 0x2e4   :  { %v214_v43 = vadd.f32 1e-05, %v212_v42 }
 0x2e5   :  { %v211_v44 = vpop.xlane.xlu1 %210 }
 0x2e6   :  { %338 = vrsqrt.f32 %v214_v43  ;;  %v213_v45 = vmul.f32 0.03125, %v211_v44 }
 0x2e8   :  { %v215_v46 = vadd.f32 1e-05, %v213_v45 }
 0x2ea   :  { %340 = vrsqrt.f32 %v215_v46 }
 0x2f0   :  { %v339_v47 = vpop.eup %338 }
 0x2f1   :  { %v218_v49 = vmul.f32 %v339_v47, %v202_v33 }
 0x2f3   :  { %v227_v51 = vmul.f32 %v298_v48, %v218_v49 }
 0x2f4   :  { %v341_v52 = vpop.eup %340 }
 0x2f5   :  { %v236_v53 = vadd.f32 %v299_v50, %v227_v51  ;;  %v219_v54 = vmul.f32 %v341_v52, %v203_v37 }
 0x2f7   :  { %v238_v55 = vsel %vm59_vm1, %v236_v53, 0.0  ;;  %v228_v56 = vmul.f32 %v298_v48, %v219_v54 }
 0x2f8   :  { %239 = vadd.xlane.f32.xlu0 %v238_v55 }
 0x2f9   :  { %v237_v57 = vadd.f32 %v299_v50, %v228_v56 }
 0x2fb   :  { %v241_v58 = vsel %vm59_vm1, %v237_v57, 0.0 }
 0x2fc   :  { %242 = vadd.xlane.f32.xlu1 %v241_v58 }
 0x385   :  { %v240_v59 = vpop.xlane.xlu0 %239 }
 0x386   :  { %v244_v60 = vmul.f32 0.03125, %v240_v59 }
 0x388   :  { %v246_v61 = vsub.f32 %v236_v53, %v244_v60 }
 0x389   :  { %v243_v62 = vpop.xlane.xlu1 %242 }
 0x38a   :  { %v245_v63 = vmul.f32 0.03125, %v243_v62  ;;  %v248_v0 = vmul.f32 %v246_v61, %v246_v61 }
 0x38c   :  { %v247_v1 = vsub.f32 %v237_v57, %v245_v63  ;;  %v250_v2 = vsel %vm59_vm1, %v248_v0, 0.0 }
 0x38d   :  { %251 = vadd.xlane.f32.xlu0 %v250_v2 }
 0x38e   :  { %v249_v3 = vmul.f32 %v247_v1, %v247_v1 }
 0x390   :  { %v253_v4 = vsel %vm59_vm1, %v249_v3, 0.0 }
 0x391   :  { %254 = vadd.xlane.f32.xlu1 %v253_v4 }
 0x41a   :  { %v252_v5 = vpop.xlane.xlu0 %251 }
 0x41b   :  { %v256_v6 = vmul.f32 0.03125, %v252_v5 }
 0x41d   :  { %v258_v7 = vadd.f32 1e-05, %v256_v6 }
 0x41e   :  { %v255_v8 = vpop.xlane.xlu1 %254 }
 0x41f   :  { %342 = vrsqrt.f32 %v258_v7  ;;  %v257_v9 = vmul.f32 0.03125, %v255_v8 }
 0x421   :  { %v259_v10 = vadd.f32 1e-05, %v257_v9 }
 0x423   :  { %344 = vrsqrt.f32 %v259_v10 }
 0x429   :  { %v343_v11 = vpop.eup %342 }
 0x42a   :  { %v262_v13 = vmul.f32 %v343_v11, %v246_v61 }
 0x42c   :  { %v271_v15 = vmul.f32 %v300_v12, %v262_v13 }
 0x42d   :  { %v345_v16 = vpop.eup %344 }
 0x42e   :  { %v280_v17 = vadd.f32 %v301_v14, %v271_v15  ;;  %v263_v18 = vmul.f32 %v345_v16, %v247_v1 }
 0x430   :  { %282 = vst.msk [vmem:[%s466_s9] sm:$0xff] %vm59_vm1, %v280_v17  ;;  %v272_v19 = vmul.f32 %v300_v12, %v263_v18 }
 0x432   :  { %v281_v20 = vadd.f32 %v301_v14, %v272_v19 }
 0x434   :  { %283 = vst.msk [vmem:[%s466_s9 + $0x8] sm:$0xff] %vm59_vm1, %v281_v20 }

// kernel: transformer_forward.11
= control target key start
LH: loop header
LB: loop body
LE: loop exit
PB: predicated region body
PF: predicated region fallthrough
CT: control target
= control target key end

     0   :  { %s1664_s25 = smov 0   ;;  %s1666_s26 = smov 0   ;;  %s1846_s0 = inlined_call_operand.vmem [shape: f32[2,8,32], index: 0, kind: input, shape index: {}, may-alias: {0,1}]   ;;  %s1847_s1 = inlined_call_operand.vmem [shape: f32[2,8,32], index: 1, kind: input, shape index: {}, may-alias: {0,1}]   ;;  %s1848_s2 = inlined_call_operand.vmem [shape: f32[2,1,8], index: 2, kind: input, shape index: {}]   ;;  %s1849_s3 = inlined_call_operand.vmem [shape: bf16[32,32], index: 3, kind: input, shape index: {}]   ;;  %s1850_s4 = inlined_call_operand.vmem [shape: f32[1,32], index: 4, kind: input, shape index: {}]   ;;  %s1851_s5 = inlined_call_operand.vmem [shape: bf16[32,32], index: 5, kind: input, shape index: {}]   ;;  %s1852_s6 = inlined_call_operand.vmem [shape: f32[1,32], index: 6, kind: input, shape index: {}]   ;;  %s1853_s7 = inlined_call_operand.vmem [shape: bf16[32,32], index: 7, kind: input, shape index: {}]   ;;  %s1854_s8 = inlined_call_operand.vmem [shape: f32[1,32], index: 8, kind: input, shape index: {}]   ;;  %s1855_s9 = inlined_call_operand.vmem [shape: bf16[32,32], index: 9, kind: input, shape index: {}]   ;;  %s1856_s10 = inlined_call_operand.vmem [shape: f32[1,32], index: 10, kind: input, shape index: {}]   ;;  %s1857_s11 = inlined_call_operand.vmem [shape: f32[1,32], index: 11, kind: input, shape index: {}]   ;;  %s1858_s12 = inlined_call_operand.vmem [shape: f32[1,32], index: 12, kind: input, shape index: {}]   ;;  %s1859_s13 = inlined_call_operand.vmem [shape: f32[2,8,32], index: 13, kind: output, shape index: {}]  }
   0x1   :  { %s1668_s27 = smov 0  }
   0x2 LB: > { %s35_s28 = sadd.s32 1, %s1580_s26  ;;  %p1363_p0 = scmp.ge.s32.totalorder %s1584_s27, 1  ;;  %s1584_s27 = sphi %s1668_s27, %s23_s27   ;;  %s1580_s26 = sphi %s1666_s26, %s1861_s26   ;;  %s1576_s25 = sphi %s1664_s25, %s1860_s25  }
   0x3   : > { %p37_p1 = scmp.ge.s32.totalorder %s35_s28, 2  ;;  %p422_p2 = scmp.lt.s32.totalorder %s1584_s27, 3 }
   0x5   : > { %s1863_s28 = smov (%p37_p1, %s35_s28), 0  ;;  %p423_p3 = pnand %p1363_p0, %p422_p2 }
   0x6   : > { %v1536_v0 = vld [vmem:[%s1849_s3] sm:$0xff] (!%p423_p3)   ;;  %v1586_v1 = vmov (!%p423_p3), 0.0   ;;  %v1538_v3 = vld [vmem:[%s1849_s3 + $0x8] sm:$0xff] (!%p423_p3)   ;;  %vm1587_vm0 = vmmov (!%p423_p3), 0   ;;  %p477_p4 = scmp.lt.s32.totalorder (!%p423_p3), %s1576_s25, 1  ;;  %vm526_vm1 = vcmask (!%p423_p3), 261120  }
   0x7   : > { %426 = sbr.rel (%p423_p3) target bundleno = 1758 (0x6de), region = 72  ;;  %1424 = vmatprep.subr.bf16.mxu0 (!%p423_p3), %v1586_v1  ;;  %1432 = vmatprep.subr.bf16.mxu1 (!%p423_p3), %v1586_v1  ;;  %v1537_v2 = vld [vmem:[%s1851_s5] sm:$0xff] (!%p423_p3)   ;;  %v1539_v4 = vld [vmem:[%s1851_s5 + $0x8] sm:$0xff] (!%p423_p3)   ;;  %vm730_vm2 = vcmask (!%p423_p3), 64512   ;;  %s1589_s24 = smov (!%p423_p3), 104   ;;  %vm966_vm3 = vcmask (!%p423_p3), 1043456  }
   0x8   : > { %1425 = vmatpush3.bf16.msra.mxu0 (!%p423_p3), %v1536_v0  ;;  %1428 = vmatprep.mubr.msk.bf16.mxu0 (!%p423_p3), %vm1587_vm0, %v1586_v1  ;;  %v1540_v9 = vld [vmem:[%s1853_s7] sm:$0xff] (!%p423_p3)   ;;  %v1541_v10 = vld [vmem:[%s1853_s7 + $0x8] sm:$0xff] (!%p423_p3)   ;;  %s1590_s29 = smov (!%p423_p3), 112   ;;  %s1591_s22 = smov (!%p423_p3), 8   ;;  %vm1161_vm4 = vcmask (!%p423_p3), 130048   ;;  %vm1163_vm5 = vcmask (!%p423_p3), 195584  }
   0x9   : > { %1433 = vmatpush3.bf16.msra.mxu1 (!%p423_p3), %v1537_v2  ;;  %1426 = vmatprep.subr.bf16.mxu0 (!%p423_p3), %v1586_v1  ;;  %v1367_v11 = vld [vmem:[%s1850_s4] ss:$0 sm:$0xff] (!%p423_p3) }
   0xa   : > { %1434 = vmatprep.subr.bf16.mxu1 (!%p423_p3), %v1586_v1  ;;  %1436 = vmatprep.mubr.msk.bf16.mxu1 (!%p423_p3), %vm1587_vm0, %v1586_v1  ;;  %v1371_v12 = vld [vmem:[%s1852_s6] ss:$0 sm:$0xff] (!%p423_p3) }
   0xb   : > { %v1375_v32 = vld [vmem:[%s1854_s8] ss:$0 sm:$0xff] (!%p423_p3) }
   0xc   : > { %1427 = vmatpush3.bf16.msra.mxu0 (!%p423_p3), %v1538_v3 }
   0xd   : > { %1435 = vmatpush3.bf16.msra.mxu1 (!%p423_p3), %v1539_v4  ;;  %1440 = vmatprep.subr.bf16.mxu0 (!%p423_p3), %v1586_v1 }
   0xe   : > { %s1865_s25 = smov (!%p477_p4, %s1576_s25), 1  ;;  %1448 = vmatprep.subr.bf16.mxu1 %v1586_v1 }
   0xf   : > { %s1705_s20 = sshll.u32 %s1865_s25, 3  ;;  %s490_s17 = scalar_lea.vmem %s1848_s2, %s1865_s25 }
  0x10   : > { %s483_s23 = scalar_lea.vmem %s1846_s0, %s1705_s20  ;;  %s487_s30 = scalar_lea.vmem %s1847_s1, %s1705_s20  ;;  %v1379_v43 = vld [vmem:[%s490_s17] ss:$0 sm:$0xff] }
  0x11   : > { %v1712_v5 = vld [vmem:[%s483_s23] sm:$0xff]  ;;  %s1588_s23 = smov 120   ;;  %s497_s19 = scalar_lea.vmem %s1859_s13, %s1705_s20 }
  0x12   : > { %v501_v6 = vpack.c.bf16 %v1712_v5, %v1712_v5  ;;  %v500_v7 = vld [vmem:[%s487_s30] sm:$0xff] }
  0x13   : > { %v502_v8 = vpack.c.bf16 %v500_v7, %v500_v7 }
  0x14   : > { %1429 = vmatmul.mubr.msk.bf16.vlgmr.msra.gmra.mrb[0].mxu0 %vm526_vm1, %v501_v6 }
  0x15   : > { %1437 = vmatmul.mubr.msk.bf16.vlgmr.msra.gmra.mrb[0].mxu1 %vm526_vm1, %v502_v8  ;;  %1444 = vmatprep.mubr.msk.bf16.mxu0 %vm1587_vm0, %v1586_v1 }
  0x16   : > { %1450 = vmatprep.mubr.msk.bf16.mxu1 %vm1587_vm0, %v1586_v1  ;;  %1441 = vmatpush3.bf16.msra.mxu0 %v1540_v9 }
  0x17   : > { %1442 = vmatprep.subr.bf16.mxu0 %v1586_v1 }
  0x1a   : > { %1443 = vmatpush3.bf16.msra.mxu0 %v1541_v10 }
  0x1b   : > { %1454 = vmatprep.subr.bf16.mxu0 %v1586_v1 }
  0x1d   : > { %1445 = vmatmul.mubr.msk.bf16.vlgmr.msra.gmra.mrb[4].mxu0 %vm526_vm1, %v502_v8 }
  0x1e   : > { %1456 = vmatprep.mubr.msk.bf16.mxu0 %vm1587_vm0, %v1586_v1 }
  0xe7   : > { %v564_v13 = vpop.f32.mrb[0].mxu0 }
  0xe8   : > { %v565_v14 = vadd.f32 %v1367_v11, %v564_v13  ;;  %v630_v15 = vpop.f32.mrb[0].mxu1  ;;  %v1430_v16 = vpop.f32.mrb[1].mxu0 }
  0xe9   : > { %v631_v17 = vadd.f32 %v1371_v12, %v630_v15  ;;  %v1438_v18 = vpop.f32.mrb[1].mxu1  ;;  %v567_v19 = vpop.f32.mrb[2].mxu0 }
  0xea   : > { %v699_v20 = vpack.c.bf16 %v565_v14, %v565_v14  ;;  %v633_v21 = vpop.f32.mrb[2].mxu1  ;;  %v1431_v22 = vpop.f32.mrb[3].mxu0 }
  0xeb   : > { %v700_v23 = vpack.c.bf16 %v631_v17, %v631_v17  ;;  %v1439_v24 = vpop.f32.mrb[3].mxu1 }
  0xec   : > { %703 = vrot.lane.b32.xlu1 %v699_v20, %s1588_s23 }
  0xed   : > { %710 = vrot.lane.b32.xlu0 %v700_v23, %s1588_s23  ;;  %v735_v25 = vsel %vm730_vm2, %v700_v23, 0 }
  0xee   : > { %1449 = vmatpush3.bf16.xpose.msra.mxu1 %v735_v25 }
  0xef   : > { %1460 = vmatprep.subr.bf16.mxu1 %v1586_v1 }
  0xf0   : > { %714 = vrot.lane.b32.xlu1 %v700_v23, %s1589_s24  ;;  %v693_v26 = vpop.f32.mrb[4].mxu0 }
  0xf1   : > { %712 = vrot.lane.b32.xlu0 %v700_v23, %s1590_s29  ;;  %v1446_v27 = vpop.f32.mrb[5].mxu0  ;;  %v694_v34 = vadd.f32 %v1375_v32, %v693_v26 }
  0xf2   : > { %v696_v28 = vpop.f32.mrb[6].mxu0 }
  0xf3   : > { %v1447_v29 = vpop.f32.mrb[7].mxu0  ;;  %v1761_v38 = vpack.c.bf16 %v694_v34, %v694_v34 }
  0xf4   : > { %707 = vrot.lane.b32.xlu1 %v699_v20, %s1589_s24 }
  0xf5   : > { %705 = vrot.lane.b32.xlu0 %v699_v20, %s1590_s29  ;;  %1451 = vmatmul.mubr.msk.bf16.vlgmr.msra.gmra.mrb[4].mxu1 %vm730_vm2, %v699_v20  ;;  %v968_v40 = vsel %vm966_vm3, %v1761_v38, 0 }
  0xf6   : > { %1462 = vmatprep.mubr.msk.bf16.mxu1 %vm1587_vm0, %v1586_v1 }
 0x15e   : > { %v704_v31 = vpop.permute.xlu1 %703 }
 0x15f   : > { %v711_v30 = vpop.permute.xlu0 %710 }
 0x160   : > { %v781_v33 = vsel %vm730_vm2, %v711_v30, 0 }
 0x161   : > { %1455 = vmatpush3.bf16.xpose.msra.mxu0 %v781_v33 }
 0x162   : > { %1466 = vmatprep.subr.bf16.mxu0 %v1586_v1  ;;  %v715_v37 = vpop.permute.xlu1 %714 }
 0x163   : > { %v713_v35 = vpop.permute.xlu0 %712  ;;  %v873_v39 = vsel %vm730_vm2, %v715_v37, 0 }
 0x164   : > { %v827_v36 = vsel %vm730_vm2, %v713_v35, 0 }
 0x165   : > { %1461 = vmatpush3.bf16.xpose.msra.mxu1 %v827_v36 }
 0x166   : > { %1472 = vmatprep.subr.bf16.mxu1 %v1586_v1  ;;  %v708_v42 = vpop.permute.xlu1 %707 }
 0x167   : > { %v706_v41 = vpop.permute.xlu0 %705 }
 0x168   : > { %1457 = vmatmul.mubr.msk.bf16.vlgmr.msra.gmra.mrb[8].mxu0 %vm730_vm2, %v704_v31 }
 0x169   : > { %1467 = vmatpush3.bf16.xpose.msra.mxu0 %v873_v39  ;;  %1468 = vmatprep.mubr.msk.bf16.mxu0 %vm1587_vm0, %v1586_v1 }
 0x16a   : > { %1478 = vmatprep.subr.bf16.mxu0 %v1586_v1 }
 0x16c   : > { %1463 = vmatmul.mubr.msk.bf16.vlgmr.msra.gmra.mrb[8].mxu1 %vm730_vm2, %v706_v41 }
 0x16d   : > { %1473 = vmatpush3.bf16.msra.mxu1 %v968_v40  ;;  %1474 = vmatprep.mubr.msk.bf16.mxu1 %vm1587_vm0, %v1586_v1 }
 0x16e   : > { %1484 = vmatprep.subr.bf16.mxu1 %v1586_v1 }
 0x170   : > { %1469 = vmatmul.mubr.msk.bf16.vlgmr.msra.gmra.mrb[12].mxu0 %vm730_vm2, %v708_v42 }
 0x171   : > { %1480 = vmatprep.mubr.msk.bf16.mxu0 %vm1587_vm0, %v1586_v1 }
 0x1c8   : > { %v771_v44 = vpop.f32.mrb[4].mxu1 }
 0x1c9   : > { %v772_v45 = vadd.f32 %v1379_v43, %v771_v44  ;;  %v1452_v46 = vpop.f32.mrb[5].mxu1 }
 0x1ca   : > { %v774_v47 = vpop.f32.mrb[6].mxu1 }
 0x1cb   : > { %v1453_v48 = vpop.f32.mrb[7].mxu1  ;;  %v915_v49 = vsel %vm730_vm2, %v772_v45, -inf }
 0x1cc   : > { %916 = vmax.xlane.f32.xlu0 %v915_v49 }
 0x23b   : > { %v817_v50 = vpop.f32.mrb[8].mxu0 }
 0x23c   : > { %v818_v51 = vadd.f32 %v1379_v43, %v817_v50  ;;  %v1458_v52 = vpop.f32.mrb[9].mxu0 }
 0x23d   : > { %v820_v53 = vpop.f32.mrb[10].mxu0  ;;  %v1542_v52 = vld [vmem:[%s1855_s9] sm:$0xff]  }
 0x23e   : > { %v1459_v54 = vpop.f32.mrb[11].mxu0  ;;  %v918_v55 = vsel %vm730_vm2, %v818_v51, -inf  ;;  %v1543_v53 = vld [vmem:[%s1855_s9 + $0x8] sm:$0xff]  }
 0x23f   : > { %v863_v56 = vpop.f32.mrb[8].mxu1  ;;  %919 = vmax.xlane.f32.xlu1 %v918_v55 }
 0x240   : > { %v864_v57 = vadd.f32 %v1379_v43, %v863_v56  ;;  %v1464_v58 = vpop.f32.mrb[9].mxu1 }
 0x241   : > { %v866_v59 = vpop.f32.mrb[10].mxu1 }
 0x242   : > { %v1465_v60 = vpop.f32.mrb[11].mxu1  ;;  %v921_v61 = vsel %vm730_vm2, %v864_v57, -inf }
 0x243   : > { %922 = vmax.xlane.f32.xlu0 %v921_v61  ;;  %v909_v62 = vpop.f32.mrb[12].mxu0 }
 0x244   : > { %v910_v63 = vadd.f32 %v1379_v43, %v909_v62  ;;  %v1470_v0 = vpop.f32.mrb[13].mxu0 }
 0x245   : > { %v912_v2 = vpop.f32.mrb[14].mxu0 }
 0x246   : > { %v1471_v3 = vpop.f32.mrb[15].mxu0  ;;  %v924_v4 = vsel %vm730_vm2, %v910_v63, -inf }
 0x247   : > { %925 = vmax.xlane.f32.xlu0 %v924_v4 }
 0x250   : > { %717 = vrot.lane.b32.xlu1 %v1761_v38, %s1588_s23  ;;  %s1592_s23 = smov 16  }
 0x259   : > { %v917_v6 = vpop.xlane.xlu0 %916 }
 0x25a   : > { %v927_v7 = vsub.f32 %v772_v45, %v917_v6 }
 0x25c   : > { %v931_v8 = vmul.f32 1.442695, %v927_v7 }
 0x25e   : > { %1544 = vpow2.f32 %v931_v8 }
 0x268   : > { %v1545_v9 = vpop.eup %1544 }
 0x269   : > { %v939_v10 = vsel %vm730_vm2, %v1545_v9, 0.0 }
 0x274   : > { %940 = vadd.xlane.f32.xlu1 %v939_v10  ;;  %v1388_v10 = vld [vmem:[%s1856_s10] ss:$0 sm:$0xff] }
 0x2cc   : > { %v920_v11 = vpop.xlane.xlu1 %919 }
 0x2cd   : > { %v928_v12 = vsub.f32 %v818_v51, %v920_v11 }
 0x2cf   : > { %v933_v13 = vmul.f32 1.442695, %v928_v12 }
 0x2d0   : > { %v923_v14 = vpop.xlane.xlu0 %922  ;;  %v718_v15 = vpop.permute.xlu1 %717 }
 0x2d1   : > { %1546 = vpow2.f32 %v933_v13  ;;  %v929_v16 = vsub.f32 %v864_v57, %v923_v14  ;;  %v1014_v17 = vsel %vm966_vm3, %v718_v15, 0 }
 0x2d2   : > { %1479 = vmatpush3.bf16.msra.mxu0 %v1014_v17 }
 0x2d3   : > { %v935_v18 = vmul.f32 1.442695, %v929_v16  ;;  %1490 = vmatprep.subr.bf16.mxu0 %v1586_v1 }
 0x2d4   : > { %v926_v19 = vpop.xlane.xlu0 %925 }
 0x2d5   : > { %1548 = vpow2.f32 %v935_v18  ;;  %v930_v20 = vsub.f32 %v910_v63, %v926_v19 }
 0x2d7   : > { %v937_v21 = vmul.f32 1.442695, %v930_v20 }
 0x2d9   : > { %1550 = vpow2.f32 %v937_v21 }
 0x2db   : > { %v1547_v22 = vpop.eup %1546 }
 0x2dc   : > { %v942_v23 = vsel %vm730_vm2, %v1547_v22, 0.0 }
 0x2dd   : > { %943 = vadd.xlane.f32.xlu0 %v942_v23 }
 0x2df   : > { %v1549_v24 = vpop.eup %1548 }
 0x2e0   : > { %v945_v25 = vsel %vm730_vm2, %v1549_v24, 0.0 }
 0x2e1   : > { %946 = vadd.xlane.f32.xlu1 %v945_v25 }
 0x2e3   : > { %v1551_v26 = vpop.eup %1550 }
 0x2e4   : > { %v948_v27 = vsel %vm730_vm2, %v1551_v26, 0.0 }
 0x2e5   : > { %949 = vadd.xlane.f32.xlu0 %v948_v27 }
 0x2f2   : > { %721 = vrot.lane.b32.xlu1 %v1761_v38, %s1589_s24  ;;  %s1593_s24 = smov 24  }
 0x2fb   : > { %719 = vrot.lane.b32.xlu0 %v1761_v38, %s1590_s29 }
 0x301   : > { %v941_v28 = vpop.xlane.xlu1 %940 }
 0x302   : > { %1552 = vrcp.f32 %v941_v28  ;;  %v1393_v28 = vld [vmem:[%s1858_s12] ss:$0 sm:$0xff] }
 0x30c   : > { %v1553_v29 = vpop.eup %1552 }
 0x30d   : > { %v955_v30 = vmul.f32 %v1553_v29, %v1545_v9 }
 0x30f   : > { %v959_v31 = vpack.c.bf16 %v955_v30, %v955_v30 }
 0x311   : > { %1475 = vmatmul.mubr.msk.bf16.vlgmr.msra.gmra.mrb[12].mxu1 %vm730_vm2, %v959_v31 }
 0x312   : > { %1486 = vmatprep.mubr.msk.bf16.mxu1 %vm1587_vm0, %v1586_v1 }
 0x36a   : > { %v944_v32 = vpop.xlane.xlu0 %943 }
 0x36b   : > { %1554 = vrcp.f32 %v944_v32 }
 0x36e   : > { %v947_v33 = vpop.xlane.xlu1 %946 }
 0x36f   : > { %1556 = vrcp.f32 %v947_v33 }
 0x372   : > { %v950_v34 = vpop.xlane.xlu0 %949  ;;  %v722_v38 = vpop.permute.xlu1 %721 }
 0x373   : > { %1558 = vrcp.f32 %v950_v34  ;;  %v1106_v43 = vsel %vm966_vm3, %v722_v38, 0 }
 0x375   : > { %v1555_v35 = vpop.eup %1554 }
 0x376   : > { %v956_v36 = vmul.f32 %v1555_v35, %v1547_v22  ;;  %v720_v37 = vpop.permute.xlu0 %719 }
 0x377   : > { %v1060_v39 = vsel %vm966_vm3, %v720_v37, 0 }
 0x378   : > { %1485 = vmatpush3.bf16.msra.mxu1 %v1060_v39  ;;  %v960_v40 = vpack.c.bf16 %v956_v36, %v956_v36 }
 0x379   : > { %v1557_v41 = vpop.eup %1556  ;;  %1496 = vmatprep.subr.bf16.mxu1 %v1586_v1 }
 0x37a   : > { %v957_v42 = vmul.f32 %v1557_v41, %v1549_v24  ;;  %1481 = vmatmul.mubr.msk.bf16.vlgmr.msra.gmra.mrb[16].mxu0 %vm730_vm2, %v960_v40 }
 0x37b   : > { %1491 = vmatpush3.bf16.msra.mxu0 %v1106_v43  ;;  %1492 = vmatprep.mubr.msk.bf16.mxu0 %vm1587_vm0, %v1586_v1 }
 0x37c   : > { %v961_v44 = vpack.c.bf16 %v957_v42, %v957_v42 }
 0x37d   : > { %v1559_v45 = vpop.eup %1558 }
 0x37e   : > { %v958_v46 = vmul.f32 %v1559_v45, %v1551_v26  ;;  %1487 = vmatmul.mubr.msk.bf16.vlgmr.msra.gmra.mrb[16].mxu1 %vm730_vm2, %v961_v44 }
 0x37f   : > { %1500 = vmatprep.mubr.msk.bf16.mxu1 %vm1587_vm0, %v1586_v1  ;;  %1497 = vmatpush3.bf16.msra.mxu1 %v1542_v52 }
 0x380   : > { %v962_v47 = vpack.c.bf16 %v958_v46, %v958_v46  ;;  %1498 = vmatprep.subr.bf16.mxu1 %v1586_v1 }
 0x382   : > { %1493 = vmatmul.mubr.msk.bf16.vlgmr.msra.gmra.mrb[20].mxu0 %vm730_vm2, %v962_v47 }
 0x383   : > { %1499 = vmatpush3.bf16.msra.mxu1 %v1543_v53 }
 0x3e4   : > { %v1004_v48 = vpop.f32.mrb[12].mxu1 }
 0x3e5   : > { %v1476_v49 = vpop.f32.mrb[13].mxu1 }
 0x3e6   : > { %v1007_v50 = vpop.f32.mrb[14].mxu1 }
 0x3e7   : > { %v1477_v51 = vpop.f32.mrb[15].mxu1 }
 0x44d   : > { %v1050_v54 = vpop.f32.mrb[16].mxu0 }
 0x44e   : > { %1149 = vrot.lane.b32.xlu1 %v1050_v54, %s1591_s22  ;;  %v1482_v55 = vpop.f32.mrb[17].mxu0 }
 0x44f   : > { %v1053_v56 = vpop.f32.mrb[18].mxu0 }
 0x450   : > { %v1483_v57 = vpop.f32.mrb[19].mxu0 }
 0x451   : > { %v1096_v58 = vpop.f32.mrb[16].mxu1 }
 0x452   : > { %1153 = vrot.lane.b32.xlu0 %v1096_v58, %s1592_s23  ;;  %v1488_v59 = vpop.f32.mrb[17].mxu1 }
 0x453   : > { %v1099_v60 = vpop.f32.mrb[18].mxu1 }
 0x454   : > { %v1489_v61 = vpop.f32.mrb[19].mxu1 }
 0x455   : > { %v1142_v62 = vpop.f32.mrb[20].mxu0 }
 0x456   : > { %1157 = vrot.lane.b32.xlu1 %v1142_v62, %s1593_s24  ;;  %v1494_v1 = vpop.f32.mrb[21].mxu0 }
 0x457   : > { %v1145_v63 = vpop.f32.mrb[22].mxu0 }
 0x458   : > { %v1495_v0 = vpop.f32.mrb[23].mxu0 }
 0x4c0   : > { %v1150_v2 = vpop.permute.xlu1 %1149 }
 0x4c1   : > { %v1160_v4 = vsel %vm730_vm2, %v1004_v48, %v1150_v2 }
 0x4c4   : > { %v1154_v3 = vpop.permute.xlu0 %1153 }
 0x4c5   : > { %v1162_v6 = vsel %vm1161_vm4, %v1160_v4, %v1154_v3 }
 0x4c8   : > { %v1158_v7 = vpop.permute.xlu1 %1157 }
 0x4c9   : > { %v1164_v8 = vsel %vm1163_vm5, %v1162_v6, %v1158_v7 }
 0x4ca   : > { %v1165_v9 = vpack.c.bf16 %v1164_v8, %v1164_v8 }
 0x4cc   : > { %1501 = vmatmul.mubr.msk.bf16.vlgmr.msra.gmra.mrb[20].mxu1 %vm526_vm1, %v1165_v9 }
 0x59f   : > { %v1226_v11 = vpop.f32.mrb[20].mxu1 }
 0x5a0   : > { %v1227_v12 = vadd.f32 %v1388_v10, %v1226_v11  ;;  %v1502_v13 = vpop.f32.mrb[21].mxu1 }
 0x5a1   : > { %v1229_v14 = vpop.f32.mrb[22].mxu1 }
 0x5a2   : > { %v1503_v15 = vpop.f32.mrb[23].mxu1  ;;  %v1232_v16 = vadd.f32 %v1227_v12, %v1712_v5  ;;  %v1392_v5 = vld [vmem:[%s1857_s11] ss:$0 sm:$0xff] }
 0x5a4   : > { %v1233_v17 = vsel %vm526_vm1, %v1232_v16, 0.0 }
 0x5a5   : > { %1234 = vadd.xlane.f32.xlu0 %v1233_v17 }
 0x632   : > { %v1235_v18 = vpop.xlane.xlu0 %1234 }
 0x633   : > { %v1237_v19 = vmul.f32 0.03125, %v1235_v18 }
 0x635   : > { %v1238_v20 = vsub.f32 %v1232_v16, %v1237_v19 }
 0x637   : > { %v1239_v21 = vmul.f32 %v1238_v20, %v1238_v20 }
 0x639   : > { %v1240_v22 = vsel %vm526_vm1, %v1239_v21, 0.0 }
 0x63a   : > { %1241 = vadd.xlane.f32.xlu1 %v1240_v22 }
 0x6c7   : > { %v1242_v23 = vpop.xlane.xlu1 %1241 }
 0x6c8   : > { %v1243_v24 = vmul.f32 0.03125, %v1242_v23 }
 0x6ca   : > { %v1244_v25 = vadd.f32 1e-05, %v1243_v24 }
 0x6cc   : > { %1560 = vrsqrt.f32 %v1244_v25 }
 0x6d6   : > { %v1561_v26 = vpop.eup %1560 }
 0x6d7   : > { %v1246_v27 = vmul.f32 %v1561_v26, %v1238_v20 }
 0x6d9   : > { %v1254_v29 = vmul.f32 %v1392_v5, %v1246_v27 }
 0x6db   : > { %v1262_v30 = vadd.f32 %v1393_v28, %v1254_v29 }
 0x6dd   : > { %1263 = vst.msk [vmem:[%s497_s19] sm:$0xff] %vm526_vm1, %v1262_v30 }
 0x6de PF: > { %s23_s27 = sadd.s32 1, %s1584_s27   ;;  %s1860_s25 = smov %s1580_s26 }
 0x6df   : > { %p20_p5 = scmp.ge.s32.totalorder %s23_s27, 4   ;;  %s1861_s26 = smov %s1863_s28 }
 0x6e1   :  { %22 = sbr.rel (!%p20_p5) target bundleno = 2 (0x2), region = 108 }

// kernel: transformer_forward.15
= control target key start
LH: loop header
LB: loop body
LE: loop exit
PB: predicated region body
PF: predicated region fallthrough
CT: control target
= control target key end

     0   :  { %s1732_s29 = smov 0   ;;  %s1734_s30 = smov 0   ;;  %s1917_s0 = inlined_call_operand.vmem [shape: f32[2,8,32], index: 0, kind: input, shape index: {}, may-alias: {0,1}]   ;;  %s1918_s1 = inlined_call_operand.vmem [shape: f32[2,8,32], index: 1, kind: input, shape index: {}, may-alias: {0,1}]   ;;  %s1919_s2 = inlined_call_operand.vmem [shape: f32[8,8], index: 2, kind: input, shape index: {}]   ;;  %s1920_s3 = inlined_call_operand.vmem [shape: f32[2,1,8], index: 3, kind: input, shape index: {}]   ;;  %s1921_s4 = inlined_call_operand.vmem [shape: bf16[32,32], index: 4, kind: input, shape index: {}]   ;;  %s1922_s5 = inlined_call_operand.vmem [shape: f32[1,32], index: 5, kind: input, shape index: {}]   ;;  %s1923_s6 = inlined_call_operand.vmem [shape: bf16[32,32], index: 6, kind: input, shape index: {}]   ;;  %s1924_s7 = inlined_call_operand.vmem [shape: f32[1,32], index: 7, kind: input, shape index: {}]   ;;  %s1925_s8 = inlined_call_operand.vmem [shape: bf16[32,32], index: 8, kind: input, shape index: {}]   ;;  %s1926_s9 = inlined_call_operand.vmem [shape: f32[1,32], index: 9, kind: input, shape index: {}]   ;;  %s1927_s10 = inlined_call_operand.vmem [shape: bf16[32,32], index: 10, kind: input, shape index: {}]   ;;  %s1928_s11 = inlined_call_operand.vmem [shape: f32[1,32], index: 11, kind: input, shape index: {}]   ;;  %s1929_s12 = inlined_call_operand.vmem [shape: f32[1,32], index: 12, kind: input, shape index: {}]   ;;  %s1930_s13 = inlined_call_operand.vmem [shape: f32[1,32], index: 13, kind: input, shape index: {}]   ;;  %s1931_s14 = inlined_call_operand.vmem [shape: f32[2,8,32], index: 14, kind: output, shape index: {}]  }
   0x1   :  { %s1736_s15 = smov 0  }
   0x2 LB: > { %s36_s16 = sadd.s32 1, %s1643_s30  ;;  %p1426_p0 = scmp.ge.s32.totalorder %s1647_s15, 1  ;;  %s1647_s15 = sphi %s1736_s15, %s24_s15   ;;  %s1643_s30 = sphi %s1734_s30, %s1933_s30   ;;  %s1639_s29 = sphi %s1732_s29, %s1932_s29  }
   0x3   : > { %p38_p1 = scmp.ge.s32.totalorder %s36_s16, 2  ;;  %p456_p2 = scmp.lt.s32.totalorder %s1647_s15, 3 }
   0x5   : > { %s1935_s16 = smov (%p38_p1, %s36_s16), 0  ;;  %p457_p3 = pnand %p1426_p0, %p456_p2 }
   0x6   : > { %v1599_v0 = vld [vmem:[%s1921_s4] sm:$0xff] (!%p457_p3)   ;;  %v1649_v1 = vmov (!%p457_p3), 0.0   ;;  %v1601_v3 = vld [vmem:[%s1921_s4 + $0x8] sm:$0xff] (!%p457_p3)   ;;  %vm1650_vm0 = vmmov (!%p457_p3), 0   ;;  %p517_p4 = scmp.lt.s32.totalorder (!%p457_p3), %s1639_s29, 1  ;;  %vm570_vm1 = vcmask (!%p457_p3), 261120  }
   0x7   : > { %460 = sbr.rel (%p457_p3) target bundleno = 1758 (0x6de), region = 76  ;;  %1487 = vmatprep.subr.bf16.mxu0 (!%p457_p3), %v1649_v1  ;;  %1495 = vmatprep.subr.bf16.mxu1 (!%p457_p3), %v1649_v1  ;;  %v1600_v2 = vld [vmem:[%s1923_s6] sm:$0xff] (!%p457_p3)   ;;  %v1602_v4 = vld [vmem:[%s1923_s6 + $0x8] sm:$0xff] (!%p457_p3)   ;;  %vm776_vm2 = vcmask (!%p457_p3), 64512   ;;  %s1651_s17 = smov (!%p457_p3), 120   ;;  %vm1012_vm3 = vcmask (!%p457_p3), 1043456  }
   0x8   : > { %1488 = vmatpush3.bf16.msra.mxu0 (!%p457_p3), %v1599_v0  ;;  %1491 = vmatprep.mubr.msk.bf16.mxu0 (!%p457_p3), %vm1650_vm0, %v1649_v1  ;;  %v1603_v9 = vld [vmem:[%s1925_s8] sm:$0xff] (!%p457_p3)   ;;  %v1604_v10 = vld [vmem:[%s1925_s8 + $0x8] sm:$0xff] (!%p457_p3)   ;;  %s1652_s18 = smov (!%p457_p3), 104   ;;  %s1655_s20 = smov (!%p457_p3), 16   ;;  %vm1207_vm4 = vcmask (!%p457_p3), 130048   ;;  %vm1209_vm5 = vcmask (!%p457_p3), 195584  }
   0x9   : > { %1496 = vmatpush3.bf16.msra.mxu1 (!%p457_p3), %v1600_v2  ;;  %1489 = vmatprep.subr.bf16.mxu0 (!%p457_p3), %v1649_v1  ;;  %v1430_v11 = vld [vmem:[%s1922_s5] ss:$0 sm:$0xff] (!%p457_p3)  ;;  %s1656_s21 = smov (!%p457_p3), 24  }
   0xa   : > { %1497 = vmatprep.subr.bf16.mxu1 (!%p457_p3), %v1649_v1  ;;  %1499 = vmatprep.mubr.msk.bf16.mxu1 (!%p457_p3), %vm1650_vm0, %v1649_v1  ;;  %v1434_v12 = vld [vmem:[%s1924_s7] ss:$0 sm:$0xff] (!%p457_p3) }
   0xb   : > { %v1438_v32 = vld [vmem:[%s1926_s9] ss:$0 sm:$0xff] (!%p457_p3) }
   0xc   : > { %1490 = vmatpush3.bf16.msra.mxu0 (!%p457_p3), %v1601_v3  ;;  %v767_v43 = vld [vmem:[%s1919_s2] sm:$0xff] (!%p457_p3) }
   0xd   : > { %1498 = vmatpush3.bf16.msra.mxu1 (!%p457_p3), %v1602_v4  ;;  %1503 = vmatprep.subr.bf16.mxu0 (!%p457_p3), %v1649_v1 }
   0xe   : > { %s1937_s29 = smov (!%p517_p4, %s1639_s29), 1  ;;  %1511 = vmatprep.subr.bf16.mxu1 %v1649_v1 }
   0xf   : > { %s1773_s25 = sshll.u32 %s1937_s29, 3  ;;  %s534_s24 = scalar_lea.vmem %s1920_s3, %s1937_s29 }
  0x10   : > { %s523_s28 = scalar_lea.vmem %s1917_s0, %s1773_s25  ;;  %s527_s19 = scalar_lea.vmem %s1918_s1, %s1773_s25  ;;  %v1442_v44 = vld [vmem:[%s534_s24] ss:$0 sm:$0xff] }
  0x11   : > { %v1780_v5 = vld [vmem:[%s523_s28] sm:$0xff]  ;;  %v775_v45 = vadd.f32 %v1442_v44, %v767_v43 }
  0x12   : > { %v545_v6 = vpack.c.bf16 %v1780_v5, %v1780_v5  ;;  %v544_v7 = vld [vmem:[%s527_s19] sm:$0xff]  ;;  %s1653_s19 = smov 112  }
  0x13   : > { %v546_v8 = vpack.c.bf16 %v544_v7, %v544_v7 }
  0x14   : > { %1492 = vmatmul.mubr.msk.bf16.vlgmr.msra.gmra.mrb[0].mxu0 %vm570_vm1, %v545_v6 }
  0x15   : > { %1500 = vmatmul.mubr.msk.bf16.vlgmr.msra.gmra.mrb[0].mxu1 %vm570_vm1, %v546_v8  ;;  %1507 = vmatprep.mubr.msk.bf16.mxu0 %vm1650_vm0, %v1649_v1 }
  0x16   : > { %1513 = vmatprep.mubr.msk.bf16.mxu1 %vm1650_vm0, %v1649_v1  ;;  %1504 = vmatpush3.bf16.msra.mxu0 %v1603_v9 }
  0x17   : > { %1505 = vmatprep.subr.bf16.mxu0 %v1649_v1 }
  0x1a   : > { %1506 = vmatpush3.bf16.msra.mxu0 %v1604_v10 }
  0x1b   : > { %1517 = vmatprep.subr.bf16.mxu0 %v1649_v1 }
  0x1d   : > { %1508 = vmatmul.mubr.msk.bf16.vlgmr.msra.gmra.mrb[4].mxu0 %vm570_vm1, %v546_v8 }
  0x1e   : > { %1519 = vmatprep.mubr.msk.bf16.mxu0 %vm1650_vm0, %v1649_v1 }
  0xe7   : > { %v608_v13 = vpop.f32.mrb[0].mxu0 }
  0xe8   : > { %v609_v14 = vadd.f32 %v1430_v11, %v608_v13  ;;  %v674_v15 = vpop.f32.mrb[0].mxu1  ;;  %v1493_v16 = vpop.f32.mrb[1].mxu0 }
  0xe9   : > { %v675_v17 = vadd.f32 %v1434_v12, %v674_v15  ;;  %v1501_v18 = vpop.f32.mrb[1].mxu1  ;;  %v611_v19 = vpop.f32.mrb[2].mxu0 }
  0xea   : > { %v743_v20 = vpack.c.bf16 %v609_v14, %v609_v14  ;;  %v677_v21 = vpop.f32.mrb[2].mxu1  ;;  %v1494_v22 = vpop.f32.mrb[3].mxu0 }
  0xeb   : > { %v744_v23 = vpack.c.bf16 %v675_v17, %v675_v17  ;;  %v1502_v24 = vpop.f32.mrb[3].mxu1 }
  0xec   : > { %747 = vrot.lane.b32.xlu1 %v743_v20, %s1651_s17 }
  0xed   : > { %754 = vrot.lane.b32.xlu0 %v744_v23, %s1651_s17  ;;  %v781_v25 = vsel %vm776_vm2, %v744_v23, 0 }
  0xee   : > { %1512 = vmatpush3.bf16.xpose.msra.mxu1 %v781_v25 }
  0xef   : > { %1523 = vmatprep.subr.bf16.mxu1 %v1649_v1 }
  0xf0   : > { %758 = vrot.lane.b32.xlu1 %v744_v23, %s1652_s18  ;;  %v737_v26 = vpop.f32.mrb[4].mxu0 }
  0xf1   : > { %756 = vrot.lane.b32.xlu0 %v744_v23, %s1653_s19  ;;  %v1509_v27 = vpop.f32.mrb[5].mxu0  ;;  %v738_v34 = vadd.f32 %v1438_v32, %v737_v26 }
  0xf2   : > { %v740_v28 = vpop.f32.mrb[6].mxu0 }
  0xf3   : > { %v1510_v29 = vpop.f32.mrb[7].mxu0  ;;  %v1829_v38 = vpack.c.bf16 %v738_v34, %v738_v34 }
  0xf4   : > { %751 = vrot.lane.b32.xlu1 %v743_v20, %s1652_s18 }
  0xf5   : > { %749 = vrot.lane.b32.xlu0 %v743_v20, %s1653_s19  ;;  %1514 = vmatmul.mubr.msk.bf16.vlgmr.msra.gmra.mrb[4].mxu1 %vm776_vm2, %v743_v20  ;;  %v1014_v40 = vsel %vm1012_vm3, %v1829_v38, 0 }
  0xf6   : > { %1525 = vmatprep.mubr.msk.bf16.mxu1 %vm1650_vm0, %v1649_v1 }
 0x15e   : > { %v748_v31 = vpop.permute.xlu1 %747 }
 0x15f   : > { %v755_v30 = vpop.permute.xlu0 %754 }
 0x160   : > { %v827_v33 = vsel %vm776_vm2, %v755_v30, 0 }
 0x161   : > { %1518 = vmatpush3.bf16.xpose.msra.mxu0 %v827_v33 }
 0x162   : > { %1529 = vmatprep.subr.bf16.mxu0 %v1649_v1  ;;  %v759_v37 = vpop.permute.xlu1 %758 }
 0x163   : > { %v757_v35 = vpop.permute.xlu0 %756  ;;  %v919_v39 = vsel %vm776_vm2, %v759_v37, 0 }
 0x164   : > { %v873_v36 = vsel %vm776_vm2, %v757_v35, 0 }
 0x165   : > { %1524 = vmatpush3.bf16.xpose.msra.mxu1 %v873_v36 }
 0x166   : > { %1535 = vmatprep.subr.bf16.mxu1 %v1649_v1  ;;  %v752_v42 = vpop.permute.xlu1 %751 }
 0x167   : > { %v750_v41 = vpop.permute.xlu0 %749 }
 0x168   : > { %1520 = vmatmul.mubr.msk.bf16.vlgmr.msra.gmra.mrb[8].mxu0 %vm776_vm2, %v748_v31 }
 0x169   : > { %1530 = vmatpush3.bf16.xpose.msra.mxu0 %v919_v39  ;;  %1531 = vmatprep.mubr.msk.bf16.mxu0 %vm1650_vm0, %v1649_v1 }
 0x16a   : > { %1541 = vmatprep.subr.bf16.mxu0 %v1649_v1 }
 0x16c   : > { %1526 = vmatmul.mubr.msk.bf16.vlgmr.msra.gmra.mrb[8].mxu1 %vm776_vm2, %v750_v41 }
 0x16d   : > { %1536 = vmatpush3.bf16.msra.mxu1 %v1014_v40  ;;  %1537 = vmatprep.mubr.msk.bf16.mxu1 %vm1650_vm0, %v1649_v1 }
 0x16e   : > { %1547 = vmatprep.subr.bf16.mxu1 %v1649_v1 }
 0x170   : > { %1532 = vmatmul.mubr.msk.bf16.vlgmr.msra.gmra.mrb[12].mxu0 %vm776_vm2, %v752_v42 }
 0x171   : > { %1543 = vmatprep.mubr.msk.bf16.mxu0 %vm1650_vm0, %v1649_v1 }
 0x1c8   : > { %v817_v46 = vpop.f32.mrb[4].mxu1 }
 0x1c9   : > { %v818_v47 = vadd.f32 %v817_v46, %v775_v45  ;;  %v1515_v48 = vpop.f32.mrb[5].mxu1 }
 0x1ca   : > { %v820_v49 = vpop.f32.mrb[6].mxu1 }
 0x1cb   : > { %v1516_v50 = vpop.f32.mrb[7].mxu1  ;;  %v961_v51 = vsel %vm776_vm2, %v818_v47, -inf }
 0x1cc   : > { %962 = vmax.xlane.f32.xlu0 %v961_v51 }
 0x23b   : > { %v863_v52 = vpop.f32.mrb[8].mxu0 }
 0x23c   : > { %v864_v53 = vadd.f32 %v863_v52, %v775_v45  ;;  %v1521_v54 = vpop.f32.mrb[9].mxu0 }
 0x23d   : > { %v866_v55 = vpop.f32.mrb[10].mxu0  ;;  %v1605_v54 = vld [vmem:[%s1927_s10] sm:$0xff]  }
 0x23e   : > { %v1522_v56 = vpop.f32.mrb[11].mxu0  ;;  %v964_v57 = vsel %vm776_vm2, %v864_v53, -inf  ;;  %v1606_v55 = vld [vmem:[%s1927_s10 + $0x8] sm:$0xff]  }
 0x23f   : > { %v909_v58 = vpop.f32.mrb[8].mxu1  ;;  %965 = vmax.xlane.f32.xlu1 %v964_v57 }
 0x240   : > { %v910_v59 = vadd.f32 %v909_v58, %v775_v45  ;;  %v1527_v60 = vpop.f32.mrb[9].mxu1 }
 0x241   : > { %v912_v61 = vpop.f32.mrb[10].mxu1 }
 0x242   : > { %v1528_v62 = vpop.f32.mrb[11].mxu1  ;;  %v967_v63 = vsel %vm776_vm2, %v910_v59, -inf }
 0x243   : > { %968 = vmax.xlane.f32.xlu0 %v967_v63  ;;  %v955_v0 = vpop.f32.mrb[12].mxu0 }
 0x244   : > { %v956_v2 = vadd.f32 %v955_v0, %v775_v45  ;;  %v1533_v3 = vpop.f32.mrb[13].mxu0 }
 0x245   : > { %v958_v4 = vpop.f32.mrb[14].mxu0 }
 0x246   : > { %v1534_v6 = vpop.f32.mrb[15].mxu0  ;;  %v970_v7 = vsel %vm776_vm2, %v956_v2, -inf }
 0x247   : > { %971 = vmax.xlane.f32.xlu0 %v970_v7 }
 0x250   : > { %761 = vrot.lane.b32.xlu1 %v1829_v38, %s1651_s17 }
 0x259   : > { %v963_v8 = vpop.xlane.xlu0 %962 }
 0x25a   : > { %v973_v9 = vsub.f32 %v818_v47, %v963_v8 }
 0x25c   : > { %v977_v10 = vmul.f32 1.442695, %v973_v9 }
 0x25e   : > { %1607 = vpow2.f32 %v977_v10 }
 0x268   : > { %v1608_v11 = vpop.eup %1607 }
 0x269   : > { %v985_v12 = vsel %vm776_vm2, %v1608_v11, 0.0 }
 0x274   : > { %986 = vadd.xlane.f32.xlu1 %v985_v12  ;;  %v1451_v12 = vld [vmem:[%s1928_s11] ss:$0 sm:$0xff] }
 0x2cc   : > { %v966_v13 = vpop.xlane.xlu1 %965 }
 0x2cd   : > { %v974_v14 = vsub.f32 %v864_v53, %v966_v13 }
 0x2cf   : > { %v979_v15 = vmul.f32 1.442695, %v974_v14 }
 0x2d0   : > { %v969_v16 = vpop.xlane.xlu0 %968  ;;  %v762_v17 = vpop.permute.xlu1 %761 }
 0x2d1   : > { %1609 = vpow2.f32 %v979_v15  ;;  %v975_v18 = vsub.f32 %v910_v59, %v969_v16  ;;  %v1060_v19 = vsel %vm1012_vm3, %v762_v17, 0 }
 0x2d2   : > { %1542 = vmatpush3.bf16.msra.mxu0 %v1060_v19 }
 0x2d3   : > { %v981_v20 = vmul.f32 1.442695, %v975_v18  ;;  %1553 = vmatprep.subr.bf16.mxu0 %v1649_v1 }
 0x2d4   : > { %v972_v21 = vpop.xlane.xlu0 %971 }
 0x2d5   : > { %1611 = vpow2.f32 %v981_v20  ;;  %v976_v22 = vsub.f32 %v956_v2, %v972_v21 }
 0x2d7   : > { %v983_v23 = vmul.f32 1.442695, %v976_v22 }
 0x2d9   : > { %1613 = vpow2.f32 %v983_v23 }
 0x2db   : > { %v1610_v24 = vpop.eup %1609 }
 0x2dc   : > { %v988_v25 = vsel %vm776_vm2, %v1610_v24, 0.0 }
 0x2dd   : > { %989 = vadd.xlane.f32.xlu0 %v988_v25 }
 0x2df   : > { %v1612_v26 = vpop.eup %1611 }
 0x2e0   : > { %v991_v27 = vsel %vm776_vm2, %v1612_v26, 0.0 }
 0x2e1   : > { %992 = vadd.xlane.f32.xlu1 %v991_v27 }
 0x2e3   : > { %v1614_v28 = vpop.eup %1613 }
 0x2e4   : > { %v994_v29 = vsel %vm776_vm2, %v1614_v28, 0.0 }
 0x2e5   : > { %995 = vadd.xlane.f32.xlu0 %v994_v29 }
 0x2f2   : > { %765 = vrot.lane.b32.xlu1 %v1829_v38, %s1652_s18  ;;  %s541_s18 = scalar_lea.vmem %s1931_s14, %s1773_s25 }
 0x2fb   : > { %763 = vrot.lane.b32.xlu0 %v1829_v38, %s1653_s19  ;;  %s1654_s19 = smov 8  }
 0x301   : > { %v987_v30 = vpop.xlane.xlu1 %986 }
 0x302   : > { %1615 = vrcp.f32 %v987_v30  ;;  %v1456_v30 = vld [vmem:[%s1930_s13] ss:$0 sm:$0xff] }
 0x30c   : > { %v1616_v31 = vpop.eup %1615 }
 0x30d   : > { %v1001_v32 = vmul.f32 %v1616_v31, %v1608_v11 }
 0x30f   : > { %v1005_v33 = vpack.c.bf16 %v1001_v32, %v1001_v32 }
 0x311   : > { %1538 = vmatmul.mubr.msk.bf16.vlgmr.msra.gmra.mrb[12].mxu1 %vm776_vm2, %v1005_v33 }
 0x312   : > { %1549 = vmatprep.mubr.msk.bf16.mxu1 %vm1650_vm0, %v1649_v1 }
 0x36a   : > { %v990_v34 = vpop.xlane.xlu0 %989 }
 0x36b   : > { %1617 = vrcp.f32 %v990_v34 }
 0x36e   : > { %v993_v35 = vpop.xlane.xlu1 %992 }
 0x36f   : > { %1619 = vrcp.f32 %v993_v35 }
 0x372   : > { %v996_v36 = vpop.xlane.xlu0 %995  ;;  %v766_v38 = vpop.permute.xlu1 %765 }
 0x373   : > { %1621 = vrcp.f32 %v996_v36  ;;  %v1152_v45 = vsel %vm1012_vm3, %v766_v38, 0 }
 0x375   : > { %v1618_v37 = vpop.eup %1617 }
 0x376   : > { %v1002_v39 = vmul.f32 %v1618_v37, %v1610_v24  ;;  %v764_v40 = vpop.permute.xlu0 %763 }
 0x377   : > { %v1106_v41 = vsel %vm1012_vm3, %v764_v40, 0 }
 0x378   : > { %1548 = vmatpush3.bf16.msra.mxu1 %v1106_v41  ;;  %v1006_v42 = vpack.c.bf16 %v1002_v39, %v1002_v39 }
 0x379   : > { %v1620_v43 = vpop.eup %1619  ;;  %1559 = vmatprep.subr.bf16.mxu1 %v1649_v1 }
 0x37a   : > { %v1003_v44 = vmul.f32 %v1620_v43, %v1612_v26  ;;  %1544 = vmatmul.mubr.msk.bf16.vlgmr.msra.gmra.mrb[16].mxu0 %vm776_vm2, %v1006_v42 }
 0x37b   : > { %1554 = vmatpush3.bf16.msra.mxu0 %v1152_v45  ;;  %1555 = vmatprep.mubr.msk.bf16.mxu0 %vm1650_vm0, %v1649_v1 }
 0x37c   : > { %v1007_v46 = vpack.c.bf16 %v1003_v44, %v1003_v44 }
 0x37d   : > { %v1622_v47 = vpop.eup %1621 }
 0x37e   : > { %v1004_v48 = vmul.f32 %v1622_v47, %v1614_v28  ;;  %1550 = vmatmul.mubr.msk.bf16.vlgmr.msra.gmra.mrb[16].mxu1 %vm776_vm2, %v1007_v46 }
 0x37f   : > { %1563 = vmatprep.mubr.msk.bf16.mxu1 %vm1650_vm0, %v1649_v1  ;;  %1560 = vmatpush3.bf16.msra.mxu1 %v1605_v54 }
 0x380   : > { %v1008_v49 = vpack.c.bf16 %v1004_v48, %v1004_v48  ;;  %1561 = vmatprep.subr.bf16.mxu1 %v1649_v1 }
 0x382   : > { %1556 = vmatmul.mubr.msk.bf16.vlgmr.msra.gmra.mrb[20].mxu0 %vm776_vm2, %v1008_v49 }
 0x383   : > { %1562 = vmatpush3.bf16.msra.mxu1 %v1606_v55 }
 0x3e4   : > { %v1050_v50 = vpop.f32.mrb[12].mxu1 }
 0x3e5   : > { %v1539_v51 = vpop.f32.mrb[13].mxu1 }
 0x3e6   : > { %v1053_v52 = vpop.f32.mrb[14].mxu1 }
 0x3e7   : > { %v1540_v53 = vpop.f32.mrb[15].mxu1 }
 0x44d   : > { %v1096_v56 = vpop.f32.mrb[16].mxu0 }
 0x44e   : > { %1195 = vrot.lane.b32.xlu1 %v1096_v56, %s1654_s19  ;;  %v1545_v57 = vpop.f32.mrb[17].mxu0 }
 0x44f   : > { %v1099_v58 = vpop.f32.mrb[18].mxu0 }
 0x450   : > { %v1546_v59 = vpop.f32.mrb[19].mxu0 }
 0x451   : > { %v1142_v60 = vpop.f32.mrb[16].mxu1 }
 0x452   : > { %1199 = vrot.lane.b32.xlu0 %v1142_v60, %s1655_s20  ;;  %v1551_v61 = vpop.f32.mrb[17].mxu1 }
 0x453   : > { %v1145_v62 = vpop.f32.mrb[18].mxu1 }
 0x454   : > { %v1552_v63 = vpop.f32.mrb[19].mxu1 }
 0x455   : > { %v1188_v0 = vpop.f32.mrb[20].mxu0 }
 0x456   : > { %1203 = vrot.lane.b32.xlu1 %v1188_v0, %s1656_s21  ;;  %v1557_v1 = vpop.f32.mrb[21].mxu0 }
 0x457   : > { %v1191_v2 = vpop.f32.mrb[22].mxu0 }
 0x458   : > { %v1558_v3 = vpop.f32.mrb[23].mxu0 }
 0x4c0   : > { %v1196_v4 = vpop.permute.xlu1 %1195 }
 0x4c1   : > { %v1206_v7 = vsel %vm776_vm2, %v1050_v50, %v1196_v4 }
 0x4c4   : > { %v1200_v6 = vpop.permute.xlu0 %1199 }
 0x4c5   : > { %v1208_v8 = vsel %vm1207_vm4, %v1206_v7, %v1200_v6 }
 0x4c8   : > { %v1204_v9 = vpop.permute.xlu1 %1203 }
 0x4c9   : > { %v1210_v10 = vsel %vm1209_vm5, %v1208_v8, %v1204_v9 }
 0x4ca   : > { %v1211_v11 = vpack.c.bf16 %v1210_v10, %v1210_v10 }
 0x4cc   : > { %1564 = vmatmul.mubr.msk.bf16.vlgmr.msra.gmra.mrb[20].mxu1 %vm570_vm1, %v1211_v11 }
 0x59f   : > { %v1272_v13 = vpop.f32.mrb[20].mxu1 }
 0x5a0   : > { %v1273_v14 = vadd.f32 %v1451_v12, %v1272_v13  ;;  %v1565_v15 = vpop.f32.mrb[21].mxu1 }
 0x5a1   : > { %v1275_v16 = vpop.f32.mrb[22].mxu1 }
 0x5a2   : > { %v1566_v17 = vpop.f32.mrb[23].mxu1  ;;  %v1278_v18 = vadd.f32 %v1273_v14, %v1780_v5  ;;  %v1455_v5 = vld [vmem:[%s1929_s12] ss:$0 sm:$0xff] }
 0x5a4   : > { %v1279_v19 = vsel %vm570_vm1, %v1278_v18, 0.0 }
 0x5a5   : > { %1280 = vadd.xlane.f32.xlu0 %v1279_v19 }
 0x632   : > { %v1281_v20 = vpop.xlane.xlu0 %1280 }
 0x633   : > { %v1283_v21 = vmul.f32 0.03125, %v1281_v20 }
 0x635   : > { %v1284_v22 = vsub.f32 %v1278_v18, %v1283_v21 }
 0x637   : > { %v1285_v23 = vmul.f32 %v1284_v22, %v1284_v22 }
 0x639   : > { %v1286_v24 = vsel %vm570_vm1, %v1285_v23, 0.0 }
 0x63a   : > { %1287 = vadd.xlane.f32.xlu1 %v1286_v24 }
 0x6c7   : > { %v1288_v25 = vpop.xlane.xlu1 %1287 }
 0x6c8   : > { %v1289_v26 = vmul.f32 0.03125, %v1288_v25 }
 0x6ca   : > { %v1290_v27 = vadd.f32 1e-05, %v1289_v26 }
 0x6cc   : > { %1623 = vrsqrt.f32 %v1290_v27 }
 0x6d6   : > { %v1624_v28 = vpop.eup %1623 }
 0x6d7   : > { %v1292_v29 = vmul.f32 %v1624_v28, %v1284_v22 }
 0x6d9   : > { %v1300_v31 = vmul.f32 %v1455_v5, %v1292_v29 }
 0x6db   : > { %v1308_v32 = vadd.f32 %v1456_v30, %v1300_v31 }
 0x6dd   : > { %1309 = vst.msk [vmem:[%s541_s18] sm:$0xff] %vm570_vm1, %v1308_v32 }
 0x6de PF: > { %s24_s15 = sadd.s32 1, %s1647_s15   ;;  %s1932_s29 = smov %s1643_s30 }
 0x6df   : > { %p21_p5 = scmp.ge.s32.totalorder %s24_s15, 4   ;;  %s1933_s30 = smov %s1935_s16 }
 0x6e1   :  { %23 = sbr.rel (!%p21_p5) target bundleno = 2 (0x2), region = 115 }

// kernel: transformer_forward.21
= control target key start
LH: loop header
LB: loop body
LE: loop exit
PB: predicated region body
PF: predicated region fallthrough
CT: control target
= control target key end

     0   :  { %v268_v1 = vmov 0   ;;  %vm86_vm0 = vcmask 261120   ;;  %v205_v12 = vlaneseq  ;;  %s346_s1 = inlined_call_operand.vmem [shape: bf16[32,512], index: 1, kind: input, shape index: {}]   ;;  %s347_s0 = inlined_call_operand.vmem [shape: f32[16,32], index: 0, kind: input, shape index: {}]   ;;  %s348_s2 = inlined_call_operand.vmem [shape: f32[1,512], index: 2, kind: input, shape index: {}]   ;;  %s349_s3 = inlined_call_operand.vmem [shape: f32[16,512], index: 3, kind: output, shape index: {}]  }
   0x1   :  { %v256_v0 = vld [vmem:[%s346_s1 + $0x4] ss:$16 sps:$4 sm:$0xff]   ;;  %122 = vmatprep.mubr.bf16.mxu0 %v268_v1  ;;  %165 = vmatprep.mubr.bf16.mxu1 %v268_v1  ;;  %v258_v2 = vld [vmem:[%s346_s1 + $0xc] ss:$16 sps:$4 sm:$0xff]   ;;  %v260_v3 = vld [vmem:[%s346_s1] ss:$16 sps:$4 sm:$0xff]  }
   0x2   :  { %90 = vmatprep.subr.bf16.mxu0 %v256_v0  ;;  %v261_v4 = vld [vmem:[%s346_s1 + $0x8] ss:$16 sps:$4 sm:$0xff]   ;;  %133 = vmatprep.subr.bf16.mxu1 %v258_v2  ;;  %v262_v5 = vld [vmem:[%s346_s1 + $0x24] ss:$16 sps:$4 sm:$0xff]   ;;  %v264_v6 = vld [vmem:[%s346_s1 + $0x2c] ss:$16 sps:$4 sm:$0xff]  }
   0x3   :  { %91 = vmatpush1.bf16.msra.mxu0 %v260_v3  ;;  %134 = vmatpush1.bf16.msra.mxu1 %v261_v4  ;;  %v266_v7 = vld [vmem:[%s346_s1 + $0x20] ss:$16 sps:$4 sm:$0xff]   ;;  %v267_v8 = vld [vmem:[%s346_s1 + $0x28] ss:$16 sps:$4 sm:$0xff]   ;;  %v206_v13 = vshrl.u32 %v205_v12, 7 }
   0x4   :  { %92 = vmatprep.subr.bf16.mxu0 %v262_v5  ;;  %v35_v9 = vld [vmem:[%s347_s0] sm:$0xff]  ;;  %v36_v10 = vld [vmem:[%s347_s0 + $0x8] sm:$0xff]  ;;  %135 = vmatprep.subr.bf16.mxu1 %v264_v6 }
   0x5   :  { %v37_v11 = vpack.c.bf16 %v36_v10, %v35_v9  ;;  %v207_v14 = vsub.s32 0, %v206_v13  ;;  %v215_v15 = vsub.s32 2, %v206_v13  ;;  %v203_v16 = vld [vmem:[%s348_s2] sm:$0xf]  ;;  %v211_v17 = vsub.s32 1, %v206_v13 }
   0x6   :  { %v219_v18 = vsub.s32 3, %v206_v13 }
   0x7   :  { %93 = vmatpush1.bf16.msra.mxu0 %v266_v7  ;;  %136 = vmatpush1.bf16.msra.mxu1 %v267_v8  ;;  %v208_v19 = vrot.slane %v203_v16, %v207_v14  ;;  %v216_v20 = vrot.slane %v203_v16, %v215_v15  ;;  %v212_v21 = vrot.slane %v203_v16, %v211_v17 }
   0x8   :  { %v220_v22 = vrot.slane %v203_v16, %v219_v18 }
   0xa   :  { %253 = vmatmul.mubr.msk.bf16.vlgmr.msra.gmra.mrb[0].mxu0 %vm86_vm0, %v37_v11  ;;  %254 = vmatmul.mubr.msk.bf16.vlgmr.msra.gmra.mrb[0].mxu1 %vm86_vm0, %v37_v11 }
  0xdd   :  { %v124_v23 = vpop.f32.mrb[0].mxu0  ;;  %v167_v24 = vpop.f32.mrb[0].mxu1 }
  0xde   :  { %v225_v25 = vadd.f32 %v208_v19, %v124_v23  ;;  %v227_v26 = vadd.f32 %v216_v20, %v167_v24  ;;  %v126_v27 = vpop.f32.mrb[1].mxu0  ;;  %v169_v28 = vpop.f32.mrb[1].mxu1 }
  0xdf   :  { %v226_v29 = vadd.f32 %v212_v21, %v126_v27  ;;  %v228_v30 = vadd.f32 %v220_v22, %v169_v28  ;;  %v128_v31 = vpop.f32.mrb[2].mxu0  ;;  %v171_v32 = vpop.f32.mrb[2].mxu1 }
  0xe0   :  { %233 = vst [vmem:[%s349_s3] sm:$0xff] %v225_v25  ;;  %235 = vst [vmem:[%s349_s3 + $0x10] sm:$0xff] %v227_v26  ;;  %v229_v33 = vadd.f32 %v208_v19, %v128_v31  ;;  %v231_v34 = vadd.f32 %v216_v20, %v171_v32  ;;  %v130_v35 = vpop.f32.mrb[3].mxu0  ;;  %v173_v36 = vpop.f32.mrb[3].mxu1 }
  0xe1   :  { %234 = vst [vmem:[%s349_s3 + $0x8] sm:$0xff] %v226_v29  ;;  %236 = vst [vmem:[%s349_s3 + $0x18] sm:$0xff] %v228_v30  ;;  %v230_v37 = vadd.f32 %v212_v21, %v130_v35  ;;  %v232_v38 = vadd.f32 %v220_v22, %v173_v36 }
  0xe2   :  { %237 = vst [vmem:[%s349_s3 + $0x20] sm:$0xff] %v229_v33  ;;  %239 = vst [vmem:[%s349_s3 + $0x30] sm:$0xff] %v231_v34 }
  0xe3   :  { %238 = vst [vmem:[%s349_s3 + $0x28] sm:$0xff] %v230_v37  ;;  %240 = vst [vmem:[%s349_s3 + $0x38] sm:$0xff] %v232_v38 }

// kernel: transformer_forward.16
= control target key start
LH: loop header
LB: loop body
LE: loop exit
PB: predicated region body
PF: predicated region fallthrough
CT: control target
= control target key end

     0   :  { %s1601_s21 = smov 0   ;;  %s1603_s22 = smov 0   ;;  %s1776_s0 = inlined_call_operand.vmem [shape: f32[2,8,32], index: 0, kind: input, shape index: {}]   ;;  %s1777_s1 = inlined_call_operand.vmem [shape: f32[2,8,32], index: 1, kind: input, shape index: {}]   ;;  %s1778_s2 = inlined_call_operand.vmem [shape: bf16[32,32], index: 2, kind: input, shape index: {}]   ;;  %s1779_s3 = inlined_call_operand.vmem [shape: f32[1,32], index: 3, kind: input, shape index: {}]   ;;  %s1780_s4 = inlined_call_operand.vmem [shape: bf16[32,32], index: 4, kind: input, shape index: {}]   ;;  %s1781_s5 = inlined_call_operand.vmem [shape: f32[1,32], index: 5, kind: input, shape index: {}]   ;;  %s1782_s6 = inlined_call_operand.vmem [shape: bf16[32,32], index: 6, kind: input, shape index: {}]   ;;  %s1783_s7 = inlined_call_operand.vmem [shape: f32[1,32], index: 7, kind: input, shape index: {}]   ;;  %s1784_s8 = inlined_call_operand.vmem [shape: bf16[32,32], index: 8, kind: input, shape index: {}]   ;;  %s1785_s9 = inlined_call_operand.vmem [shape: f32[1,32], index: 9, kind: input, shape index: {}]   ;;  %s1786_s10 = inlined_call_operand.vmem [shape: f32[1,32], index: 10, kind: input, shape index: {}]   ;;  %s1787_s11 = inlined_call_operand.vmem [shape: f32[1,32], index: 11, kind: input, shape index: {}]   ;;  %s1788_s12 = inlined_call_operand.vmem [shape: f32[2,8,32], index: 12, kind: output, shape index: {}]  }
   0x1   :  { %s1605_s23 = smov 0  }
   0x2 LB: > { %s34_s24 = sadd.s32 1, %s1522_s22  ;;  %p1306_p0 = scmp.ge.s32.totalorder %s1526_s23, 1  ;;  %s1526_s23 = sphi %s1605_s23, %s22_s23   ;;  %s1522_s22 = sphi %s1603_s22, %s1790_s22   ;;  %s1518_s21 = sphi %s1601_s21, %s1789_s21  }
   0x3   : > { %p36_p1 = scmp.ge.s32.totalorder %s34_s24, 2  ;;  %p389_p2 = scmp.lt.s32.totalorder %s1526_s23, 3 }
   0x5   : > { %s1792_s24 = smov (%p36_p1, %s34_s24), 0  ;;  %p390_p3 = pnand %p1306_p0, %p389_p2 }
   0x6   : > { %v1478_v0 = vld [vmem:[%s1778_s2] sm:$0xff] (!%p390_p3)   ;;  %v1528_v1 = vmov (!%p390_p3), 0.0   ;;  %v1480_v3 = vld [vmem:[%s1778_s2 + $0x8] sm:$0xff] (!%p390_p3)   ;;  %vm1529_vm0 = vmmov (!%p390_p3), 0   ;;  %p439_p4 = scmp.lt.s32.totalorder (!%p390_p3), %s1518_s21, 1  ;;  %vm485_vm1 = vcmask (!%p390_p3), 261120  }
   0x7   : > { %393 = sbr.rel (%p390_p3) target bundleno = 1756 (0x6dc), region = 68  ;;  %1366 = vmatprep.subr.bf16.mxu0 (!%p390_p3), %v1528_v1  ;;  %1374 = vmatprep.subr.bf16.mxu1 (!%p390_p3), %v1528_v1  ;;  %v1479_v2 = vld [vmem:[%s1780_s4] sm:$0xff] (!%p390_p3)   ;;  %v1481_v4 = vld [vmem:[%s1780_s4 + $0x8] sm:$0xff] (!%p390_p3)   ;;  %vm682_vm2 = vcmask (!%p390_p3), 64512   ;;  %s1530_s16 = smov (!%p390_p3), 120   ;;  %vm918_vm3 = vcmask (!%p390_p3), 1043456  }
   0x8   : > { %1367 = vmatpush3.bf16.msra.mxu0 (!%p390_p3), %v1478_v0  ;;  %1370 = vmatprep.mubr.msk.bf16.mxu0 (!%p390_p3), %vm1529_vm0, %v1528_v1  ;;  %v1482_v9 = vld [vmem:[%s1782_s6] sm:$0xff] (!%p390_p3)   ;;  %v1483_v10 = vld [vmem:[%s1782_s6 + $0x8] sm:$0xff] (!%p390_p3)   ;;  %s1531_s17 = smov (!%p390_p3), 104   ;;  %s1533_s28 = smov (!%p390_p3), 8   ;;  %vm1113_vm4 = vcmask (!%p390_p3), 130048   ;;  %vm1115_vm5 = vcmask (!%p390_p3), 195584  }
   0x9   : > { %1375 = vmatpush3.bf16.msra.mxu1 (!%p390_p3), %v1479_v2  ;;  %1368 = vmatprep.subr.bf16.mxu0 (!%p390_p3), %v1528_v1  ;;  %v1310_v11 = vld [vmem:[%s1779_s3] ss:$0 sm:$0xff] (!%p390_p3)  ;;  %s1534_s29 = smov (!%p390_p3), 16   ;;  %s1535_s30 = smov (!%p390_p3), 24  }
   0xa   : > { %1376 = vmatprep.subr.bf16.mxu1 (!%p390_p3), %v1528_v1  ;;  %1378 = vmatprep.mubr.msk.bf16.mxu1 (!%p390_p3), %vm1529_vm0, %v1528_v1  ;;  %v1314_v12 = vld [vmem:[%s1781_s5] ss:$0 sm:$0xff] (!%p390_p3) }
   0xb   : > { %v1318_v32 = vld [vmem:[%s1783_s7] ss:$0 sm:$0xff] (!%p390_p3) }
   0xc   : > { %1369 = vmatpush3.bf16.msra.mxu0 (!%p390_p3), %v1480_v3 }
   0xd   : > { %1377 = vmatpush3.bf16.msra.mxu1 (!%p390_p3), %v1481_v4  ;;  %1382 = vmatprep.subr.bf16.mxu0 (!%p390_p3), %v1528_v1 }
   0xe   : > { %s1794_s21 = smov (!%p439_p4, %s1518_s21), 1  ;;  %1390 = vmatprep.subr.bf16.mxu1 %v1528_v1 }
   0xf   : > { %s1639_s15 = sshll.u32 %s1794_s21, 3 }
  0x10   : > { %s445_s18 = scalar_lea.vmem %s1776_s0, %s1639_s15  ;;  %s449_s25 = scalar_lea.vmem %s1777_s1, %s1639_s15 }
  0x11   : > { %v1646_v5 = vld [vmem:[%s445_s18] sm:$0xff]  ;;  %s1532_s18 = smov 112   ;;  %s456_s21 = scalar_lea.vmem %s1788_s12, %s1639_s15 }
  0x12   : > { %v460_v6 = vpack.c.bf16 %v1646_v5, %v1646_v5  ;;  %v459_v7 = vld [vmem:[%s449_s25] sm:$0xff] }
  0x13   : > { %v461_v8 = vpack.c.bf16 %v459_v7, %v459_v7 }
  0x14   : > { %1371 = vmatmul.mubr.msk.bf16.vlgmr.msra.gmra.mrb[0].mxu0 %vm485_vm1, %v460_v6 }
  0x15   : > { %1379 = vmatmul.mubr.msk.bf16.vlgmr.msra.gmra.mrb[0].mxu1 %vm485_vm1, %v461_v8  ;;  %1386 = vmatprep.mubr.msk.bf16.mxu0 %vm1529_vm0, %v1528_v1 }
  0x16   : > { %1392 = vmatprep.mubr.msk.bf16.mxu1 %vm1529_vm0, %v1528_v1  ;;  %1383 = vmatpush3.bf16.msra.mxu0 %v1482_v9 }
  0x17   : > { %1384 = vmatprep.subr.bf16.mxu0 %v1528_v1 }
  0x1a   : > { %1385 = vmatpush3.bf16.msra.mxu0 %v1483_v10 }
  0x1b   : > { %1396 = vmatprep.subr.bf16.mxu0 %v1528_v1 }
  0x1d   : > { %1387 = vmatmul.mubr.msk.bf16.vlgmr.msra.gmra.mrb[4].mxu0 %vm485_vm1, %v461_v8 }
  0x1e   : > { %1398 = vmatprep.mubr.msk.bf16.mxu0 %vm1529_vm0, %v1528_v1 }
  0xe7   : > { %v523_v13 = vpop.f32.mrb[0].mxu0 }
  0xe8   : > { %v524_v14 = vadd.f32 %v1310_v11, %v523_v13  ;;  %v589_v15 = vpop.f32.mrb[0].mxu1  ;;  %v1372_v16 = vpop.f32.mrb[1].mxu0 }
  0xe9   : > { %v590_v17 = vadd.f32 %v1314_v12, %v589_v15  ;;  %v1380_v18 = vpop.f32.mrb[1].mxu1  ;;  %v526_v19 = vpop.f32.mrb[2].mxu0 }
  0xea   : > { %v658_v20 = vpack.c.bf16 %v524_v14, %v524_v14  ;;  %v592_v21 = vpop.f32.mrb[2].mxu1  ;;  %v1373_v22 = vpop.f32.mrb[3].mxu0 }
  0xeb   : > { %v659_v23 = vpack.c.bf16 %v590_v17, %v590_v17  ;;  %v1381_v24 = vpop.f32.mrb[3].mxu1 }
  0xec   : > { %662 = vrot.lane.b32.xlu1 %v658_v20, %s1530_s16 }
  0xed   : > { %669 = vrot.lane.b32.xlu0 %v659_v23, %s1530_s16  ;;  %v687_v25 = vsel %vm682_vm2, %v659_v23, 0 }
  0xee   : > { %1391 = vmatpush3.bf16.xpose.msra.mxu1 %v687_v25 }
  0xef   : > { %1402 = vmatprep.subr.bf16.mxu1 %v1528_v1 }
  0xf0   : > { %673 = vrot.lane.b32.xlu1 %v659_v23, %s1531_s17  ;;  %v652_v26 = vpop.f32.mrb[4].mxu0 }
  0xf1   : > { %671 = vrot.lane.b32.xlu0 %v659_v23, %s1532_s18  ;;  %v1388_v27 = vpop.f32.mrb[5].mxu0  ;;  %v653_v34 = vadd.f32 %v1318_v32, %v652_v26 }
  0xf2   : > { %v655_v28 = vpop.f32.mrb[6].mxu0 }
  0xf3   : > { %v1389_v29 = vpop.f32.mrb[7].mxu0  ;;  %v1695_v38 = vpack.c.bf16 %v653_v34, %v653_v34 }
  0xf4   : > { %666 = vrot.lane.b32.xlu1 %v658_v20, %s1531_s17 }
  0xf5   : > { %664 = vrot.lane.b32.xlu0 %v658_v20, %s1532_s18  ;;  %1393 = vmatmul.mubr.msk.bf16.vlgmr.msra.gmra.mrb[4].mxu1 %vm682_vm2, %v658_v20  ;;  %v920_v40 = vsel %vm918_vm3, %v1695_v38, 0 }
  0xf6   : > { %1404 = vmatprep.mubr.msk.bf16.mxu1 %vm1529_vm0, %v1528_v1 }
 0x15e   : > { %v663_v31 = vpop.permute.xlu1 %662 }
 0x15f   : > { %v670_v30 = vpop.permute.xlu0 %669 }
 0x160   : > { %v733_v33 = vsel %vm682_vm2, %v670_v30, 0 }
 0x161   : > { %1397 = vmatpush3.bf16.xpose.msra.mxu0 %v733_v33 }
 0x162   : > { %1408 = vmatprep.subr.bf16.mxu0 %v1528_v1  ;;  %v674_v37 = vpop.permute.xlu1 %673 }
 0x163   : > { %v672_v35 = vpop.permute.xlu0 %671  ;;  %v825_v39 = vsel %vm682_vm2, %v674_v37, 0 }
 0x164   : > { %v779_v36 = vsel %vm682_vm2, %v672_v35, 0 }
 0x165   : > { %1403 = vmatpush3.bf16.xpose.msra.mxu1 %v779_v36 }
 0x166   : > { %1414 = vmatprep.subr.bf16.mxu1 %v1528_v1  ;;  %v667_v42 = vpop.permute.xlu1 %666 }
 0x167   : > { %v665_v41 = vpop.permute.xlu0 %664 }
 0x168   : > { %1399 = vmatmul.mubr.msk.bf16.vlgmr.msra.gmra.mrb[8].mxu0 %vm682_vm2, %v663_v31 }
 0x169   : > { %1409 = vmatpush3.bf16.xpose.msra.mxu0 %v825_v39  ;;  %1410 = vmatprep.mubr.msk.bf16.mxu0 %vm1529_vm0, %v1528_v1 }
 0x16a   : > { %1420 = vmatprep.subr.bf16.mxu0 %v1528_v1 }
 0x16c   : > { %1405 = vmatmul.mubr.msk.bf16.vlgmr.msra.gmra.mrb[8].mxu1 %vm682_vm2, %v665_v41 }
 0x16d   : > { %1415 = vmatpush3.bf16.msra.mxu1 %v920_v40  ;;  %1416 = vmatprep.mubr.msk.bf16.mxu1 %vm1529_vm0, %v1528_v1 }
 0x16e   : > { %1426 = vmatprep.subr.bf16.mxu1 %v1528_v1 }
 0x170   : > { %1411 = vmatmul.mubr.msk.bf16.vlgmr.msra.gmra.mrb[12].mxu0 %vm682_vm2, %v667_v42 }
 0x171   : > { %1422 = vmatprep.mubr.msk.bf16.mxu0 %vm1529_vm0, %v1528_v1 }
 0x1c8   : > { %v723_v43 = vpop.f32.mrb[4].mxu1 }
 0x1c9   : > { %v1394_v44 = vpop.f32.mrb[5].mxu1  ;;  %v867_v45 = vsel %vm682_vm2, %v723_v43, -inf }
 0x1ca   : > { %868 = vmax.xlane.f32.xlu0 %v867_v45  ;;  %v726_v46 = vpop.f32.mrb[6].mxu1 }
 0x1cb   : > { %v1395_v47 = vpop.f32.mrb[7].mxu1 }
 0x1cc   : > { %v1484_v47 = vld [vmem:[%s1784_s8] sm:$0xff]  }
 0x23b   : > { %v769_v48 = vpop.f32.mrb[8].mxu0 }
 0x23c   : > { %v1400_v49 = vpop.f32.mrb[9].mxu0  ;;  %v870_v50 = vsel %vm682_vm2, %v769_v48, -inf }
 0x23d   : > { %871 = vmax.xlane.f32.xlu1 %v870_v50  ;;  %v772_v51 = vpop.f32.mrb[10].mxu0 }
 0x23e   : > { %v1401_v52 = vpop.f32.mrb[11].mxu0 }
 0x23f   : > { %v815_v53 = vpop.f32.mrb[8].mxu1 }
 0x240   : > { %v1406_v54 = vpop.f32.mrb[9].mxu1  ;;  %v873_v55 = vsel %vm682_vm2, %v815_v53, -inf }
 0x241   : > { %874 = vmax.xlane.f32.xlu0 %v873_v55  ;;  %v818_v56 = vpop.f32.mrb[10].mxu1 }
 0x242   : > { %v1407_v57 = vpop.f32.mrb[11].mxu1 }
 0x243   : > { %v861_v58 = vpop.f32.mrb[12].mxu0 }
 0x244   : > { %v1412_v59 = vpop.f32.mrb[13].mxu0  ;;  %v876_v60 = vsel %vm682_vm2, %v861_v58, -inf }
 0x245   : > { %877 = vmax.xlane.f32.xlu0 %v876_v60  ;;  %v864_v61 = vpop.f32.mrb[14].mxu0 }
 0x246   : > { %v1413_v62 = vpop.f32.mrb[15].mxu0 }
 0x24e   : > { %676 = vrot.lane.b32.xlu1 %v1695_v38, %s1530_s16 }
 0x257   : > { %v869_v63 = vpop.xlane.xlu0 %868 }
 0x258   : > { %v879_v0 = vsub.f32 %v723_v43, %v869_v63 }
 0x25a   : > { %v883_v2 = vmul.f32 1.442695, %v879_v0 }
 0x25c   : > { %1486 = vpow2.f32 %v883_v2 }
 0x266   : > { %v1487_v3 = vpop.eup %1486 }
 0x267   : > { %v891_v4 = vsel %vm682_vm2, %v1487_v3, 0.0 }
 0x272   : > { %892 = vadd.xlane.f32.xlu1 %v891_v4  ;;  %v1330_v4 = vld [vmem:[%s1785_s9] ss:$0 sm:$0xff] }
 0x2ca   : > { %v872_v6 = vpop.xlane.xlu1 %871 }
 0x2cb   : > { %v880_v7 = vsub.f32 %v769_v48, %v872_v6  ;;  %v1485_v48 = vld [vmem:[%s1784_s8 + $0x8] sm:$0xff]  }
 0x2cd   : > { %v885_v8 = vmul.f32 1.442695, %v880_v7 }
 0x2ce   : > { %v875_v9 = vpop.xlane.xlu0 %874  ;;  %v677_v10 = vpop.permute.xlu1 %676 }
 0x2cf   : > { %1488 = vpow2.f32 %v885_v8  ;;  %v881_v11 = vsub.f32 %v815_v53, %v875_v9  ;;  %v966_v12 = vsel %vm918_vm3, %v677_v10, 0 }
 0x2d0   : > { %1421 = vmatpush3.bf16.msra.mxu0 %v966_v12 }
 0x2d1   : > { %v887_v13 = vmul.f32 1.442695, %v881_v11  ;;  %1432 = vmatprep.subr.bf16.mxu0 %v1528_v1 }
 0x2d2   : > { %v878_v14 = vpop.xlane.xlu0 %877 }
 0x2d3   : > { %1490 = vpow2.f32 %v887_v13  ;;  %v882_v15 = vsub.f32 %v861_v58, %v878_v14 }
 0x2d5   : > { %v889_v16 = vmul.f32 1.442695, %v882_v15 }
 0x2d7   : > { %1492 = vpow2.f32 %v889_v16 }
 0x2d9   : > { %v1489_v17 = vpop.eup %1488 }
 0x2da   : > { %v894_v18 = vsel %vm682_vm2, %v1489_v17, 0.0 }
 0x2db   : > { %895 = vadd.xlane.f32.xlu0 %v894_v18 }
 0x2dd   : > { %v1491_v19 = vpop.eup %1490 }
 0x2de   : > { %v897_v20 = vsel %vm682_vm2, %v1491_v19, 0.0 }
 0x2df   : > { %898 = vadd.xlane.f32.xlu1 %v897_v20 }
 0x2e1   : > { %v1493_v21 = vpop.eup %1492 }
 0x2e2   : > { %v900_v22 = vsel %vm682_vm2, %v1493_v21, 0.0 }
 0x2e3   : > { %901 = vadd.xlane.f32.xlu0 %v900_v22 }
 0x2f0   : > { %680 = vrot.lane.b32.xlu1 %v1695_v38, %s1531_s17 }
 0x2f9   : > { %678 = vrot.lane.b32.xlu0 %v1695_v38, %s1532_s18 }
 0x2ff   : > { %v893_v23 = vpop.xlane.xlu1 %892 }
 0x300   : > { %1494 = vrcp.f32 %v893_v23  ;;  %v1335_v23 = vld [vmem:[%s1787_s11] ss:$0 sm:$0xff] }
 0x30a   : > { %v1495_v24 = vpop.eup %1494 }
 0x30b   : > { %v907_v25 = vmul.f32 %v1495_v24, %v1487_v3 }
 0x30d   : > { %v911_v26 = vpack.c.bf16 %v907_v25, %v907_v25 }
 0x30f   : > { %1417 = vmatmul.mubr.msk.bf16.vlgmr.msra.gmra.mrb[12].mxu1 %vm682_vm2, %v911_v26 }
 0x310   : > { %1428 = vmatprep.mubr.msk.bf16.mxu1 %vm1529_vm0, %v1528_v1 }
 0x368   : > { %v896_v27 = vpop.xlane.xlu0 %895 }
 0x369   : > { %1496 = vrcp.f32 %v896_v27 }
 0x36c   : > { %v899_v28 = vpop.xlane.xlu1 %898 }
 0x36d   : > { %1498 = vrcp.f32 %v899_v28 }
 0x370   : > { %v902_v29 = vpop.xlane.xlu0 %901  ;;  %v681_v33 = vpop.permute.xlu1 %680 }
 0x371   : > { %1500 = vrcp.f32 %v902_v29  ;;  %v1058_v38 = vsel %vm918_vm3, %v681_v33, 0 }
 0x373   : > { %v1497_v30 = vpop.eup %1496 }
 0x374   : > { %v908_v31 = vmul.f32 %v1497_v30, %v1489_v17  ;;  %v679_v32 = vpop.permute.xlu0 %678 }
 0x375   : > { %v1012_v34 = vsel %vm918_vm3, %v679_v32, 0 }
 0x376   : > { %1427 = vmatpush3.bf16.msra.mxu1 %v1012_v34  ;;  %v912_v35 = vpack.c.bf16 %v908_v31, %v908_v31 }
 0x377   : > { %v1499_v36 = vpop.eup %1498  ;;  %1438 = vmatprep.subr.bf16.mxu1 %v1528_v1 }
 0x378   : > { %v909_v37 = vmul.f32 %v1499_v36, %v1491_v19  ;;  %1423 = vmatmul.mubr.msk.bf16.vlgmr.msra.gmra.mrb[16].mxu0 %vm682_vm2, %v912_v35 }
 0x379   : > { %1433 = vmatpush3.bf16.msra.mxu0 %v1058_v38  ;;  %1434 = vmatprep.mubr.msk.bf16.mxu0 %vm1529_vm0, %v1528_v1 }
 0x37a   : > { %v913_v39 = vpack.c.bf16 %v909_v37, %v909_v37 }
 0x37b   : > { %v1501_v40 = vpop.eup %1500 }
 0x37c   : > { %v910_v41 = vmul.f32 %v1501_v40, %v1493_v21  ;;  %1429 = vmatmul.mubr.msk.bf16.vlgmr.msra.gmra.mrb[16].mxu1 %vm682_vm2, %v913_v39 }
 0x37d   : > { %1442 = vmatprep.mubr.msk.bf16.mxu1 %vm1529_vm0, %v1528_v1  ;;  %1439 = vmatpush3.bf16.msra.mxu1 %v1484_v47 }
 0x37e   : > { %v914_v42 = vpack.c.bf16 %v910_v41, %v910_v41  ;;  %1440 = vmatprep.subr.bf16.mxu1 %v1528_v1 }
 0x380   : > { %1435 = vmatmul.mubr.msk.bf16.vlgmr.msra.gmra.mrb[20].mxu0 %vm682_vm2, %v914_v42 }
 0x381   : > { %1441 = vmatpush3.bf16.msra.mxu1 %v1485_v48 }
 0x3e2   : > { %v956_v43 = vpop.f32.mrb[12].mxu1 }
 0x3e3   : > { %v1418_v44 = vpop.f32.mrb[13].mxu1 }
 0x3e4   : > { %v959_v45 = vpop.f32.mrb[14].mxu1 }
 0x3e5   : > { %v1419_v46 = vpop.f32.mrb[15].mxu1 }
 0x44b   : > { %v1002_v49 = vpop.f32.mrb[16].mxu0 }
 0x44c   : > { %1101 = vrot.lane.b32.xlu1 %v1002_v49, %s1533_s28  ;;  %v1424_v50 = vpop.f32.mrb[17].mxu0 }
 0x44d   : > { %v1005_v51 = vpop.f32.mrb[18].mxu0 }
 0x44e   : > { %v1425_v52 = vpop.f32.mrb[19].mxu0 }
 0x44f   : > { %v1048_v53 = vpop.f32.mrb[16].mxu1 }
 0x450   : > { %1105 = vrot.lane.b32.xlu0 %v1048_v53, %s1534_s29  ;;  %v1430_v54 = vpop.f32.mrb[17].mxu1 }
 0x451   : > { %v1051_v55 = vpop.f32.mrb[18].mxu1 }
 0x452   : > { %v1431_v56 = vpop.f32.mrb[19].mxu1 }
 0x453   : > { %v1094_v57 = vpop.f32.mrb[20].mxu0 }
 0x454   : > { %1109 = vrot.lane.b32.xlu1 %v1094_v57, %s1535_s30  ;;  %v1436_v1 = vpop.f32.mrb[21].mxu0 }
 0x455   : > { %v1097_v58 = vpop.f32.mrb[22].mxu0 }
 0x456   : > { %v1437_v59 = vpop.f32.mrb[23].mxu0 }
 0x4be   : > { %v1102_v60 = vpop.permute.xlu1 %1101 }
 0x4bf   : > { %v1112_v62 = vsel %vm682_vm2, %v956_v43, %v1102_v60 }
 0x4c2   : > { %v1106_v61 = vpop.permute.xlu0 %1105 }
 0x4c3   : > { %v1114_v63 = vsel %vm1113_vm4, %v1112_v62, %v1106_v61 }
 0x4c6   : > { %v1110_v0 = vpop.permute.xlu1 %1109 }
 0x4c7   : > { %v1116_v2 = vsel %vm1115_vm5, %v1114_v63, %v1110_v0 }
 0x4c8   : > { %v1117_v3 = vpack.c.bf16 %v1116_v2, %v1116_v2 }
 0x4ca   : > { %1443 = vmatmul.mubr.msk.bf16.vlgmr.msra.gmra.mrb[20].mxu1 %vm485_vm1, %v1117_v3 }
 0x59d   : > { %v1178_v6 = vpop.f32.mrb[20].mxu1 }
 0x59e   : > { %v1179_v7 = vadd.f32 %v1330_v4, %v1178_v6  ;;  %v1444_v8 = vpop.f32.mrb[21].mxu1 }
 0x59f   : > { %v1181_v9 = vpop.f32.mrb[22].mxu1 }
 0x5a0   : > { %v1445_v10 = vpop.f32.mrb[23].mxu1  ;;  %v1184_v11 = vadd.f32 %v1179_v7, %v1646_v5  ;;  %v1334_v5 = vld [vmem:[%s1786_s10] ss:$0 sm:$0xff] }
 0x5a2   : > { %v1185_v12 = vsel %vm485_vm1, %v1184_v11, 0.0 }
 0x5a3   : > { %1186 = vadd.xlane.f32.xlu0 %v1185_v12 }
 0x630   : > { %v1187_v13 = vpop.xlane.xlu0 %1186 }
 0x631   : > { %v1189_v14 = vmul.f32 0.03125, %v1187_v13 }
 0x633   : > { %v1190_v15 = vsub.f32 %v1184_v11, %v1189_v14 }
 0x635   : > { %v1191_v16 = vmul.f32 %v1190_v15, %v1190_v15 }
 0x637   : > { %v1192_v17 = vsel %vm485_vm1, %v1191_v16, 0.0 }
 0x638   : > { %1193 = vadd.xlane.f32.xlu1 %v1192_v17 }
 0x6c5   : > { %v1194_v18 = vpop.xlane.xlu1 %1193 }
 0x6c6   : > { %v1195_v19 = vmul.f32 0.03125, %v1194_v18 }
 0x6c8   : > { %v1196_v20 = vadd.f32 1e-05, %v1195_v19 }
 0x6ca   : > { %1502 = vrsqrt.f32 %v1196_v20 }
 0x6d4   : > { %v1503_v21 = vpop.eup %1502 }
 0x6d5   : > { %v1198_v22 = vmul.f32 %v1503_v21, %v1190_v15 }
 0x6d7   : > { %v1206_v24 = vmul.f32 %v1334_v5, %v1198_v22 }
 0x6d9   : > { %v1214_v25 = vadd.f32 %v1335_v23, %v1206_v24 }
 0x6db   : > { %1215 = vst.msk [vmem:[%s456_s21] sm:$0xff] %vm485_vm1, %v1214_v25 }
 0x6dc PF: > { %s22_s23 = sadd.s32 1, %s1526_s23   ;;  %s1789_s21 = smov %s1522_s22 }
 0x6dd   : > { %p19_p5 = scmp.ge.s32.totalorder %s22_s23, 4   ;;  %s1790_s22 = smov %s1792_s24 }
 0x6df   :  { %21 = sbr.rel (!%p19_p5) target bundleno = 2 (0x2), region = 101 }

</bundles_post_ra>
